<compile_context>
chip_gen: v7x
topology: tpu7x:2x2x1
jax: 0.10.0
libtpu: 0.0.40
codegen_flags: <defaults>
</compile_context>

<pallas_src>
import functools

import jax
import jax.numpy as jnp
from jax import lax
from jax.experimental import pallas as pl
from jax.experimental.pallas import tpu as pltpu


def _vq_kernel(z_ref, e_ref, e2h_ref, zq_ref, idx_ref, sse_ref, *,
               n_valid, tile_n, needs_mask, use_bf16_matmul):
    """One grid step processes a (tile_n, D) tile of flattened z vectors."""
    i = pl.program_id(0)

    z = z_ref[...].astype(jnp.float32)           # (TN, D)
    e = e_ref[...].astype(jnp.float32)           # (K, D)
    e2h = e2h_ref[...]                           # (1, K)  precomputed 0.5*||e||^2
    tn, d = z.shape
    k = e.shape[0]

    # score = 0.5*||e||^2 - z.e ; per-row ||z||^2 dropped and everything scaled
    # by the power of two 0.5 -> exact same argmin and ties as the full distance.
    if use_bf16_matmul:
        ze = lax.dot_general(z.astype(jnp.bfloat16), e.astype(jnp.bfloat16),
                             (((1,), (1,)), ((), ())),
                             preferred_element_type=jnp.float32)    # (TN, K)
    else:
        ze = lax.dot_general(z, e, (((1,), (1,)), ((), ())),
                             preferred_element_type=jnp.float32)    # (TN, K)
    score = e2h - ze

    # First-occurrence argmin over the codebook axis (matches torch.argmin).
    iota_k = lax.broadcasted_iota(jnp.int32, (tn, k), 1)
    min_s = jnp.min(score, axis=1, keepdims=True)                   # (TN, 1)
    idx_col = jnp.min(jnp.where(score == min_s, iota_k, k),
                      axis=1, keepdims=True)                        # (TN, 1) int32

    # Lane-dense index output: tiny (TN,1)->(1,TN) transpose rides the XLU slot
    # (no second pass of one_hot through the MXU).
    idx_ref[...] = jnp.transpose(idx_col).reshape(1, 1, tn)

    # Exact one-hot gather z_q = one_hot @ E on the MXU (kept f32 so z_q is
    # bit-faithful to the f32 codebook even when the score matmul is bf16).
    one_hot = (iota_k == idx_col).astype(jnp.float32)               # (TN, K)
    z_q = jnp.dot(one_hot, e, preferred_element_type=jnp.float32)   # (TN, D)
    zq_ref[...] = z_q.astype(zq_ref.dtype)

    diff = z_q - z

    def _write_sse(dd):
        sse_ref[...] = jnp.sum(dd * dd, axis=0, keepdims=True).reshape(1, 1, d)

    if needs_mask:  # static: only emitted when N % tile_n != 0
        last = pl.num_programs(0) - 1

        @pl.when(i < last)
        def _full_tile():
            _write_sse(diff)

        @pl.when(i == last)
        def _partial_tile():
            # jnp.where (not multiply) so garbage/NaN padding rows cannot leak.
            row_ids = lax.broadcasted_iota(jnp.int32, (tn, 1), 0) + i * tile_n
            _write_sse(jnp.where(row_ids < n_valid, diff, 0.0))
    else:
        _write_sse(diff)


def vector_quantizer(z, embeddings, commitment_cost, *, tile_n=512,
                     use_bf16_matmul=False,
                     vmem_limit_bytes=48 * 1024 * 1024):
    """Pallas forward pass of VectorQuantizer.

    Args:
      z: (B, H, W, D) float32, channels-last (D == embedding_dim).
      embeddings: (K, D) float32 codebook.
      tile_n: rows of flattened z per grid step (multiple of 8; multiples of
        128 recommended; sweep 512/1024 per generation / VMEM budget).
      use_bf16_matmul: opt-in bf16 score matmul (faster, may flip near-ties).
    Returns:
      z_q (same shape as z), loss (scalar), encoding_indices (N, 1) int32,
      embedding_usage (scalar).
    """
    K, D = embeddings.shape
    assert z.shape[-1] == D, "z last dim must equal embedding_dim"
    assert tile_n % 8 == 0, "tile_n must be a multiple of 8"

    z_flat = z.reshape(-1, D).astype(jnp.float32)
    N = z_flat.shape[0]
    num_tiles = (N + tile_n - 1) // tile_n
    needs_mask = (N % tile_n) != 0               # no pad copy: masked tail tile

    e = embeddings.astype(jnp.float32)
    e2_half = (0.5 * jnp.sum(e * e, axis=1))[None, :]   # (1, K), hoisted

    kernel = functools.partial(
        _vq_kernel,
        n_valid=N,
        tile_n=tile_n,
        needs_mask=needs_mask,
        use_bf16_matmul=use_bf16_matmul,
    )

    out_shapes = (
        jax.ShapeDtypeStruct((N, D), jnp.float32),                # z_q (flattened)
        jax.ShapeDtypeStruct((num_tiles, 1, tile_n), jnp.int32),  # indices (lane-dense)
        jax.ShapeDtypeStruct((num_tiles, 1, D), jnp.float32),     # per-tile partial SSE
    )

    grid_spec = pltpu.PrefetchScalarGridSpec(
        num_scalar_prefetch=0,
        grid=(num_tiles,),
        in_specs=[
            pl.BlockSpec((tile_n, D), lambda i: (i, 0)),           # z tile
            pl.BlockSpec((K, D), lambda i: (0, 0),
                         pipeline_mode=pl.Buffered(1)),            # codebook (constant)
            pl.BlockSpec((1, K), lambda i: (0, 0),
                         pipeline_mode=pl.Buffered(1)),            # 0.5*||e||^2 (constant)
        ],
        out_specs=[
            pl.BlockSpec((tile_n, D), lambda i: (i, 0)),
            pl.BlockSpec((1, 1, tile_n), lambda i: (i, 0, 0)),
            pl.BlockSpec((1, 1, D), lambda i: (i, 0, 0)),
        ],
    )

    cost = pl.CostEstimate(
        flops=int(4 * N * K * D),                       # score matmul + one-hot gather
        transcendentals=0,
        bytes_accessed=int(2 * N * D * 4 + K * D * 4 + N * 4 + num_tiles * D * 4),
    )

    zq_flat, idx, sse = pl.pallas_call(
        kernel,
        out_shape=out_shapes,
        grid_spec=grid_spec,
        compiler_params=pltpu.CompilerParams(
            # All output blocks are per-tile -> no cross-step state -> the tile
            # axis is truly parallel (uses both TCs on v7x, harmless elsewhere).
            dimension_semantics=("parallel",),
            vmem_limit_bytes=vmem_limit_bytes),
        cost_estimate=cost,
    )(z_flat, e, e2_half)

    z_q = zq_flat.reshape(z.shape)
    idx_flat = idx.reshape(-1)[:N]                       # drop padded tail entries
    encoding_indices = idx_flat[:, None]

    # Finalize scalars in the wrapper (tiny reductions over num_tiles*D / N).
    loss = (1.0 + float(commitment_cost)) * jnp.sum(sse) / float(N * D)
    present = jnp.zeros((K,), jnp.float32).at[idx_flat].set(1.0)
    embedding_usage = jnp.sum(present) / float(K)
    return z_q, loss, encoding_indices, embedding_usage


def _reference(z, embeddings, commitment_cost):
    """Pure-JAX reference matching the PyTorch forward values."""
    K, D = embeddings.shape
    zf = z.reshape(-1, D)
    dist = (jnp.sum(zf ** 2, axis=1, keepdims=True)
            + jnp.sum(embeddings ** 2, axis=1)
            - 2.0 * zf @ embeddings.T)
    idx = jnp.argmin(dist, axis=1)
    z_q = embeddings[idx].reshape(z.shape)
    loss = (1.0 + commitment_cost) * jnp.mean((z_q - z) ** 2)
    usage = jnp.unique(idx).shape[0] / K
    return z_q, loss, idx[:, None].astype(jnp.int32), usage


if __name__ == "__main__":
    # Small synthetic problem: N = 2*20*16 = 640 = 512 + 128, so with the
    # default tile_n=512 this exercises both multi-tile execution and the
    # masked (partial) tail-tile path.
    B, H, W = 2, 20, 16
    num_embeddings, embedding_dim, commitment_cost = 64, 32, 0.25

    key = jax.random.PRNGKey(0)
    kz, ke = jax.random.split(key)
    z = jax.random.normal(kz, (B, H, W, embedding_dim), dtype=jnp.float32)
    # nn.Embedding weight init: uniform(-1/K, 1/K), deterministic here.
    embeddings = jax.random.uniform(
        ke, (num_embeddings, embedding_dim), dtype=jnp.float32,
        minval=-1.0 / num_embeddings, maxval=1.0 / num_embeddings)

    z_q, loss, encoding_indices, usage = vector_quantizer(
        z, embeddings, commitment_cost)
    jax.block_until_ready((z_q, loss, encoding_indices, usage))

    # Sanity check against a pure-JAX reference of the same math.
    zq_ref, loss_ref, idx_ref, usage_ref = _reference(
        z, embeddings, commitment_cost)
    assert z_q.shape == z.shape
    assert encoding_indices.shape == (B * H * W, 1)
    assert jnp.allclose(z_q, zq_ref, atol=1e-5)
    assert jnp.allclose(loss, loss_ref, atol=1e-5, rtol=1e-5)
    assert jnp.array_equal(encoding_indices, idx_ref)
    assert abs(float(usage) - float(usage_ref)) < 1e-6

    print("KERNEL_OK")
</pallas_src>

<mosaic_0001>
module attributes {stable_mosaic.version = 11 : i64} {
  func.func @_vq_kernel(%arg0: i32, %arg1: memref<512x32xf32, #tpu.memory_space<vmem>>, %arg2: memref<64x32xf32, #tpu.memory_space<vmem>>, %arg3: memref<1x64xf32, #tpu.memory_space<vmem>>, %arg4: memref<512x32xf32, #tpu.memory_space<vmem>>, %arg5: memref<1x1x512xi32, #tpu.memory_space<vmem>>, %arg6: memref<1x1x32xf32, #tpu.memory_space<vmem>>) attributes {dimension_semantics = [#tpu.dimension_semantics<parallel>], iteration_bounds = array<i64: 2>, scalar_prefetch = 0 : i64, scratch_operands = 0 : i64, tpu.core_type = #tpu.core_type<tc>, window_params = [{transform_indices = @transform_0, window_bounds = array<i64: 512, 32>}, {pipeline_mode = #tpu.pipeline_mode<synchronous>, transform_indices = @transform_1, window_bounds = array<i64: 64, 32>}, {pipeline_mode = #tpu.pipeline_mode<synchronous>, transform_indices = @transform_2, window_bounds = array<i64: 1, 64>}, {transform_indices = @transform_3, window_bounds = array<i64: 512, 32>}, {transform_indices = @transform_4, window_bounds = array<i64: 1, 1, 512>}, {transform_indices = @transform_5, window_bounds = array<i64: 1, 1, 32>}]} {
    %c0 = arith.constant 0 : index
    %c0_0 = arith.constant 0 : index
    %0 = vector.load %arg1[%c0, %c0_0] : memref<512x32xf32, #tpu.memory_space<vmem>>, vector<512x32xf32>
    %c0_1 = arith.constant 0 : index
    %c0_2 = arith.constant 0 : index
    %1 = vector.load %arg2[%c0_1, %c0_2] : memref<64x32xf32, #tpu.memory_space<vmem>>, vector<64x32xf32>
    %c0_3 = arith.constant 0 : index
    %c0_4 = arith.constant 0 : index
    %2 = vector.load %arg3[%c0_3, %c0_4] : memref<1x64xf32, #tpu.memory_space<vmem>>, vector<1x64xf32>
    %cst = arith.constant dense<0.000000e+00> : vector<512x64xf32>
    %3 = tpu.matmul %0, %1, %cst {dimension_numbers = #tpu.dot_dimension_numbers<[1], [1], [0], [0], [0, 0, 1, 0], [], []>} : vector<512x32xf32>, vector<64x32xf32>, vector<512x64xf32> -> vector<512x64xf32>
    %4 = vector.broadcast %2 : vector<1x64xf32> to vector<512x64xf32>
    %5 = arith.subf %4, %3 : vector<512x64xf32>
    %6 = tpu.iota {dimensions = array<i32: 1>} : vector<512x64xi32>
    %cst_5 = arith.constant dense<0x7F800000> : vector<512xf32>
    %7 = vector.multi_reduction <minimumf>, %5, %cst_5 [1] : vector<512x64xf32> to vector<512xf32>
    %8 = vector.shape_cast %7 : vector<512xf32> to vector<512x1xf32>
    %9 = vector.broadcast %8 : vector<512x1xf32> to vector<512x64xf32>
    %10 = arith.cmpf oeq, %5, %9 : vector<512x64xf32>
    %c64_i32 = arith.constant 64 : i32
    %11 = vector.broadcast %c64_i32 : i32 to vector<512x64xi32>
    %12 = arith.select %10, %6, %11 : vector<512x64xi1>, vector<512x64xi32>
    %cst_6 = arith.constant dense<2147483647> : vector<512xi32>
    %13 = vector.multi_reduction <minsi>, %12, %cst_6 [1] : vector<512x64xi32> to vector<512xi32>
    %14 = vector.shape_cast %13 : vector<512xi32> to vector<512x1xi32>
    %15 = tpu.transpose %14, [1, 0] : vector<512x1xi32> -> vector<1x512xi32>
    %16 = vector.shape_cast %15 : vector<1x512xi32> to vector<1x1x512xi32>
    %c0_7 = arith.constant 0 : index
    %c0_8 = arith.constant 0 : index
    %c0_9 = arith.constant 0 : index
    %17 = vector.load %arg5[%c0_7, %c0_8, %c0_9] : memref<1x1x512xi32, #tpu.memory_space<vmem>>, vector<1x1x512xi32>
    tpu.vector_store %arg5[%c0_7, %c0_8, %c0_9], %16 {strides = array<i32>} : memref<1x1x512xi32, #tpu.memory_space<vmem>>, vector<1x1x512xi32>,
    %18 = vector.broadcast %14 : vector<512x1xi32> to vector<512x64xi32>
    %19 = arith.cmpi eq, %6, %18 : vector<512x64xi32>
    %20 = arith.extui %19 : vector<512x64xi1> to vector<512x64xi32>
    %21 = arith.sitofp %20 : vector<512x64xi32> to vector<512x64xf32>
    %cst_10 = arith.constant dense<0.000000e+00> : vector<512x32xf32>
    %22 = tpu.matmul %21, %1, %cst_10 {dimension_numbers = #tpu.dot_dimension_numbers<[1], [0], [0], [1], [0, 0, 1, 1], [], []>} : vector<512x64xf32>, vector<64x32xf32>, vector<512x32xf32> -> vector<512x32xf32>
    %c0_11 = arith.constant 0 : index
    %c0_12 = arith.constant 0 : index
    %23 = vector.load %arg4[%c0_11, %c0_12] : memref<512x32xf32, #tpu.memory_space<vmem>>, vector<512x32xf32>
    tpu.vector_store %arg4[%c0_11, %c0_12], %22 {strides = array<i32>} : memref<512x32xf32, #tpu.memory_space<vmem>>, vector<512x32xf32>,
    %24 = arith.subf %22, %0 : vector<512x32xf32>
    %c1_i32 = arith.constant 1 : i32
    %25 = arith.cmpi slt, %arg0, %c1_i32 : i32
    %26 = arith.extui %25 : i1 to i32
    %c0_i32 = arith.constant 0 : i32
    %27 = arith.cmpi ne, %26, %c0_i32 : i32
    scf.if %27 {
      %31 = arith.mulf %24, %24 : vector<512x32xf32>
      %cst_15 = arith.constant dense<0.000000e+00> : vector<32xf32>
      %32 = vector.multi_reduction <add>, %31, %cst_15 [0] : vector<512x32xf32> to vector<32xf32>
      %33 = vector.shape_cast %32 : vector<32xf32> to vector<1x32xf32>
      %34 = vector.shape_cast %33 : vector<1x32xf32> to vector<1x1x32xf32>
      %c0_16 = arith.constant 0 : index
      %c0_17 = arith.constant 0 : index
      %c0_18 = arith.constant 0 : index
      %35 = vector.load %arg6[%c0_16, %c0_17, %c0_18] : memref<1x1x32xf32, #tpu.memory_space<vmem>>, vector<1x1x32xf32>
      tpu.vector_store %arg6[%c0_16, %c0_17, %c0_18], %34 {strides = array<i32>} : memref<1x1x32xf32, #tpu.memory_space<vmem>>, vector<1x1x32xf32>,
    } else {
    }
    %c1_i32_13 = arith.constant 1 : i32
    %28 = arith.cmpi eq, %arg0, %c1_i32_13 : i32
    %29 = arith.extui %28 : i1 to i32
    %c0_i32_14 = arith.constant 0 : i32
    %30 = arith.cmpi ne, %29, %c0_i32_14 : i32
    scf.if %30 {
      %31 = tpu.iota {dimensions = array<i32: 0>} : vector<512x1xi32>
      %c512_i32 = arith.constant 512 : i32
      %32 = arith.muli %arg0, %c512_i32 : i32
      %33 = vector.broadcast %32 : i32 to vector<512x1xi32>
      %34 = arith.addi %31, %33 : vector<512x1xi32>
      %c640_i32 = arith.constant 640 : i32
      %35 = vector.broadcast %c640_i32 : i32 to vector<512x1xi32>
      %36 = arith.cmpi slt, %34, %35 : vector<512x1xi32>
      %cst_15 = arith.constant 0.000000e+00 : f32
      %37 = vector.shape_cast %36 : vector<512x1xi1> to vector<512x1xi1>
      %38 = vector.broadcast %37 : vector<512x1xi1> to vector<512x32xi1>
      %39 = vector.broadcast %cst_15 : f32 to vector<512x32xf32>
      %40 = arith.select %38, %24, %39 : vector<512x32xi1>, vector<512x32xf32>
      %41 = arith.mulf %40, %40 : vector<512x32xf32>
      %cst_16 = arith.constant dense<0.000000e+00> : vector<32xf32>
      %42 = vector.multi_reduction <add>, %41, %cst_16 [0] : vector<512x32xf32> to vector<32xf32>
      %43 = vector.shape_cast %42 : vector<32xf32> to vector<1x32xf32>
      %44 = vector.shape_cast %43 : vector<1x32xf32> to vector<1x1x32xf32>
      %c0_17 = arith.constant 0 : index
      %c0_18 = arith.constant 0 : index
      %c0_19 = arith.constant 0 : index
      %45 = vector.load %arg6[%c0_17, %c0_18, %c0_19] : memref<1x1x32xf32, #tpu.memory_space<vmem>>, vector<1x1x32xf32>
      tpu.vector_store %arg6[%c0_17, %c0_18, %c0_19], %44 {strides = array<i32>} : memref<1x1x32xf32, #tpu.memory_space<vmem>>, vector<1x1x32xf32>,
    } else {
    }
    return
  }
  func.func @transform_0(%arg0: i32) -> (i32, i32) {
    %c0_i32 = arith.constant 0 : i32
    %c0_i32_0 = arith.constant 0 : i32
    return %arg0, %c0_i32 : i32, i32
  }
  func.func @transform_1(%arg0: i32) -> (i32, i32) {
    %c0_i32 = arith.constant 0 : i32
    %c0_i32_0 = arith.constant 0 : i32
    %c0_i32_1 = arith.constant 0 : i32
    return %c0_i32, %c0_i32_0 : i32, i32
  }
  func.func @transform_2(%arg0: i32) -> (i32, i32) {
    %c0_i32 = arith.constant 0 : i32
    %c0_i32_0 = arith.constant 0 : i32
    %c0_i32_1 = arith.constant 0 : i32
    return %c0_i32, %c0_i32_0 : i32, i32
  }
  func.func @transform_3(%arg0: i32) -> (i32, i32) {
    %c0_i32 = arith.constant 0 : i32
    %c0_i32_0 = arith.constant 0 : i32
    return %arg0, %c0_i32 : i32, i32
  }
  func.func @transform_4(%arg0: i32) -> (i32, i32, i32) {
    %c0_i32 = arith.constant 0 : i32
    %c0_i32_0 = arith.constant 0 : i32
    %c0_i32_1 = arith.constant 0 : i32
    return %arg0, %c0_i32, %c0_i32_0 : i32, i32, i32
  }
  func.func @transform_5(%arg0: i32) -> (i32, i32, i32) {
    %c0_i32 = arith.constant 0 : i32
    %c0_i32_0 = arith.constant 0 : i32
    %c0_i32_1 = arith.constant 0 : i32
    return %arg0, %c0_i32, %c0_i32_0 : i32, i32, i32
  }
}

</mosaic_0001>

<bundles_post_ra>
// kernel: tpu_custom_call.1
= control target key start
LH: loop header
LB: loop body
LE: loop exit
PB: predicated region body
PF: predicated region fallthrough
CT: control target
= control target key end

     0   :  { %s8711_s0 = inlined_call_operand.vmem [shape: f32[640,32], index: 0, kind: input, shape index: {}]   ;;  %s8712_s1 = inlined_call_operand.vmem [shape: f32[64,32], index: 1, kind: input, shape index: {}]   ;;  %s8713_s2 = inlined_call_operand.vmem [shape: f32[1,64], index: 2, kind: input, shape index: {}]   ;;  %s8714_s3 = inlined_call_operand.vmem [shape: f32[640,32], index: 3, kind: output, shape index: {0}]   ;;  %s8715_s4 = inlined_call_operand.hbm [shape: s32[2,1,512], index: 4, kind: output, shape index: {1}]   ;;  %s8716_s5 = inlined_call_operand.hbm [shape: f32[2,1,32], index: 5, kind: output, shape index: {2}]  }
   0x1   :  { %8850 = sst [smem:[#allocation94_spill]] %s8711_s0 }
   0x2   :  { %8851 = sst [smem:[#allocation95_spill]] %s8712_s1 }
   0x3   :  { %8852 = sst [smem:[#allocation96_spill]] %s8713_s2 }
   0x4   :  { %8853 = sst [smem:[#allocation97_spill]] %s8714_s3 }
   0x5   :  { %11 = vsyncpa [#allocation4], 0 }
   0x6   :  { %13 = vsyncpa [#allocation4 + $0x1], 0 }
   0x7   :  { %14 = vsyncpa [#allocation6], 0 }
   0x8   :  { %16 = vsyncpa [#allocation6 + $0x1], 0  ;;  %s5717_s18 = smov 0   ;;  %s5719_s19 = smov 0  }
   0x9   :  { %s5721_s20 = smov 0   ;;  %s5723_s21 = smov 0  }
   0xa LB: > { %s5738_s22 = sadd.s32 4294967295, %s5649_s21   ;;  %s4704_s23 = sadd.s32 4294967294, %s5649_s21   ;;  %s5649_s21 = sphi %s5723_s21, %s9164_s21   ;;  %s5645_s20 = sphi %s5721_s20, %s9163_s20   ;;  %s5641_s19 = sphi %s5719_s19, %s9162_s19   ;;  %s5637_s18 = sphi %s5717_s18, %s9161_s18  }
   0xb   : > { %s5742_s24 = sadd.s32 1, %s5649_s21   ;;  %s97_s25 = sadd.s32 1, %s5645_s20 }
   0xc   : > { %s94_s26 = ssub.s32 %s5649_s21, %s5742_s24  ;;  %p107_p0 = scmp.ne.s32.totalorder %s5645_s20, %s5641_s19 }
   0xd   : > { %p95_p1 = scmp.eq.s32.totalorder %s94_s26, 0  ;;  %p108_p2 = scmp.eq.s32.totalorder %s5738_s22, 1 }
   0xe   : > { %p139_p3 = scmp.ne.s32.totalorder %s5641_s19, %s5637_s18  ;;  %p140_p4 = scmp.eq.s32.totalorder %s4704_s23, 1 }
   0xf   : > { %s5753_s27 = scalar_select %p95_p1, %s5645_s20, %s97_s25  }
  0x10   : > { %p5755_p5 = por %p108_p2, %p107_p0  ;;  %p5759_p6 = por %p140_p4, %p139_p3 }
  0x11   : > { %p4707_p7 = scmp.ge.s32.totalorder %s5649_s21, 1  ;;  %p207_p8 = scmp.lt.s32.totalorder %s5649_s21, 3 }
  0x13   : > { %p208_p9 = pnand %p4707_p7, %p207_p8 }
  0x15   : > { %211 = sbr.rel (%p208_p9) target bundleno = 1535 (0x5ff), region = 32 }
  0x1c   : > { %s8856_s1 = sld [smem:[#allocation95_spill]]  ;;  %vm339_vm0 = vcmask 261120   ;;  %s5775_s11 = sshll.u32 %s5738_s22, 6  ;;  %vm1013_vm2 = vcmask 523264  }
  0x1d   : > { %vm5779_vm1 = vmpackc.low %vm339_vm0, %vm339_vm0  ;;  %p252_p10 = scmp.lt.s32.totalorder %s5775_s11, 79  ;;  %s8859_s0 = sld [smem:[#allocation94_spill]] }
  0x1e   : > { %s8860_s2 = sld [smem:[#allocation96_spill]]  ;;  %p4913_p11 = scmp.ge.s32.totalorder %s5738_s22, 1 }
  0x1f   : > { %s253_s14 = scalar_select %p252_p10, %s5775_s11, 79 }
  0x21   : > { %s4711_s25 = sshll.u32 %s253_s14, 3  ;;  %s7651_s14 = sand.u32 1, %s5641_s19  }
  0x22   : > { %v330_v0 = vld [vmem:[%s8856_s1] sm:$0xff]  ;;  %v331_v1 = vld [vmem:[%s8856_s1 + $0x8] sm:$0xff]  ;;  %v332_v2 = vld [vmem:[%s8856_s1 + $0x10] sm:$0xff]  ;;  %s4708_s15 = sshll.u32 %s7651_s14, 9  ;;  %s4709_s17 = sshll.u32 %s7651_s14, 2 }
  0x23   : > { %v5309_v3 = vpack.c.bf16 %v331_v1, %v330_v0  ;;  %v333_v5 = vld [vmem:[%s8856_s1 + $0x18] sm:$0xff]  ;;  %v334_v7 = vld [vmem:[%s8856_s1 + $0x20] sm:$0xff]  ;;  %v335_v8 = vld [vmem:[%s8856_s1 + $0x28] sm:$0xff]  ;;  %s5803_s6 = scalar_lea.vmem %s8859_s0, %s4711_s25  ;;  %s7655_s16 = scalar_lea.vmem [#allocation2], %s4708_s15  }
  0x24   : > { %v5315_v6 = vpack.c.bf16 %v333_v5, %v332_v2  ;;  %v5321_v9 = vpack.c.bf16 %v335_v8, %v334_v7  ;;  %v266_v10 = vld [vmem:[%s5803_s6] sm:$0xff]  ;;  %v336_v11 = vld [vmem:[%s8856_s1 + $0x30] sm:$0xff]  ;;  %v337_v12 = vld [vmem:[%s8856_s1 + $0x38] sm:$0xff]  ;;  %s7743_s23 = scalar_lea.vmem [#allocation3], %s4709_s17  ;;  %s7987_s25 = scalar_lea.vmem [#allocation5], %s7651_s14 }
  0x25   : > { %5311 = vmatprep.subr.msk.bf16.mxu0 %vm5779_vm1, %v5309_v3  ;;  %5334 = vmatprep.subr.bf16.mxu1 %v5309_v3  ;;  %v5327_v13 = vpack.c.bf16 %v337_v12, %v336_v11  ;;  %v267_v14 = vld [vmem:[%s5803_s6 + $0x8] sm:$0xff]  ;;  %v268_v15 = vld [vmem:[%s5803_s6 + $0x10] sm:$0xff]  ;;  %v269_v16 = vld [vmem:[%s5803_s6 + $0x18] sm:$0xff] }
  0x26   : > { %5314 = vmatpush3.bf16.xpose.msk.msra.mxu0 %vm5779_vm1, %v5309_v3  ;;  %5336 = vmatpush3.bf16.msra.mxu1 %v5309_v3  ;;  %v270_v17 = vld [vmem:[%s5803_s6 + $0x20] sm:$0xff]  ;;  %v271_v18 = vld [vmem:[%s5803_s6 + $0x28] sm:$0xff]  ;;  %v272_v19 = vld [vmem:[%s5803_s6 + $0x30] sm:$0xff] }
  0x27   : > { %5317 = vmatprep.subr.msk.bf16.mxu0 %vm5779_vm1, %v5315_v6  ;;  %5338 = vmatprep.subr.bf16.mxu1 %v5315_v6  ;;  %v273_v20 = vld [vmem:[%s5803_s6 + $0x38] sm:$0xff]  ;;  %v274_v21 = vld [vmem:[%s5803_s6 + $0x40] sm:$0xff]  ;;  %v275_v22 = vld [vmem:[%s5803_s6 + $0x48] sm:$0xff] }
  0x28   : > { %5101 = vmatprep.mubr.msk.f32.mxu0 %vm339_vm0, %v266_v10  ;;  %v276_v23 = vld [vmem:[%s5803_s6 + $0x50] sm:$0xff]  ;;  %v277_v24 = vld [vmem:[%s5803_s6 + $0x58] sm:$0xff]  ;;  %v278_v25 = vld [vmem:[%s5803_s6 + $0x60] sm:$0xff] }
  0x29   : > { %v279_v26 = vld [vmem:[%s5803_s6 + $0x68] sm:$0xff]  ;;  %v280_v27 = vld [vmem:[%s5803_s6 + $0x70] sm:$0xff]  ;;  %v281_v28 = vld [vmem:[%s5803_s6 + $0x78] sm:$0xff] }
  0x2a   : > { %5340 = vmatpush3.bf16.msra.mxu1 %v5315_v6  ;;  %v282_v29 = vld [vmem:[%s5803_s6 + $0x80] sm:$0xff]  ;;  %v283_v30 = vld [vmem:[%s5803_s6 + $0x88] sm:$0xff]  ;;  %v284_v31 = vld [vmem:[%s5803_s6 + $0x90] sm:$0xff] }
  0x2b   : > { %5342 = vmatprep.subr.bf16.mxu1 %v5321_v9  ;;  %v285_v32 = vld [vmem:[%s5803_s6 + $0x98] sm:$0xff]  ;;  %v286_v33 = vld [vmem:[%s5803_s6 + $0xa0] sm:$0xff]  ;;  %v287_v34 = vld [vmem:[%s5803_s6 + $0xa8] sm:$0xff] }
  0x2c   : > { %v288_v35 = vld [vmem:[%s5803_s6 + $0xb0] sm:$0xff]  ;;  %v289_v36 = vld [vmem:[%s5803_s6 + $0xb8] sm:$0xff]  ;;  %v290_v37 = vld [vmem:[%s5803_s6 + $0xc0] sm:$0xff] }
  0x2d   : > { %v291_v38 = vld [vmem:[%s5803_s6 + $0xc8] sm:$0xff]  ;;  %v292_v39 = vld [vmem:[%s5803_s6 + $0xd0] sm:$0xff]  ;;  %v293_v40 = vld [vmem:[%s5803_s6 + $0xd8] sm:$0xff] }
  0x2e   : > { %5320 = vmatpush3.bf16.xpose.msk.msra.mxu0 %vm5779_vm1, %v5315_v6  ;;  %5344 = vmatpush3.bf16.msra.mxu1 %v5321_v9  ;;  %v294_v41 = vld [vmem:[%s5803_s6 + $0xe0] sm:$0xff]  ;;  %v295_v42 = vld [vmem:[%s5803_s6 + $0xe8] sm:$0xff]  ;;  %v296_v43 = vld [vmem:[%s5803_s6 + $0xf0] sm:$0xff] }
  0x2f   : > { %5323 = vmatprep.subr.msk.bf16.mxu0 %vm5779_vm1, %v5321_v9  ;;  %5346 = vmatprep.subr.bf16.mxu1 %v5327_v13  ;;  %v297_v44 = vld [vmem:[%s5803_s6 + $0xf8] sm:$0xff]  ;;  %v298_v45 = vld [vmem:[%s5803_s6 + $0x100] sm:$0xff]  ;;  %v299_v46 = vld [vmem:[%s5803_s6 + $0x108] sm:$0xff] }
  0x30   : > { %v300_v47 = vld [vmem:[%s5803_s6 + $0x110] sm:$0xff]  ;;  %v301_v48 = vld [vmem:[%s5803_s6 + $0x118] sm:$0xff]  ;;  %v302_v49 = vld [vmem:[%s5803_s6 + $0x120] sm:$0xff] }
  0x31   : > { %v303_v50 = vld [vmem:[%s5803_s6 + $0x128] sm:$0xff]  ;;  %v304_v51 = vld [vmem:[%s5803_s6 + $0x130] sm:$0xff]  ;;  %v305_v52 = vld [vmem:[%s5803_s6 + $0x138] sm:$0xff] }
  0x32   : > { %5348 = vmatpush3.bf16.msra.mxu1 %v5327_v13  ;;  %v306_v53 = vld [vmem:[%s5803_s6 + $0x140] sm:$0xff]  ;;  %v307_v54 = vld [vmem:[%s5803_s6 + $0x148] sm:$0xff]  ;;  %v308_v55 = vld [vmem:[%s5803_s6 + $0x150] sm:$0xff] }
  0x33   : > { %v309_v56 = vld [vmem:[%s5803_s6 + $0x158] sm:$0xff]  ;;  %v310_v57 = vld [vmem:[%s5803_s6 + $0x160] sm:$0xff]  ;;  %v311_v58 = vld [vmem:[%s5803_s6 + $0x168] sm:$0xff] }
  0x34   : > { %v312_v59 = vld [vmem:[%s5803_s6 + $0x170] sm:$0xff]  ;;  %v313_v60 = vld [vmem:[%s5803_s6 + $0x178] sm:$0xff]  ;;  %v314_v61 = vld [vmem:[%s5803_s6 + $0x180] sm:$0xff] }
  0x35   : > { %v315_v62 = vld [vmem:[%s5803_s6 + $0x188] sm:$0xff]  ;;  %v316_v63 = vld [vmem:[%s5803_s6 + $0x190] sm:$0xff]  ;;  %v317_v0 = vld [vmem:[%s5803_s6 + $0x198] sm:$0xff] }
  0x36   : > { %5326 = vmatpush3.bf16.xpose.msk.msra.mxu0 %vm5779_vm1, %v5321_v9  ;;  %v318_v1 = vld [vmem:[%s5803_s6 + $0x1a0] sm:$0xff]  ;;  %v319_v2 = vld [vmem:[%s5803_s6 + $0x1a8] sm:$0xff]  ;;  %v320_v3 = vld [vmem:[%s5803_s6 + $0x1b0] sm:$0xff] }
  0x37   : > { %5329 = vmatprep.subr.msk.bf16.mxu0 %vm5779_vm1, %v5327_v13  ;;  %v321_v4 = vld [vmem:[%s5803_s6 + $0x1b8] sm:$0xff]  ;;  %v322_v5 = vld [vmem:[%s5803_s6 + $0x1c0] sm:$0xff]  ;;  %v323_v6 = vld [vmem:[%s5803_s6 + $0x1c8] sm:$0xff] }
  0x38   : > { %v324_v7 = vld [vmem:[%s5803_s6 + $0x1d0] sm:$0xff]  ;;  %v325_v8 = vld [vmem:[%s5803_s6 + $0x1d8] sm:$0xff]  ;;  %v326_v9 = vld [vmem:[%s5803_s6 + $0x1e0] sm:$0xff] }
  0x39   : > { %v327_v10 = vld [vmem:[%s5803_s6 + $0x1e8] sm:$0xff]  ;;  %v328_v11 = vld [vmem:[%s5803_s6 + $0x1f0] sm:$0xff]  ;;  %v329_v12 = vld [vmem:[%s5803_s6 + $0x1f8] sm:$0xff] }
  0x3e   : > { %5332 = vmatpush3.bf16.xpose.msk.msra.mxu0 %vm5779_vm1, %v5327_v13  ;;  %v5952_v13 = vld [vmem:[%s8860_s2] ss:$0 sm:$0xff] }
  0x45   : > { %5102 = vmatmul.mubr.msk.f32.vlgmr.msra.gmra.mrb[0].mxu0 %vm339_vm0, %v267_v14 }
  0x46   : > { %5104 = vmatprep.mubr.msk.f32.mxu0 %vm339_vm0, %v268_v15 }
  0x49   : > { %5105 = vmatmul.mubr.msk.f32.gmra.mrb[2].mxu0 %vm339_vm0, %v269_v16 }
  0x4a   : > { %5107 = vmatprep.mubr.msk.f32.mxu0 %vm339_vm0, %v270_v17 }
  0x4d   : > { %5108 = vmatmul.mubr.msk.f32.gmra.mrb[4].mxu0 %vm339_vm0, %v271_v18 }
  0x4e   : > { %5110 = vmatprep.mubr.msk.f32.mxu0 %vm339_vm0, %v272_v19 }
  0x51   : > { %5111 = vmatmul.mubr.msk.f32.gmra.mrb[6].mxu0 %vm339_vm0, %v273_v20 }
  0x52   : > { %5113 = vmatprep.mubr.msk.f32.mxu0 %vm339_vm0, %v274_v21 }
  0x55   : > { %5114 = vmatmul.mubr.msk.f32.gmra.mrb[8].mxu0 %vm339_vm0, %v275_v22 }
  0x56   : > { %5116 = vmatprep.mubr.msk.f32.mxu0 %vm339_vm0, %v276_v23 }
  0x59   : > { %5117 = vmatmul.mubr.msk.f32.gmra.mrb[10].mxu0 %vm339_vm0, %v277_v24 }
  0x5a   : > { %5119 = vmatprep.mubr.msk.f32.mxu0 %vm339_vm0, %v278_v25 }
  0x5d   : > { %5120 = vmatmul.mubr.msk.f32.gmra.mrb[12].mxu0 %vm339_vm0, %v279_v26 }
  0x5e   : > { %5122 = vmatprep.mubr.msk.f32.mxu0 %vm339_vm0, %v280_v27 }
  0x61   : > { %5123 = vmatmul.mubr.msk.f32.gmra.mrb[14].mxu0 %vm339_vm0, %v281_v28 }
  0x62   : > { %5125 = vmatprep.mubr.msk.f32.mxu0 %vm339_vm0, %v282_v29 }
  0x65   : > { %5126 = vmatmul.mubr.msk.f32.gmra.mrb[16].mxu0 %vm339_vm0, %v283_v30 }
  0x66   : > { %5128 = vmatprep.mubr.msk.f32.mxu0 %vm339_vm0, %v284_v31 }
  0x69   : > { %5129 = vmatmul.mubr.msk.f32.gmra.mrb[18].mxu0 %vm339_vm0, %v285_v32 }
  0x6a   : > { %5131 = vmatprep.mubr.msk.f32.mxu0 %vm339_vm0, %v286_v33 }
  0x6d   : > { %5132 = vmatmul.mubr.msk.f32.gmra.mrb[20].mxu0 %vm339_vm0, %v287_v34 }
  0x6e   : > { %5134 = vmatprep.mubr.msk.f32.mxu0 %vm339_vm0, %v288_v35 }
  0x71   : > { %5135 = vmatmul.mubr.msk.f32.gmra.mrb[22].mxu0 %vm339_vm0, %v289_v36 }
  0x72   : > { %5137 = vmatprep.mubr.msk.f32.mxu0 %vm339_vm0, %v290_v37 }
  0x75   : > { %5138 = vmatmul.mubr.msk.f32.gmra.mrb[24].mxu0 %vm339_vm0, %v291_v38 }
  0x76   : > { %5140 = vmatprep.mubr.msk.f32.mxu0 %vm339_vm0, %v292_v39 }
  0x79   : > { %5141 = vmatmul.mubr.msk.f32.gmra.mrb[26].mxu0 %vm339_vm0, %v293_v40 }
  0x7a   : > { %5143 = vmatprep.mubr.msk.f32.mxu0 %vm339_vm0, %v294_v41 }
  0x7d   : > { %5144 = vmatmul.mubr.msk.f32.gmra.mrb[28].mxu0 %vm339_vm0, %v295_v42 }
  0x7e   : > { %5146 = vmatprep.mubr.msk.f32.mxu0 %vm339_vm0, %v296_v43 }
  0x81   : > { %5147 = vmatmul.mubr.msk.f32.gmra.mrb[30].mxu0 %vm339_vm0, %v297_v44 }
  0x82   : > { %5149 = vmatprep.mubr.msk.f32.mxu0 %vm339_vm0, %v298_v45 }
  0x85   : > { %5150 = vmatmul.mubr.msk.f32.gmra.mrb[32].mxu0 %vm339_vm0, %v299_v46 }
  0x86   : > { %5152 = vmatprep.mubr.msk.f32.mxu0 %vm339_vm0, %v300_v47 }
  0x89   : > { %5153 = vmatmul.mubr.msk.f32.gmra.mrb[34].mxu0 %vm339_vm0, %v301_v48 }
  0x8a   : > { %5155 = vmatprep.mubr.msk.f32.mxu0 %vm339_vm0, %v302_v49 }
  0x8d   : > { %5156 = vmatmul.mubr.msk.f32.gmra.mrb[36].mxu0 %vm339_vm0, %v303_v50 }
  0x8e   : > { %5158 = vmatprep.mubr.msk.f32.mxu0 %vm339_vm0, %v304_v51 }
  0x91   : > { %5159 = vmatmul.mubr.msk.f32.gmra.mrb[38].mxu0 %vm339_vm0, %v305_v52 }
  0x92   : > { %5161 = vmatprep.mubr.msk.f32.mxu0 %vm339_vm0, %v306_v53 }
  0x95   : > { %5162 = vmatmul.mubr.msk.f32.gmra.mrb[40].mxu0 %vm339_vm0, %v307_v54 }
  0x96   : > { %5164 = vmatprep.mubr.msk.f32.mxu0 %vm339_vm0, %v308_v55 }
  0x99   : > { %5165 = vmatmul.mubr.msk.f32.gmra.mrb[42].mxu0 %vm339_vm0, %v309_v56 }
  0x9a   : > { %5167 = vmatprep.mubr.msk.f32.mxu0 %vm339_vm0, %v310_v57 }
  0x9d   : > { %5168 = vmatmul.mubr.msk.f32.gmra.mrb[44].mxu0 %vm339_vm0, %v311_v58 }
  0x9e   : > { %5170 = vmatprep.mubr.msk.f32.mxu0 %vm339_vm0, %v312_v59 }
  0xa1   : > { %5171 = vmatmul.mubr.msk.f32.gmra.mrb[46].mxu0 %vm339_vm0, %v313_v60 }
  0xa2   : > { %5173 = vmatprep.mubr.msk.f32.mxu0 %vm339_vm0, %v314_v61 }
  0xa5   : > { %5174 = vmatmul.mubr.msk.f32.gmra.mrb[48].mxu0 %vm339_vm0, %v315_v62 }
  0xa6   : > { %5176 = vmatprep.mubr.msk.f32.mxu0 %vm339_vm0, %v316_v63 }
  0xa9   : > { %5177 = vmatmul.mubr.msk.f32.gmra.mrb[50].mxu0 %vm339_vm0, %v317_v0 }
  0xaa   : > { %5179 = vmatprep.mubr.msk.f32.mxu0 %vm339_vm0, %v318_v1 }
  0xad   : > { %5180 = vmatmul.mubr.msk.f32.gmra.mrb[52].mxu0 %vm339_vm0, %v319_v2 }
  0xae   : > { %5182 = vmatprep.mubr.msk.f32.mxu0 %vm339_vm0, %v320_v3 }
  0xb1   : > { %5183 = vmatmul.mubr.msk.f32.gmra.mrb[54].mxu0 %vm339_vm0, %v321_v4 }
  0xb2   : > { %5185 = vmatprep.mubr.msk.f32.mxu0 %vm339_vm0, %v322_v5 }
  0xb5   : > { %5186 = vmatmul.mubr.msk.f32.gmra.mrb[56].mxu0 %vm339_vm0, %v323_v6 }
  0xb6   : > { %5188 = vmatprep.mubr.msk.f32.mxu0 %vm339_vm0, %v324_v7 }
  0xb9   : > { %5189 = vmatmul.mubr.msk.f32.gmra.mrb[58].mxu0 %vm339_vm0, %v325_v8 }
  0xba   : > { %5191 = vmatprep.mubr.msk.f32.mxu0 %vm339_vm0, %v326_v9 }
  0xbd   : > { %5192 = vmatmul.mubr.msk.f32.gmra.mrb[60].mxu0 %vm339_vm0, %v327_v10 }
  0xbe   : > { %5194 = vmatprep.mubr.msk.f32.mxu0 %vm339_vm0, %v328_v11 }
  0xc1   : > { %5195 = vmatmul.mubr.msk.f32.gmra.mrb[62].mxu0 %vm339_vm0, %v329_v12 }
 0x118   : > { %v5103_v14 = vpop.f32.mrb[0].mxu0 }
 0x119   : > { %v5955_v15 = vsub.f32 %v5952_v13, %v5103_v14  ;;  %v622_v16 = vpop.f32.mrb[1].mxu0 }
 0x11a   : > { %v5958_v17 = vsub.f32 %v5952_v13, %v622_v16 }
 0x11b   : > { %v1017_v18 = vsel %vm1013_vm2, %v5955_v15, inf }
 0x11c   : > { %1018 = vmin.xlane.f32.xlu0 %v1017_v18  ;;  %v5106_v19 = vpop.f32.mrb[2].mxu0  ;;  %v1014_v23 = vsel %vm1013_vm2, %v5958_v17, inf }
 0x11d   : > { %v5963_v20 = vsub.f32 %v5952_v13, %v5106_v19  ;;  %v632_v21 = vpop.f32.mrb[3].mxu0 }
 0x11e   : > { %v5966_v22 = vsub.f32 %v5952_v13, %v632_v21 }
 0x11f   : > { %v1023_v24 = vsel %vm1013_vm2, %v5963_v20, inf }
 0x120   : > { %1015 = vmin.xlane.f32.xlu0 %v1014_v23  ;;  %1024 = vmin.xlane.f32.xlu1 %v1023_v24  ;;  %v5109_v25 = vpop.f32.mrb[4].mxu0  ;;  %v1020_v29 = vsel %vm1013_vm2, %v5966_v22, inf }
 0x121   : > { %v5973_v26 = vsub.f32 %v5952_v13, %v5109_v25  ;;  %v642_v27 = vpop.f32.mrb[5].mxu0 }
 0x122   : > { %v5976_v28 = vsub.f32 %v5952_v13, %v642_v27 }
 0x123   : > { %v1029_v34 = vsel %vm1013_vm2, %v5973_v26, inf }
 0x124   : > { %1021 = vmin.xlane.f32.xlu1 %v1020_v29  ;;  %v5112_v30 = vpop.f32.mrb[6].mxu0  ;;  %v1026_v31 = vsel %vm1013_vm2, %v5976_v28, inf }
 0x125   : > { %v5983_v32 = vsub.f32 %v5952_v13, %v5112_v30  ;;  %1027 = vmin.xlane.f32.xlu0 %v1026_v31  ;;  %v652_v33 = vpop.f32.mrb[7].mxu0 }
 0x126   : > { %v5988_v35 = vsub.f32 %v5952_v13, %v652_v33 }
 0x127   : > { %v1035_v40 = vsel %vm1013_vm2, %v5983_v32, inf }
 0x128   : > { %1030 = vmin.xlane.f32.xlu1 %v1029_v34  ;;  %v5115_v36 = vpop.f32.mrb[8].mxu0  ;;  %v1032_v37 = vsel %vm1013_vm2, %v5988_v35, inf }
 0x129   : > { %v5993_v38 = vsub.f32 %v5952_v13, %v5115_v36  ;;  %1033 = vmin.xlane.f32.xlu0 %v1032_v37  ;;  %v662_v39 = vpop.f32.mrb[9].mxu0 }
 0x12a   : > { %v5998_v41 = vsub.f32 %v5952_v13, %v662_v39 }
 0x12b   : > { %v1041_v46 = vsel %vm1013_vm2, %v5993_v38, inf }
 0x12c   : > { %1036 = vmin.xlane.f32.xlu1 %v1035_v40  ;;  %v5118_v42 = vpop.f32.mrb[10].mxu0  ;;  %v1038_v43 = vsel %vm1013_vm2, %v5998_v41, inf }
 0x12d   : > { %v6003_v44 = vsub.f32 %v5952_v13, %v5118_v42  ;;  %1039 = vmin.xlane.f32.xlu0 %v1038_v43  ;;  %v672_v45 = vpop.f32.mrb[11].mxu0 }
 0x12e   : > { %v6008_v47 = vsub.f32 %v5952_v13, %v672_v45 }
 0x12f   : > { %v1047_v52 = vsel %vm1013_vm2, %v6003_v44, inf }
 0x130   : > { %1042 = vmin.xlane.f32.xlu1 %v1041_v46  ;;  %v5121_v48 = vpop.f32.mrb[12].mxu0  ;;  %v1044_v49 = vsel %vm1013_vm2, %v6008_v47, inf }
 0x131   : > { %v6013_v50 = vsub.f32 %v5952_v13, %v5121_v48  ;;  %1045 = vmin.xlane.f32.xlu0 %v1044_v49  ;;  %v682_v51 = vpop.f32.mrb[13].mxu0 }
 0x132   : > { %v6018_v53 = vsub.f32 %v5952_v13, %v682_v51 }
 0x133   : > { %v1053_v58 = vsel %vm1013_vm2, %v6013_v50, inf }
 0x134   : > { %1048 = vmin.xlane.f32.xlu1 %v1047_v52  ;;  %v5124_v54 = vpop.f32.mrb[14].mxu0  ;;  %v1050_v55 = vsel %vm1013_vm2, %v6018_v53, inf }
 0x135   : > { %v6023_v56 = vsub.f32 %v5952_v13, %v5124_v54  ;;  %1051 = vmin.xlane.f32.xlu0 %v1050_v55  ;;  %v692_v57 = vpop.f32.mrb[15].mxu0 }
 0x136   : > { %v6028_v59 = vsub.f32 %v5952_v13, %v692_v57 }
 0x137   : > { %v1059_v0 = vsel %vm1013_vm2, %v6023_v56, inf }
 0x138   : > { %1054 = vmin.xlane.f32.xlu1 %v1053_v58  ;;  %v5127_v60 = vpop.f32.mrb[16].mxu0  ;;  %v1056_v61 = vsel %vm1013_vm2, %v6028_v59, inf }
 0x139   : > { %v6033_v62 = vsub.f32 %v5952_v13, %v5127_v60  ;;  %1057 = vmin.xlane.f32.xlu0 %v1056_v61  ;;  %v702_v63 = vpop.f32.mrb[17].mxu0 }
 0x13a   : > { %v6038_v1 = vsub.f32 %v5952_v13, %v702_v63 }
 0x13b   : > { %v1065_v6 = vsel %vm1013_vm2, %v6033_v62, inf }
 0x13c   : > { %1060 = vmin.xlane.f32.xlu1 %v1059_v0  ;;  %v5130_v2 = vpop.f32.mrb[18].mxu0  ;;  %v1062_v3 = vsel %vm1013_vm2, %v6038_v1, inf }
 0x13d   : > { %v6043_v4 = vsub.f32 %v5952_v13, %v5130_v2  ;;  %1063 = vmin.xlane.f32.xlu0 %v1062_v3  ;;  %v712_v5 = vpop.f32.mrb[19].mxu0 }
 0x13e   : > { %v6048_v7 = vsub.f32 %v5952_v13, %v712_v5 }
 0x13f   : > { %v1071_v12 = vsel %vm1013_vm2, %v6043_v4, inf }
 0x140   : > { %1066 = vmin.xlane.f32.xlu1 %v1065_v6  ;;  %v5133_v8 = vpop.f32.mrb[20].mxu0  ;;  %v1068_v9 = vsel %vm1013_vm2, %v6048_v7, inf }
 0x141   : > { %v6053_v10 = vsub.f32 %v5952_v13, %v5133_v8  ;;  %1069 = vmin.xlane.f32.xlu0 %v1068_v9  ;;  %v722_v11 = vpop.f32.mrb[21].mxu0 }
 0x142   : > { %v6058_v14 = vsub.f32 %v5952_v13, %v722_v11 }
 0x143   : > { %v1077_v23 = vsel %vm1013_vm2, %v6053_v10, inf }
 0x144   : > { %1072 = vmin.xlane.f32.xlu1 %v1071_v12  ;;  %v5136_v16 = vpop.f32.mrb[22].mxu0  ;;  %v1074_v18 = vsel %vm1013_vm2, %v6058_v14, inf }
 0x145   : > { %v6063_v19 = vsub.f32 %v5952_v13, %v5136_v16  ;;  %1075 = vmin.xlane.f32.xlu0 %v1074_v18  ;;  %v732_v21 = vpop.f32.mrb[23].mxu0 }
 0x146   : > { %v6068_v24 = vsub.f32 %v5952_v13, %v732_v21 }
 0x147   : > { %v1083_v31 = vsel %vm1013_vm2, %v6063_v19, inf }
 0x148   : > { %1078 = vmin.xlane.f32.xlu1 %v1077_v23  ;;  %v5139_v25 = vpop.f32.mrb[24].mxu0  ;;  %v1080_v27 = vsel %vm1013_vm2, %v6068_v24, inf }
 0x149   : > { %v6073_v29 = vsub.f32 %v5952_v13, %v5139_v25  ;;  %1081 = vmin.xlane.f32.xlu0 %v1080_v27  ;;  %v742_v30 = vpop.f32.mrb[25].mxu0 }
 0x14a   : > { %v6078_v33 = vsub.f32 %v5952_v13, %v742_v30 }
 0x14b   : > { %v1089_v40 = vsel %vm1013_vm2, %v6073_v29, inf }
 0x14c   : > { %1084 = vmin.xlane.f32.xlu1 %v1083_v31  ;;  %v5142_v34 = vpop.f32.mrb[26].mxu0  ;;  %v1086_v36 = vsel %vm1013_vm2, %v6078_v33, inf }
 0x14d   : > { %v6083_v37 = vsub.f32 %v5952_v13, %v5142_v34  ;;  %1087 = vmin.xlane.f32.xlu0 %v1086_v36  ;;  %v752_v39 = vpop.f32.mrb[27].mxu0 }
 0x14e   : > { %v6088_v42 = vsub.f32 %v5952_v13, %v752_v39 }
 0x14f   : > { %v1095_v49 = vsel %vm1013_vm2, %v6083_v37, inf }
 0x150   : > { %1090 = vmin.xlane.f32.xlu1 %v1089_v40  ;;  %v5145_v43 = vpop.f32.mrb[28].mxu0  ;;  %v1092_v45 = vsel %vm1013_vm2, %v6088_v42, inf }
 0x151   : > { %v6093_v46 = vsub.f32 %v5952_v13, %v5145_v43  ;;  %1093 = vmin.xlane.f32.xlu0 %v1092_v45  ;;  %v762_v48 = vpop.f32.mrb[29].mxu0 }
 0x152   : > { %v6098_v51 = vsub.f32 %v5952_v13, %v762_v48 }
 0x153   : > { %v1101_v58 = vsel %vm1013_vm2, %v6093_v46, inf }
 0x154   : > { %1096 = vmin.xlane.f32.xlu1 %v1095_v49  ;;  %v5148_v52 = vpop.f32.mrb[30].mxu0  ;;  %v1098_v54 = vsel %vm1013_vm2, %v6098_v51, inf }
 0x155   : > { %v6103_v55 = vsub.f32 %v5952_v13, %v5148_v52  ;;  %1099 = vmin.xlane.f32.xlu0 %v1098_v54  ;;  %v772_v57 = vpop.f32.mrb[31].mxu0 }
 0x156   : > { %v6108_v60 = vsub.f32 %v5952_v13, %v772_v57 }
 0x157   : > { %v1107_v3 = vsel %vm1013_vm2, %v6103_v55, inf }
 0x158   : > { %1102 = vmin.xlane.f32.xlu1 %v1101_v58  ;;  %v5151_v61 = vpop.f32.mrb[32].mxu0  ;;  %v1104_v63 = vsel %vm1013_vm2, %v6108_v60, inf }
 0x159   : > { %v6113_v0 = vsub.f32 %v5952_v13, %v5151_v61  ;;  %1105 = vmin.xlane.f32.xlu0 %v1104_v63  ;;  %v782_v2 = vpop.f32.mrb[33].mxu0 }
 0x15a   : > { %v6118_v5 = vsub.f32 %v5952_v13, %v782_v2 }
 0x15b   : > { %v1113_v12 = vsel %vm1013_vm2, %v6113_v0, inf }
 0x15c   : > { %1108 = vmin.xlane.f32.xlu1 %v1107_v3  ;;  %v5154_v6 = vpop.f32.mrb[34].mxu0  ;;  %v1110_v8 = vsel %vm1013_vm2, %v6118_v5, inf }
 0x15d   : > { %v6123_v9 = vsub.f32 %v5952_v13, %v5154_v6  ;;  %1111 = vmin.xlane.f32.xlu0 %v1110_v8  ;;  %v792_v11 = vpop.f32.mrb[35].mxu0 }
 0x15e   : > { %v6128_v16 = vsub.f32 %v5952_v13, %v792_v11 }
 0x15f   : > { %v1119_v27 = vsel %vm1013_vm2, %v6123_v9, inf }
 0x160   : > { %1114 = vmin.xlane.f32.xlu1 %v1113_v12  ;;  %v5157_v18 = vpop.f32.mrb[36].mxu0  ;;  %v1116_v21 = vsel %vm1013_vm2, %v6128_v16, inf }
 0x161   : > { %v6133_v23 = vsub.f32 %v5952_v13, %v5157_v18  ;;  %1117 = vmin.xlane.f32.xlu0 %v1116_v21  ;;  %v802_v25 = vpop.f32.mrb[37].mxu0 }
 0x162   : > { %v6138_v30 = vsub.f32 %v5952_v13, %v802_v25 }
 0x163   : > { %v1125_v40 = vsel %vm1013_vm2, %v6133_v23, inf }
 0x164   : > { %1120 = vmin.xlane.f32.xlu1 %v1119_v27  ;;  %v5160_v31 = vpop.f32.mrb[38].mxu0  ;;  %v1122_v34 = vsel %vm1013_vm2, %v6138_v30, inf }
 0x165   : > { %v6143_v36 = vsub.f32 %v5952_v13, %v5160_v31  ;;  %1123 = vmin.xlane.f32.xlu0 %v1122_v34  ;;  %v812_v39 = vpop.f32.mrb[39].mxu0 }
 0x166   : > { %v6148_v43 = vsub.f32 %v5952_v13, %v812_v39 }
 0x167   : > { %v1131_v52 = vsel %vm1013_vm2, %v6143_v36, inf }
 0x168   : > { %8861 = vst [vmem:[#allocation9_spill] sm:$0xff] %v6148_v43  ;;  %1126 = vmin.xlane.f32.xlu1 %v1125_v40  ;;  %v1128_v45 = vsel %vm1013_vm2, %v6148_v43, inf  ;;  %v5163_v48 = vpop.f32.mrb[40].mxu0 }
 0x169   : > { %1129 = vmin.xlane.f32.xlu0 %v1128_v45  ;;  %v6153_v49 = vsub.f32 %v5952_v13, %v5163_v48  ;;  %v822_v54 = vpop.f32.mrb[41].mxu0 }
 0x16a   : > { %v6160_v63 = vsub.f32 %v5952_v13, %v822_v54 }
 0x16b   : > { %v1137_v58 = vsel %vm1013_vm2, %v6153_v49, inf }
 0x16c   : > { %1132 = vmin.xlane.f32.xlu1 %v1131_v52  ;;  %v5166_v57 = vpop.f32.mrb[42].mxu0  ;;  %8862 = vst [vmem:[#allocation10_spill] sm:$0xff] %v6160_v63  ;;  %v1134_v8 = vsel %vm1013_vm2, %v6160_v63, inf }
 0x16d   : > { %v832_v61 = vpop.f32.mrb[43].mxu0  ;;  %v6163_v3 = vsub.f32 %v5952_v13, %v5166_v57 }
 0x16e   : > { %v6170_v21 = vsub.f32 %v5952_v13, %v832_v61 }
 0x16f   : > { %v1143_v12 = vsel %vm1013_vm2, %v6163_v3, inf }
 0x170   : > { %1138 = vmin.xlane.f32.xlu1 %v1137_v58  ;;  %v5169_v2 = vpop.f32.mrb[44].mxu0  ;;  %8863 = vst [vmem:[#allocation11_spill] sm:$0xff] %v6170_v21  ;;  %v1140_v34 = vsel %vm1013_vm2, %v6170_v21, inf }
 0x171   : > { %v842_v6 = vpop.f32.mrb[45].mxu0  ;;  %v6173_v27 = vsub.f32 %v5952_v13, %v5169_v2 }
 0x172   : > { %v6180_v48 = vsub.f32 %v5952_v13, %v842_v6 }
 0x173   : > { %v1149_v40 = vsel %vm1013_vm2, %v6173_v27, inf }
 0x174   : > { %1135 = vmin.xlane.f32.xlu1 %v1134_v8  ;;  %v5172_v11 = vpop.f32.mrb[46].mxu0  ;;  %8864 = vst [vmem:[#allocation12_spill] sm:$0xff] %v6180_v48  ;;  %v1146_v58 = vsel %vm1013_vm2, %v6180_v48, inf }
 0x175   : > { %v852_v18 = vpop.f32.mrb[47].mxu0  ;;  %v6183_v54 = vsub.f32 %v5952_v13, %v5172_v11 }
 0x177   : > { %v1155_v2 = vsel %vm1013_vm2, %v6183_v54, inf }
 0x178   : > { %1144 = vmin.xlane.f32.xlu1 %v1143_v12  ;;  %v5175_v25 = vpop.f32.mrb[48].mxu0  ;;  %v6190_v12 = vsub.f32 %v5952_v13, %v852_v18 }
 0x179   : > { %v862_v31 = vpop.f32.mrb[49].mxu0 }
 0x17a   : > { %8865 = vst [vmem:[#allocation13_spill] sm:$0xff] %v6190_v12  ;;  %v6202_v63 = vsub.f32 %v5952_v13, %v862_v31 }
 0x17c   : > { %1141 = vmin.xlane.f32.xlu1 %v1140_v34  ;;  %v5178_v39 = vpop.f32.mrb[50].mxu0  ;;  %v6193_v34 = vsub.f32 %v5952_v13, %v5175_v25  ;;  %8867 = vst [vmem:[#allocation15_spill] sm:$0xff] %v6202_v63 }
 0x17d   : > { %v872_v45 = vpop.f32.mrb[51].mxu0  ;;  %v6207_v25 = vsub.f32 %v5952_v13, %v5178_v39 }
 0x17e   : > { %8866 = vst [vmem:[#allocation14_spill] sm:$0xff] %v6193_v34  ;;  %v6220_v31 = vsub.f32 %v5952_v13, %v872_v45 }
 0x17f   : > { %8868 = vst [vmem:[#allocation16_spill] sm:$0xff] %v6207_v25 }
 0x180   : > { %1150 = vmin.xlane.f32.xlu1 %v1149_v40  ;;  %v5181_v52 = vpop.f32.mrb[52].mxu0  ;;  %v1152_v40 = vsel %vm1013_vm2, %v6190_v12, inf  ;;  %8869 = vst [vmem:[#allocation17_spill] sm:$0xff] %v6220_v31 }
 0x181   : > { %v882_v57 = vpop.f32.mrb[53].mxu0  ;;  %v6223_v39 = vsub.f32 %v5952_v13, %v5181_v52 }
 0x184   : > { %1147 = vmin.xlane.f32.xlu1 %v1146_v58  ;;  %v5184_v61 = vpop.f32.mrb[54].mxu0  ;;  %v1161_v58 = vsel %vm1013_vm2, %v6193_v34, inf  ;;  %v1167_v34 = vsel %vm1013_vm2, %v6207_v25, inf }
 0x185   : > { %v892_v8 = vpop.f32.mrb[55].mxu0  ;;  %v6233_v25 = vsub.f32 %v5952_v13, %v5184_v61 }
 0x187   : > { %8871 = vst [vmem:[#allocation19_spill] sm:$0xff] %v6233_v25  ;;  %v1179_v52 = vsel %vm1013_vm2, %v6233_v25, inf }
 0x188   : > { %1156 = vmin.xlane.f32.xlu1 %v1155_v2  ;;  %v5187_v6 = vpop.f32.mrb[56].mxu0 }
 0x189   : > { %v902_v11 = vpop.f32.mrb[57].mxu0 }
 0x18c   : > { %1153 = vmin.xlane.f32.xlu1 %v1152_v40  ;;  %v5190_v48 = vpop.f32.mrb[58].mxu0  ;;  %v1158_v40 = vsel %vm1013_vm2, %v6202_v63, inf  ;;  %v6230_v63 = vsub.f32 %v5952_v13, %v882_v57 }
 0x18d   : > { %v6199_v21 = vpop.f32.mrb[59].mxu0 }
 0x18e   : > { %8870 = vst [vmem:[#allocation18_spill] sm:$0xff] %v6230_v63  ;;  %v1170_v45 = vsel %vm1013_vm2, %v6230_v63, inf }
 0x190   : > { %1162 = vmin.xlane.f32.xlu1 %v1161_v58  ;;  %v6204_v18 = vpop.f32.mrb[60].mxu0  ;;  %v1164_v58 = vsel %vm1013_vm2, %v6220_v31, inf }
 0x191   : > { %v6209_v2 = vpop.f32.mrb[61].mxu0 }
 0x194   : > { %1159 = vmin.xlane.f32.xlu1 %v1158_v40  ;;  %v6213_v12 = vpop.f32.mrb[62].mxu0  ;;  %v1173_v40 = vsel %vm1013_vm2, %v6223_v39, inf }
 0x195   : > { %v6217_v43 = vpop.f32.mrb[63].mxu0 }
 0x198   : > { %1168 = vmin.xlane.f32.xlu1 %v1167_v34  ;;  %v8728_v34 = vlaneseq }
 0x19a   : > { %v6243_v31 = vand.u32 127, %v8728_v34 }
 0x19c   : > { %1165 = vmin.xlane.f32.xlu1 %v1164_v58  ;;  %v6240_v58 = vsub.f32 %v5952_v13, %v892_v8  ;;  %8872 = vst [vmem:[#allocation20_spill] sm:$0xff] %v6243_v31 }
 0x1a0   : > { %1174 = vmin.xlane.f32.xlu1 %v1173_v40  ;;  %v6246_v40 = vsub.f32 %v5952_v13, %v5187_v6 }
 0x1a2   : > { %8873 = vst [vmem:[#allocation21_spill] sm:$0xff] %v6246_v40 }
 0x1a4   : > { %1171 = vmin.xlane.f32.xlu1 %v1170_v45  ;;  %v1176_v45 = vsel %vm1013_vm2, %v6240_v58, inf }
 0x1a8   : > { %1180 = vmin.xlane.f32.xlu1 %v1179_v52  ;;  %v1185_v52 = vsel %vm1013_vm2, %v6246_v40, inf }
 0x1a9   : > { %v1019_v57 = vpop.xlane.xlu0 %1018 }
 0x1aa   : > { %vm1207_vm3 = vcmp.eq.f32.partialorder %v5955_v15, %v1019_v57  ;;  %v6261_v15 = vsub.f32 %v5952_v13, %v902_v11 }
 0x1ab   : > { %v1271_v61 = vsel %vm1207_vm3, %v6243_v31, 64 }
 0x1ac   : > { %1177 = vmin.xlane.f32.xlu1 %v1176_v45  ;;  %v6253_v63 = vsel %vm1013_vm2, %v1271_v61, 2147483647 }
 0x1ad   : > { %8874 = vst [vmem:[#allocation22_spill] sm:$0xff] %v6253_v63  ;;  %v1016_v8 = vpop.xlane.xlu0 %1015  ;;  %v1025_v25 = vpop.xlane.xlu1 %1024  ;;  %v1351_v34 = vshra.s32 %v6253_v63, 16 }
 0x1ae   : > { %vm1206_vm4 = vcmp.eq.f32.partialorder %v5958_v17, %v1016_v8  ;;  %vm1209_vm5 = vcmp.eq.f32.partialorder %v5963_v20, %v1025_v25  ;;  %v6275_v17 = vsub.f32 %v5952_v13, %v5190_v48 }
 0x1af   : > { %v1270_v6 = vsel %vm1206_vm4, %v6243_v31, 64  ;;  %v1273_v57 = vsel %vm1209_vm5, %v6243_v31, 64  ;;  %v6265_v61 = vcvt.s32.f32 %v1351_v34  ;;  %v1182_v34 = vsel %vm1013_vm2, %v6261_v15, inf }
 0x1b0   : > { %1186 = vmin.xlane.f32.xlu1 %v1185_v52  ;;  %v6268_v45 = vsel %vm1013_vm2, %v1270_v6, 2147483647  ;;  %v6271_v40 = vsel %vm1013_vm2, %v1273_v57, 2147483647 }
 0x1b1   : > { %8875 = vst [vmem:[#allocation23_spill] sm:$0xff] %v6271_v40  ;;  %v1022_v63 = vpop.xlane.xlu1 %1021  ;;  %1354 = vmin.xlane.f32.xlu0 %v6265_v61  ;;  %v1336_v20 = vshra.s32 %v6268_v45, 16  ;;  %v1381_v52 = vshra.s32 %v6271_v40, 16 }
 0x1b2   : > { %vm1208_vm6 = vcmp.eq.f32.partialorder %v5966_v22, %v1022_v63  ;;  %v1028_v25 = vpop.xlane.xlu0 %1027  ;;  %v1191_v22 = vsel %vm1013_vm2, %v6275_v17, inf  ;;  %v6295_v63 = vsub.f32 %v5952_v13, %v6199_v21 }
 0x1b3   : > { %v1272_v11 = vsel %vm1208_vm6, %v6243_v31, 64  ;;  %v6282_v8 = vcvt.s32.f32 %v1336_v20  ;;  %vm1210_vm7 = vcmp.eq.f32.partialorder %v5976_v28, %v1028_v25  ;;  %v6298_v20 = vcvt.s32.f32 %v1381_v52 }
 0x1b4   : > { %1183 = vmin.xlane.f32.xlu1 %v1182_v34  ;;  %v6286_v6 = vsel %vm1013_vm2, %v1272_v11, 2147483647  ;;  %v1188_v21 = vsel %vm1013_vm2, %v6295_v63, inf }
 0x1b5   : > { %8876 = vst [vmem:[#allocation24_spill] sm:$0xff] %v6282_v8  ;;  %v1031_v48 = vpop.xlane.xlu1 %1030  ;;  %1339 = vmin.xlane.f32.xlu0 %v6282_v8  ;;  %v1366_v11 = vshra.s32 %v6286_v6, 16  ;;  %v1274_v8 = vsel %vm1210_vm7, %v6243_v31, 64 }
 0x1b6   : > { %vm1211_vm8 = vcmp.eq.f32.partialorder %v5973_v26, %v1031_v48  ;;  %v6308_v26 = vsub.f32 %v5952_v13, %v6204_v18  ;;  %v1034_v28 = vpop.xlane.xlu0 %1033  ;;  %v6317_v48 = vsel %vm1013_vm2, %v1274_v8, 2147483647  ;;  %v6326_v18 = vsub.f32 %v5952_v13, %v6209_v2 }
 0x1b7   : > { %v1275_v57 = vsel %vm1211_vm8, %v6243_v31, 64  ;;  %v6313_v25 = vcvt.s32.f32 %v1366_v11  ;;  %8879 = vst [vmem:[#allocation27_spill] sm:$0xff] %v6317_v48  ;;  %vm1212_vm10 = vcmp.eq.f32.partialorder %v5988_v35, %v1034_v28  ;;  %v1396_v11 = vshra.s32 %v6317_v48, 16 }
 0x1b8   : > { %1192 = vmin.xlane.f32.xlu1 %v1191_v22  ;;  %v6302_v34 = vsel %vm1013_vm2, %v1275_v57, 2147483647  ;;  %v6338_v35 = vsub.f32 %v5952_v13, %v6213_v12  ;;  %v1194_v2 = vsel %vm1013_vm2, %v6326_v18, inf }
 0x1b9   : > { %8877 = vst [vmem:[#allocation25_spill] sm:$0xff] %v6302_v34  ;;  %v1037_v40 = vpop.xlane.xlu1 %1036  ;;  %1384 = vmin.xlane.f32.xlu0 %v6298_v20  ;;  %8878 = vst [vmem:[#allocation26_spill] sm:$0xff] %v6313_v25  ;;  %v1411_v52 = vshra.s32 %v6302_v34, 16  ;;  %v6343_v28 = vcvt.s32.f32 %v1396_v11 }
 0x1ba   : > { %vm1213_vm9 = vcmp.eq.f32.partialorder %v5983_v32, %v1037_v40  ;;  %v1197_v32 = vsel %vm1013_vm2, %v6308_v26, inf  ;;  %v1203_v12 = vsel %vm1013_vm2, %v6338_v35, inf }
 0x1bb   : > { %v1277_v22 = vsel %vm1213_vm9, %v6243_v31, 64  ;;  %v6328_v40 = vcvt.s32.f32 %v1411_v52  ;;  %8881 = vst [vmem:[#allocation29_spill] sm:$0xff] %v6343_v28 }
 0x1bc   : > { %1189 = vmin.xlane.f32.xlu1 %v1188_v21  ;;  %v6332_v8 = vsel %vm1013_vm2, %v1277_v22, 2147483647  ;;  %v1276_v21 = vsel %vm1212_vm10, %v6243_v31, 64 }
 0x1bd   : > { %v1043_v57 = vpop.xlane.xlu1 %1042  ;;  %1369 = vmin.xlane.f32.xlu0 %v6313_v25  ;;  %8880 = vst [vmem:[#allocation28_spill] sm:$0xff] %v6332_v8  ;;  %v1040_v25 = vpop.xlane.xlu0 %1039  ;;  %v1441_v52 = vshra.s32 %v6332_v8, 16  ;;  %v6347_v22 = vsel %vm1013_vm2, %v1276_v21, 2147483647 }
 0x1be   : > { %vm1215_vm11 = vcmp.eq.f32.partialorder %v5993_v38, %v1043_v57  ;;  %8882 = vst [vmem:[#allocation30_spill] sm:$0xff] %v6347_v22  ;;  %vm1214_vm12 = vcmp.eq.f32.partialorder %v5998_v41, %v1040_v25  ;;  %v6356_v57 = vsub.f32 %v5952_v13, %v6217_v43  ;;  %v1426_v21 = vshra.s32 %v6347_v22, 16 }
 0x1bf   : > { %v6358_v11 = vcvt.s32.f32 %v1441_v52 }
 0x1c0   : > { %1198 = vmin.xlane.f32.xlu1 %v1197_v32  ;;  %v1279_v32 = vsel %vm1215_vm11, %v6243_v31, 64  ;;  %v1200_v41 = vsel %vm1013_vm2, %v6356_v57, inf  ;;  %v6369_v13 = vcvt.s32.f32 %v1426_v21 }
 0x1c1   : > { %v1049_v34 = vpop.xlane.xlu1 %1048  ;;  %1414 = vmin.xlane.f32.xlu0 %v6328_v40  ;;  %v1046_v38 = vpop.xlane.xlu0 %1045 }
 0x1c2   : > { %vm1217_vm13 = vcmp.eq.f32.partialorder %v6003_v44, %v1049_v34  ;;  %8884 = vst [vmem:[#allocation32_spill] sm:$0xff] %v6369_v13  ;;  %vm1216_vm14 = vcmp.eq.f32.partialorder %v6008_v47, %v1046_v38 }
 0x1c3   : > { %v1281_v52 = vsel %vm1217_vm13, %v6243_v31, 64 }
 0x1c4   : > { %1195 = vmin.xlane.f32.xlu1 %v1194_v2  ;;  %v6362_v2 = vsel %vm1013_vm2, %v1279_v32, 2147483647  ;;  %v6382_v21 = vsel %vm1013_vm2, %v1281_v52, 2147483647 }
 0x1c5   : > { %v1055_v48 = vpop.xlane.xlu1 %1054  ;;  %1399 = vmin.xlane.f32.xlu0 %v6343_v28  ;;  %8883 = vst [vmem:[#allocation31_spill] sm:$0xff] %v6362_v2  ;;  %v1278_v28 = vsel %vm1214_vm12, %v6243_v31, 64  ;;  %v1471_v43 = vshra.s32 %v6362_v2, 16  ;;  %v1052_v32 = vpop.xlane.xlu0 %1051  ;;  %8886 = vst [vmem:[#allocation34_spill] sm:$0xff] %v6382_v21  ;;  %v1501_v47 = vshra.s32 %v6382_v21, 16 }
 0x1c6   : > { %v6373_v25 = vsel %vm1013_vm2, %v1278_v28, 2147483647  ;;  %vm1219_vm15 = vcmp.eq.f32.partialorder %v6013_v50, %v1055_v48  ;;  %vm1218_vm1 = vcmp.eq.f32.partialorder %v6018_v53, %v1052_v32 }
 0x1c7   : > { %8885 = vst [vmem:[#allocation33_spill] sm:$0xff] %v6373_v25  ;;  %v6378_v44 = vcvt.s32.f32 %v1471_v43  ;;  %v1456_v34 = vshra.s32 %v6373_v25, 16  ;;  %v1283_v43 = vsel %vm1219_vm15, %v6243_v31, 64  ;;  %v6400_v25 = vcvt.s32.f32 %v1501_v47 }
 0x1c8   : > { %1204 = vmin.xlane.f32.xlu1 %v1203_v12  ;;  %v6404_v48 = vsel %vm1013_vm2, %v1283_v43, 2147483647 }
 0x1c9   : > { %v1061_v8 = vpop.xlane.xlu1 %1060  ;;  %1444 = vmin.xlane.f32.xlu0 %v6358_v11  ;;  %v1058_v28 = vpop.xlane.xlu0 %1057  ;;  %v6389_v22 = vcvt.s32.f32 %v1456_v34  ;;  %8889 = vst [vmem:[#allocation37_spill] sm:$0xff] %v6404_v48  ;;  %v1282_v34 = vsel %vm1218_vm1, %v6243_v31, 64  ;;  %v1531_v53 = vshra.s32 %v6404_v48, 16 }
 0x1ca   : > { %vm1221_vm3 = vcmp.eq.f32.partialorder %v6023_v56, %v1061_v8  ;;  %v6415_v32 = vsel %vm1013_vm2, %v1282_v34, 2147483647  ;;  %vm1220_vm4 = vcmp.eq.f32.partialorder %v6028_v59, %v1058_v28 }
 0x1cb   : > { %8887 = vst [vmem:[#allocation35_spill] sm:$0xff] %v6389_v22  ;;  %8891 = vst [vmem:[#allocation39_spill] sm:$0xff] %v6415_v32  ;;  %v1285_v47 = vsel %vm1221_vm3, %v6243_v31, 64  ;;  %v6422_v56 = vcvt.s32.f32 %v1531_v53  ;;  %v1516_v8 = vshra.s32 %v6415_v32, 16  ;;  %v1284_v48 = vsel %vm1220_vm4, %v6243_v31, 64 }
 0x1cc   : > { %1201 = vmin.xlane.f32.xlu1 %v1200_v41  ;;  %v1280_v41 = vsel %vm1216_vm14, %v6243_v31, 64  ;;  %v6429_v34 = vsel %vm1013_vm2, %v1285_v47, 2147483647 }
 0x1cd   : > { %v1067_v12 = vpop.xlane.xlu1 %1066  ;;  %1429 = vmin.xlane.f32.xlu0 %v6369_v13  ;;  %v6393_v38 = vsel %vm1013_vm2, %v1280_v41, 2147483647  ;;  %v1064_v21 = vpop.xlane.xlu0 %1063  ;;  %v6437_v28 = vcvt.s32.f32 %v1516_v8  ;;  %v1561_v53 = vshra.s32 %v6429_v34, 16 }
 0x1ce   : > { %8888 = vst [vmem:[#allocation36_spill] sm:$0xff] %v6393_v38  ;;  %v1486_v50 = vshra.s32 %v6393_v38, 16  ;;  %vm1223_vm6 = vcmp.eq.f32.partialorder %v6033_v62, %v1067_v12  ;;  %vm1222_vm8 = vcmp.eq.f32.partialorder %v6038_v1, %v1064_v21 }
 0x1cf   : > { %v6457_v12 = vcvt.s32.f32 %v1561_v53 }
 0x1d0   : > { %v6411_v13 = vcvt.s32.f32 %v1486_v50 }
 0x1d1   : > { %v6385_v2 = vpop.xlane.xlu1 %1072  ;;  %1474 = vmin.xlane.f32.xlu0 %v6378_v44  ;;  %v1070_v38 = vpop.xlane.xlu0 %1069 }
 0x1d2   : > { %8890 = vst [vmem:[#allocation38_spill] sm:$0xff] %v6411_v13  ;;  %vm1225_vm10 = vcmp.eq.f32.partialorder %v6043_v4, %v6385_v2  ;;  %vm1224_vm12 = vcmp.eq.f32.partialorder %v6048_v7, %v1070_v38 }
 0x1d3   : > { %v1289_v4 = vsel %vm1225_vm10, %v6243_v31, 64 }
 0x1d5   : > { %v6396_v52 = vpop.xlane.xlu1 %1078  ;;  %1459 = vmin.xlane.f32.xlu0 %v6389_v22  ;;  %v6449_v32 = vpop.xlane.xlu0 %1075 }
 0x1d6   : > { %vm1227_vm14 = vcmp.eq.f32.partialorder %v6053_v10, %v6396_v52  ;;  %vm1226_vm1 = vcmp.eq.f32.partialorder %v6058_v14, %v6449_v32 }
 0x1d9   : > { %v6407_v41 = vpop.xlane.xlu1 %1084  ;;  %1504 = vmin.xlane.f32.xlu0 %v6400_v25 }
 0x1da   : > { %vm1229_vm4 = vcmp.eq.f32.partialorder %v6063_v19, %v6407_v41 }
 0x1dd   : > { %v1091_v43 = vpop.xlane.xlu1 %1090  ;;  %1489 = vmin.xlane.f32.xlu0 %v6411_v13 }
 0x1de   : > { %vm1231_vm5 = vcmp.eq.f32.partialorder %v6073_v29, %v1091_v43  ;;  %v6446_v43 = vsel %vm1013_vm2, %v1284_v48, 2147483647 }
 0x1df   : > { %v1295_v22 = vsel %vm1231_vm5, %v6243_v31, 64  ;;  %v1546_v8 = vshra.s32 %v6446_v43, 16 }
 0x1e0   : > { %v6426_v50 = vsel %vm1013_vm2, %v1295_v22, 2147483647 }
 0x1e1   : > { %8892 = vst [vmem:[#allocation40_spill] sm:$0xff] %v6426_v50  ;;  %v1097_v13 = vpop.xlane.xlu1 %1096  ;;  %1534 = vmin.xlane.f32.xlu0 %v6422_v56  ;;  %v1711_v59 = vshra.s32 %v6426_v50, 16  ;;  %v1287_v50 = vsel %vm1223_vm6, %v6243_v31, 64 }
 0x1e2   : > { %vm1233_vm7 = vcmp.eq.f32.partialorder %v6083_v37, %v1097_v13 }
 0x1e3   : > { %v1297_v29 = vsel %vm1233_vm7, %v6243_v31, 64  ;;  %v6439_v22 = vcvt.s32.f32 %v1711_v59 }
 0x1e4   : > { %v6443_v47 = vsel %vm1013_vm2, %v1297_v29, 2147483647  ;;  %v6466_v29 = vsel %vm1013_vm2, %v1287_v50, 2147483647  ;;  %v6478_v50 = vcvt.s32.f32 %v1546_v8 }
 0x1e5   : > { %8893 = vst [vmem:[#allocation41_spill] sm:$0xff] %v6439_v22  ;;  %8894 = vst [vmem:[#allocation42_spill] sm:$0xff] %v6443_v47  ;;  %v1103_v62 = vpop.xlane.xlu1 %1102  ;;  %1519 = vmin.xlane.f32.xlu0 %v6437_v28  ;;  %1714 = vmin.xlane.f32.xlu1 %v6439_v22  ;;  %v1741_v37 = vshra.s32 %v6443_v47, 16  ;;  %v1286_v47 = vsel %vm1222_vm8, %v6243_v31, 64 }
 0x1e6   : > { %vm1235_vm9 = vcmp.eq.f32.partialorder %v6093_v46, %v1103_v62  ;;  %v6475_v46 = vpop.xlane.xlu0 %1081  ;;  %v1591_v62 = vshra.s32 %v6466_v29, 16 }
 0x1e7   : > { %v1299_v13 = vsel %vm1235_vm9, %v6243_v31, 64  ;;  %v6459_v48 = vcvt.s32.f32 %v1741_v37  ;;  %vm1228_vm6 = vcmp.eq.f32.partialorder %v6068_v24, %v6475_v46 }
 0x1e8   : > { %v6463_v59 = vsel %vm1013_vm2, %v1299_v13, 2147483647  ;;  %v6487_v13 = vsel %vm1013_vm2, %v1286_v47, 2147483647  ;;  %v6496_v8 = vcvt.s32.f32 %v1591_v62 }
 0x1e9   : > { %8895 = vst [vmem:[#allocation43_spill] sm:$0xff] %v6463_v59  ;;  %v1109_v22 = vpop.xlane.xlu1 %1108  ;;  %1564 = vmin.xlane.f32.xlu0 %v6457_v12  ;;  %1744 = vmin.xlane.f32.xlu1 %v6459_v48  ;;  %v1771_v1 = vshra.s32 %v6463_v59, 16  ;;  %v1576_v47 = vshra.s32 %v6487_v13, 16  ;;  %v6505_v59 = vsel %vm1013_vm2, %v1289_v4, 2147483647 }
 0x1ea   : > { %vm1237_vm11 = vcmp.eq.f32.partialorder %v6103_v55, %v1109_v22 }
 0x1eb   : > { %v1301_v21 = vsel %vm1237_vm11, %v6243_v31, 64  ;;  %v6480_v53 = vcvt.s32.f32 %v1771_v1  ;;  %v6517_v62 = vcvt.s32.f32 %v1576_v47 }
 0x1ec   : > { %v6484_v37 = vsel %vm1013_vm2, %v1301_v21, 2147483647 }
 0x1ed   : > { %8896 = vst [vmem:[#allocation44_spill] sm:$0xff] %v6480_v53  ;;  %8897 = vst [vmem:[#allocation45_spill] sm:$0xff] %v6484_v37  ;;  %v1115_v2 = vpop.xlane.xlu1 %1114  ;;  %1549 = vmin.xlane.f32.xlu0 %v6478_v50  ;;  %1774 = vmin.xlane.f32.xlu1 %v6480_v53  ;;  %v1801_v55 = vshra.s32 %v6484_v37, 16  ;;  %v1288_v37 = vsel %vm1224_vm12, %v6243_v31, 64  ;;  %v6508_v53 = vpop.xlane.xlu0 %1087 }
 0x1ee   : > { %vm1239_vm13 = vcmp.eq.f32.partialorder %v6113_v0, %v1115_v2  ;;  %v1621_v2 = vshra.s32 %v6505_v59, 16  ;;  %vm1230_vm8 = vcmp.eq.f32.partialorder %v6078_v33, %v6508_v53 }
 0x1ef   : > { %v1303_v22 = vsel %vm1239_vm13, %v6243_v31, 64  ;;  %v6498_v1 = vcvt.s32.f32 %v1801_v55 }
 0x1f0   : > { %v6502_v21 = vsel %vm1013_vm2, %v1303_v22, 2147483647  ;;  %v6526_v22 = vsel %vm1013_vm2, %v1288_v37, 2147483647  ;;  %v6536_v47 = vcvt.s32.f32 %v1621_v2 }
 0x1f1   : > { %8898 = vst [vmem:[#allocation46_spill] sm:$0xff] %v6498_v1  ;;  %8899 = vst [vmem:[#allocation47_spill] sm:$0xff] %v6502_v21  ;;  %v1121_v7 = vpop.xlane.xlu1 %1120  ;;  %1594 = vmin.xlane.f32.xlu0 %v6496_v8  ;;  %1804 = vmin.xlane.f32.xlu1 %v6498_v1  ;;  %v1831_v0 = vshra.s32 %v6502_v21, 16  ;;  %v1291_v21 = vsel %vm1227_vm14, %v6243_v31, 64 }
 0x1f2   : > { %vm1241_vm15 = vcmp.eq.f32.partialorder %v6123_v9, %v1121_v7  ;;  %v1094_v9 = vpop.xlane.xlu0 %1093  ;;  %v1606_v7 = vshra.s32 %v6526_v22, 16 }
 0x1f3   : > { %v1305_v38 = vsel %vm1241_vm15, %v6243_v31, 64  ;;  %v6519_v4 = vcvt.s32.f32 %v1831_v0  ;;  %vm1232_vm9 = vcmp.eq.f32.partialorder %v6088_v42, %v1094_v9 }
 0x1f4   : > { %v6523_v55 = vsel %vm1013_vm2, %v1305_v38, 2147483647  ;;  %v6545_v38 = vsel %vm1013_vm2, %v1291_v21, 2147483647 }
 0x1f5   : > { %8900 = vst [vmem:[#allocation48_spill] sm:$0xff] %v6519_v4  ;;  %8901 = vst [vmem:[#allocation49_spill] sm:$0xff] %v6523_v55  ;;  %v1127_v1 = vpop.xlane.xlu1 %1126  ;;  %1579 = vmin.xlane.f32.xlu0 %v6517_v62  ;;  %1834 = vmin.xlane.f32.xlu1 %v6519_v4  ;;  %v1861_v10 = vshra.s32 %v6523_v55, 16  ;;  %v1290_v55 = vsel %vm1226_vm1, %v6243_v31, 64  ;;  %v1651_v2 = vshra.s32 %v6545_v38, 16 }
 0x1f6   : > { %vm1243_vm3 = vcmp.eq.f32.partialorder %v6133_v23, %v1127_v1  ;;  %v6555_v1 = vcvt.s32.f32 %v1606_v7 }
 0x1f7   : > { %v1307_v52 = vsel %vm1243_vm3, %v6243_v31, 64  ;;  %v6538_v37 = vcvt.s32.f32 %v1861_v10  ;;  %v6574_v7 = vcvt.s32.f32 %v1651_v2 }
 0x1f8   : > { %v6542_v0 = vsel %vm1013_vm2, %v1307_v52, 2147483647  ;;  %v6564_v52 = vsel %vm1013_vm2, %v1290_v55, 2147483647 }
 0x1f9   : > { %8902 = vst [vmem:[#allocation50_spill] sm:$0xff] %v6538_v37  ;;  %8903 = vst [vmem:[#allocation51_spill] sm:$0xff] %v6542_v0  ;;  %v1133_v14 = vpop.xlane.xlu1 %1132  ;;  %1624 = vmin.xlane.f32.xlu0 %v6536_v47  ;;  %1864 = vmin.xlane.f32.xlu1 %v6538_v37  ;;  %v1891_v23 = vshra.s32 %v6542_v0, 16  ;;  %v1293_v0 = vsel %vm1229_vm4, %v6243_v31, 64  ;;  %v1100_v37 = vpop.xlane.xlu0 %1099 }
 0x1fa   : > { %vm1245_vm5 = vcmp.eq.f32.partialorder %v6143_v36, %v1133_v14  ;;  %v1636_v14 = vshra.s32 %v6564_v52, 16  ;;  %vm1234_vm11 = vcmp.eq.f32.partialorder %v6098_v51, %v1100_v37 }
 0x1fb   : > { %v1309_v32 = vsel %vm1245_vm5, %v6243_v31, 64  ;;  %v6557_v21 = vcvt.s32.f32 %v1891_v23 }
 0x1fc   : > { %v6561_v10 = vsel %vm1013_vm2, %v1309_v32, 2147483647  ;;  %v6583_v32 = vsel %vm1013_vm2, %v1293_v0, 2147483647  ;;  %v6593_v2 = vcvt.s32.f32 %v1636_v14 }
 0x1fd   : > { %8904 = vst [vmem:[#allocation52_spill] sm:$0xff] %v6557_v21  ;;  %8905 = vst [vmem:[#allocation53_spill] sm:$0xff] %v6561_v10  ;;  %1609 = vmin.xlane.f32.xlu0 %v6555_v1  ;;  %v1139_v19 = vpop.xlane.xlu1 %1138  ;;  %1894 = vmin.xlane.f32.xlu1 %v6557_v21  ;;  %v1921_v36 = vshra.s32 %v6561_v10, 16  ;;  %v1292_v10 = vsel %vm1228_vm6, %v6243_v31, 64  ;;  %v1106_v46 = vpop.xlane.xlu0 %1105  ;;  %v1681_v0 = vshra.s32 %v6583_v32, 16 }
 0x1fe   : > { %vm1247_vm7 = vcmp.eq.f32.partialorder %v6153_v49, %v1139_v19  ;;  %vm1236_vm12 = vcmp.eq.f32.partialorder %v6108_v60, %v1106_v46 }
 0x1ff   : > { %v1311_v41 = vsel %vm1247_vm7, %v6243_v31, 64  ;;  %v6576_v55 = vcvt.s32.f32 %v1921_v36  ;;  %v6599_v36 = vsel %vm1013_vm2, %v1292_v10, 2147483647  ;;  %v6607_v53 = vcvt.s32.f32 %v1681_v0 }
 0x200   : > { %v6580_v23 = vsel %vm1013_vm2, %v1311_v41, 2147483647  ;;  %v1294_v41 = vsel %vm1230_vm8, %v6243_v31, 64  ;;  %v1666_v14 = vshra.s32 %v6599_v36, 16  ;;  %v1300_v4 = vsel %vm1236_vm12, %v6243_v31, 64 }
 0x201   : > { %8906 = vst [vmem:[#allocation54_spill] sm:$0xff] %v6576_v55  ;;  %8907 = vst [vmem:[#allocation55_spill] sm:$0xff] %v6580_v23  ;;  %1654 = vmin.xlane.f32.xlu0 %v6574_v7  ;;  %v6587_v24 = vpop.xlane.xlu1 %1135  ;;  %1924 = vmin.xlane.f32.xlu1 %v6576_v55  ;;  %v1951_v49 = vshra.s32 %v6580_v23, 16  ;;  %v1296_v23 = vsel %vm1232_vm9, %v6243_v31, 64  ;;  %v1112_v21 = vpop.xlane.xlu0 %1111 }
 0x202   : > { %v6622_v9 = vcvt.s32.f32 %v1666_v14  ;;  %vm1238_vm14 = vcmp.eq.f32.partialorder %v6118_v5, %v1112_v21 }
 0x203   : > { %v6595_v19 = vcvt.s32.f32 %v1951_v49  ;;  %v6614_v49 = vsel %vm1013_vm2, %v1294_v41, 2147483647  ;;  %v6628_v41 = vsel %vm1013_vm2, %v1296_v23, 2147483647 }
 0x204   : > { %v1696_v0 = vshra.s32 %v6614_v49, 16 }
 0x205   : > { %8908 = vst [vmem:[#allocation56_spill] sm:$0xff] %v6595_v19  ;;  %1639 = vmin.xlane.f32.xlu0 %v6593_v2  ;;  %v1145_v55 = vpop.xlane.xlu1 %1144  ;;  %1954 = vmin.xlane.f32.xlu1 %v6595_v19  ;;  %v1118_v51 = vpop.xlane.xlu0 %1117 }
 0x206   : > { %vm1249_vm10 = vcmp.eq.f32.partialorder %v6163_v3, %v1145_v55  ;;  %v6636_v14 = vcvt.s32.f32 %v1696_v0  ;;  %vm1240_vm15 = vcmp.eq.f32.partialorder %v6128_v16, %v1118_v51 }
 0x207   : > { %v1313_v33 = vsel %vm1249_vm10, %v6243_v31, 64 }
 0x208   : > { %v6611_v10 = vsel %vm1013_vm2, %v1313_v33, 2147483647  ;;  %v1298_v33 = vsel %vm1234_vm11, %v6243_v31, 64  ;;  %8911 = vst [vmem:[#allocation59_spill] sm:$0xff] %v6636_v14 }
 0x209   : > { %8909 = vst [vmem:[#allocation57_spill] sm:$0xff] %v6611_v10  ;;  %1684 = vmin.xlane.f32.xlu0 %v6607_v53  ;;  %v6618_v42 = vpop.xlane.xlu1 %1141  ;;  %v1981_v3 = vshra.s32 %v6611_v10, 16  ;;  %v6643_v10 = vsel %vm1013_vm2, %v1298_v33, 2147483647  ;;  %v1302_v33 = vsel %vm1238_vm14, %v6243_v31, 64 }
 0x20a   : > { %v1756_v0 = vshra.s32 %v6643_v10, 16 }
 0x20b   : > { %v6624_v55 = vcvt.s32.f32 %v1981_v3  ;;  %v1726_v3 = vshra.s32 %v6628_v41, 16 }
 0x20c   : > { %v6665_v21 = vcvt.s32.f32 %v1756_v0 }
 0x20d   : > { %8910 = vst [vmem:[#allocation58_spill] sm:$0xff] %v6624_v55  ;;  %1669 = vmin.xlane.f32.xlu0 %v6622_v9  ;;  %v1151_v19 = vpop.xlane.xlu1 %1150  ;;  %1984 = vmin.xlane.f32.xlu1 %v6624_v55  ;;  %v6651_v46 = vcvt.s32.f32 %v1726_v3  ;;  %v1124_v55 = vpop.xlane.xlu0 %1123 }
 0x20e   : > { %vm1251_vm13 = vcmp.eq.f32.partialorder %v6173_v27, %v1151_v19  ;;  %8914 = vst [vmem:[#allocation62_spill] sm:$0xff] %v6665_v21  ;;  %vm1242_vm3 = vcmp.eq.f32.partialorder %v6138_v30, %v1124_v55  ;;  %v8920_v30 = vld [vmem:[#allocation14_spill] sm:$0xff] }
 0x20f   : > { %v1315_v37 = vsel %vm1251_vm13, %v6243_v31, 64 }
 0x210   : > { %v6640_v23 = vsel %vm1013_vm2, %v1315_v37, 2147483647  ;;  %v6657_v37 = vsel %vm1013_vm2, %v1300_v4, 2147483647 }
 0x211   : > { %8912 = vst [vmem:[#allocation60_spill] sm:$0xff] %v6640_v23  ;;  %1699 = vmin.xlane.f32.xlu0 %v6636_v14  ;;  %v6647_v60 = vpop.xlane.xlu1 %1147  ;;  %v2011_v27 = vshra.s32 %v6640_v23, 16  ;;  %v1786_v3 = vshra.s32 %v6657_v37, 16  ;;  %v1304_v23 = vsel %vm1240_vm15, %v6243_v31, 64 }
 0x213   : > { %v6653_v19 = vcvt.s32.f32 %v2011_v27  ;;  %v6672_v27 = vsel %vm1013_vm2, %v1302_v33, 2147483647  ;;  %v6678_v51 = vcvt.s32.f32 %v1786_v3  ;;  %v1306_v33 = vsel %vm1242_vm3, %v6243_v31, 64 }
 0x214   : > { %8916 = vst [vmem:[#allocation64_spill] sm:$0xff] %v6672_v27  ;;  %v1816_v0 = vshra.s32 %v6672_v27, 16 }
 0x215   : > { %8913 = vst [vmem:[#allocation61_spill] sm:$0xff] %v6653_v19  ;;  %1729 = vmin.xlane.f32.xlu0 %v6651_v46  ;;  %v1157_v14 = vpop.xlane.xlu1 %1156  ;;  %2014 = vmin.xlane.f32.xlu1 %v6653_v19  ;;  %8917 = vst [vmem:[#allocation65_spill] sm:$0xff] %v6678_v51 }
 0x216   : > { %vm1253_vm1 = vcmp.eq.f32.partialorder %v6183_v54, %v1157_v14  ;;  %v1130_v54 = vpop.xlane.xlu0 %1129  ;;  %v6692_v3 = vcvt.s32.f32 %v1816_v0 }
 0x217   : > { %v1317_v5 = vsel %vm1253_vm1, %v6243_v31, 64 }
 0x218   : > { %v6669_v4 = vsel %vm1013_vm2, %v1317_v5, 2147483647  ;;  %v6684_v5 = vsel %vm1013_vm2, %v1304_v23, 2147483647  ;;  %v6696_v23 = vsel %vm1013_vm2, %v1306_v33, 2147483647 }
 0x219   : > { %8915 = vst [vmem:[#allocation63_spill] sm:$0xff] %v6669_v4  ;;  %1759 = vmin.xlane.f32.xlu0 %v6665_v21  ;;  %v1154_v19 = vpop.xlane.xlu1 %1153  ;;  %v2041_v16 = vshra.s32 %v6669_v4, 16  ;;  %v8919_v4 = vld [vmem:[#allocation9_spill] sm:$0xff]  ;;  %8922 = vst [vmem:[#allocation14_spill] sm:$0xff] %v6696_v23  ;;  %v1876_v33 = vshra.s32 %v6696_v23, 16 }
 0x21a   : > { %vm1244_vm4 = vcmp.eq.f32.partialorder %v8919_v4, %v1130_v54  ;;  %8921 = vst [vmem:[#allocation9_spill] sm:$0xff] %v6692_v3 }
 0x21b   : > { %v6680_v14 = vcvt.s32.f32 %v2041_v16  ;;  %v1846_v16 = vshra.s32 %v6684_v5, 16 }
 0x21d   : > { %8918 = vst [vmem:[#allocation66_spill] sm:$0xff] %v6680_v14  ;;  %1789 = vmin.xlane.f32.xlu0 %v6678_v51  ;;  %v1163_v21 = vpop.xlane.xlu1 %1162  ;;  %2044 = vmin.xlane.f32.xlu1 %v6680_v14  ;;  %v1308_v51 = vsel %vm1244_vm4, %v6243_v31, 64  ;;  %v6706_v54 = vcvt.s32.f32 %v1846_v16 }
 0x21e   : > { %vm1255_vm5 = vcmp.eq.f32.partialorder %v8920_v30, %v1163_v21  ;;  %v8924_v21 = vld [vmem:[#allocation10_spill] sm:$0xff]  ;;  %v6712_v30 = vsel %vm1013_vm2, %v1308_v51, 2147483647 }
 0x21f   : > { %v1319_v55 = vsel %vm1255_vm5, %v6243_v31, 64  ;;  %vm1246_vm6 = vcmp.eq.f32.partialorder %v8924_v21, %v6587_v24  ;;  %8925 = vst [vmem:[#allocation10_spill] sm:$0xff] %v6706_v54  ;;  %v8928_v24 = vld [vmem:[#allocation16_spill] sm:$0xff]  ;;  %v1906_v21 = vshra.s32 %v6712_v30, 16 }
 0x220   : > { %v6699_v27 = vsel %vm1013_vm2, %v1319_v55, 2147483647  ;;  %v1310_v55 = vsel %vm1246_vm6, %v6243_v31, 64 }
 0x221   : > { %8923 = vst [vmem:[#allocation67_spill] sm:$0xff] %v6699_v27  ;;  %1819 = vmin.xlane.f32.xlu0 %v6692_v3  ;;  %v1160_v14 = vpop.xlane.xlu1 %1159  ;;  %v2071_v4 = vshra.s32 %v6699_v27, 16  ;;  %v8927_v27 = vld [vmem:[#allocation11_spill] sm:$0xff]  ;;  %v6725_v51 = vsel %vm1013_vm2, %v1310_v55, 2147483647 }
 0x222   : > { %vm1248_vm7 = vcmp.eq.f32.partialorder %v8927_v27, %v6618_v42  ;;  %v8931_v27 = vld [vmem:[#allocation12_spill] sm:$0xff]  ;;  %v1936_v55 = vshra.s32 %v6725_v51, 16 }
 0x223   : > { %v6708_v0 = vcvt.s32.f32 %v2071_v4  ;;  %v6721_v4 = vcvt.s32.f32 %v1876_v33  ;;  %vm1250_vm9 = vcmp.eq.f32.partialorder %v8931_v27, %v6647_v60 }
 0x225   : > { %8926 = vst [vmem:[#allocation68_spill] sm:$0xff] %v6708_v0  ;;  %1849 = vmin.xlane.f32.xlu0 %v6706_v54  ;;  %v1169_v3 = vpop.xlane.xlu1 %1168  ;;  %2074 = vmin.xlane.f32.xlu1 %v6708_v0  ;;  %8929 = vst [vmem:[#allocation11_spill] sm:$0xff] %v6721_v4  ;;  %v1312_v54 = vsel %vm1248_vm7, %v6243_v31, 64 }
 0x226   : > { %vm1257_vm8 = vcmp.eq.f32.partialorder %v8928_v24, %v1169_v3  ;;  %v6735_v3 = vcvt.s32.f32 %v1906_v21  ;;  %v6741_v24 = vsel %vm1013_vm2, %v1312_v54, 2147483647  ;;  %v6749_v21 = vcvt.s32.f32 %v1936_v55 }
 0x227   : > { %v1321_v16 = vsel %vm1257_vm8, %v6243_v31, 64  ;;  %8934 = vst [vmem:[#allocation70_spill] sm:$0xff] %v6741_v24 }
 0x228   : > { %v6728_v23 = vsel %vm1013_vm2, %v1321_v16, 2147483647  ;;  %8932 = vst [vmem:[#allocation12_spill] sm:$0xff] %v6735_v3  ;;  %v1314_v16 = vsel %vm1250_vm9, %v6243_v31, 64 }
 0x229   : > { %8930 = vst [vmem:[#allocation16_spill] sm:$0xff] %v6728_v23  ;;  %1879 = vmin.xlane.f32.xlu0 %v6721_v4  ;;  %v1166_v0 = vpop.xlane.xlu1 %1165  ;;  %v2101_v42 = vshra.s32 %v6728_v23, 16  ;;  %v8935_v23 = vld [vmem:[#allocation13_spill] sm:$0xff]  ;;  %v6753_v54 = vsel %vm1013_vm2, %v1314_v16, 2147483647 }
 0x22a   : > { %vm1252_vm10 = vcmp.eq.f32.partialorder %v8935_v23, %v1154_v19  ;;  %8936 = vst [vmem:[#allocation13_spill] sm:$0xff] %v6749_v21  ;;  %v1996_v55 = vshra.s32 %v6753_v54, 16 }
 0x22b   : > { %v6737_v33 = vcvt.s32.f32 %v2101_v42  ;;  %v1966_v42 = vshra.s32 %v6741_v24, 16 }
 0x22d   : > { %8933 = vst [vmem:[#allocation69_spill] sm:$0xff] %v6737_v33  ;;  %1909 = vmin.xlane.f32.xlu0 %v6735_v3  ;;  %v1175_v4 = vpop.xlane.xlu1 %1174  ;;  %2104 = vmin.xlane.f32.xlu1 %v6737_v33  ;;  %v1316_v3 = vsel %vm1252_vm10, %v6243_v31, 64  ;;  %v6762_v23 = vcvt.s32.f32 %v1966_v42  ;;  %v6776_v42 = vcvt.s32.f32 %v1996_v55 }
 0x22e   : > { %vm1259_vm11 = vcmp.eq.f32.partialorder %v6223_v39, %v1175_v4  ;;  %v8938_v39 = vld [vmem:[#allocation15_spill] sm:$0xff]  ;;  %v6768_v16 = vsel %vm1013_vm2, %v1316_v3, 2147483647 }
 0x22f   : > { %v1323_v60 = vsel %vm1259_vm11, %v6243_v31, 64  ;;  %vm1254_vm12 = vcmp.eq.f32.partialorder %v8938_v39, %v1160_v14  ;;  %8939 = vst [vmem:[#allocation15_spill] sm:$0xff] %v6762_v23  ;;  %8941 = vst [vmem:[#allocation73_spill] sm:$0xff] %v6768_v16 }
 0x230   : > { %v6756_v27 = vsel %vm1013_vm2, %v1323_v60, 2147483647  ;;  %v1318_v60 = vsel %vm1254_vm12, %v6243_v31, 64 }
 0x231   : > { %8937 = vst [vmem:[#allocation71_spill] sm:$0xff] %v6756_v27  ;;  %1939 = vmin.xlane.f32.xlu0 %v6749_v21  ;;  %v1172_v33 = vpop.xlane.xlu1 %1171  ;;  %v2131_v19 = vshra.s32 %v6756_v27, 16  ;;  %v8942_v21 = vld [vmem:[#allocation17_spill] sm:$0xff]  ;;  %v8943_v27 = vld [vmem:[#allocation19_spill] sm:$0xff]  ;;  %v6780_v3 = vsel %vm1013_vm2, %v1318_v60, 2147483647 }
 0x232   : > { %vm1256_vm13 = vcmp.eq.f32.partialorder %v8942_v21, %v1166_v0  ;;  %v2056_v55 = vshra.s32 %v6780_v3, 16 }
 0x233   : > { %v6764_v4 = vcvt.s32.f32 %v2131_v19  ;;  %v2026_v19 = vshra.s32 %v6768_v16, 16 }
 0x235   : > { %8940 = vst [vmem:[#allocation72_spill] sm:$0xff] %v6764_v4  ;;  %1969 = vmin.xlane.f32.xlu0 %v6762_v23  ;;  %v1181_v24 = vpop.xlane.xlu1 %1180  ;;  %2134 = vmin.xlane.f32.xlu1 %v6764_v4  ;;  %v1320_v23 = vsel %vm1256_vm13, %v6243_v31, 64  ;;  %v6789_v21 = vcvt.s32.f32 %v2026_v19 }
 0x236   : > { %vm1261_vm14 = vcmp.eq.f32.partialorder %v8943_v27, %v1181_v24  ;;  %v8945_v24 = vld [vmem:[#allocation18_spill] sm:$0xff]  ;;  %v6795_v60 = vsel %vm1013_vm2, %v1320_v23, 2147483647 }
 0x237   : > { %v1325_v14 = vsel %vm1261_vm14, %v6243_v31, 64  ;;  %vm1258_vm15 = vcmp.eq.f32.partialorder %v8945_v24, %v1172_v33  ;;  %8946 = vst [vmem:[#allocation19_spill] sm:$0xff] %v6789_v21  ;;  %8948 = vst [vmem:[#allocation74_spill] sm:$0xff] %v6795_v60  ;;  %v2086_v23 = vshra.s32 %v6795_v60, 16 }
 0x238   : > { %v6783_v39 = vsel %vm1013_vm2, %v1325_v14, 2147483647  ;;  %v1322_v14 = vsel %vm1258_vm15, %v6243_v31, 64 }
 0x239   : > { %8944 = vst [vmem:[#allocation17_spill] sm:$0xff] %v6783_v39  ;;  %1999 = vmin.xlane.f32.xlu0 %v6776_v42  ;;  %v1178_v4 = vpop.xlane.xlu1 %1177  ;;  %v2161_v0 = vshra.s32 %v6783_v39, 16  ;;  %v8949_v39 = vld [vmem:[#allocation21_spill] sm:$0xff]  ;;  %v6809_v24 = vsel %vm1013_vm2, %v1322_v14, 2147483647 }
 0x23a   : > { %vm1260_vm1 = vcmp.eq.f32.partialorder %v6240_v58, %v1178_v4  ;;  %v2116_v14 = vshra.s32 %v6809_v24, 16 }
 0x23b   : > { %v6791_v27 = vcvt.s32.f32 %v2161_v0  ;;  %v6805_v0 = vcvt.s32.f32 %v2056_v55 }
 0x23d   : > { %8947 = vst [vmem:[#allocation18_spill] sm:$0xff] %v6791_v27  ;;  %2029 = vmin.xlane.f32.xlu0 %v6789_v21  ;;  %v1187_v16 = vpop.xlane.xlu1 %1186  ;;  %2164 = vmin.xlane.f32.xlu1 %v6791_v27  ;;  %8951 = vst [vmem:[#allocation75_spill] sm:$0xff] %v6805_v0  ;;  %v1324_v27 = vsel %vm1260_vm1, %v6243_v31, 64 }
 0x23e   : > { %vm1263_vm3 = vcmp.eq.f32.partialorder %v8949_v39, %v1187_v16  ;;  %v6802_v33 = vpop.xlane.xlu0 %1354  ;;  %v6820_v39 = vcvt.s32.f32 %v2086_v23 }
 0x23f   : > { %8950 = vst [vmem:[#allocation21_spill] sm:$0xff] %v6802_v33  ;;  %v1327_v19 = vsel %vm1263_vm3, %v6243_v31, 64  ;;  %vm1356_vm11 = vcmp.eq.f32.partialorder %v6265_v61, %v6802_v33  ;;  %v8974_v61 = vld [vmem:[#allocation24_spill] sm:$0xff] }
 0x240   : > { %v6812_v21 = vsel %vm1013_vm2, %v1327_v19, 2147483647  ;;  %8953 = vst [vmem:[#allocation77_spill] sm:$0xff] %v6820_v39  ;;  %v6826_v19 = vsel %vm1013_vm2, %v1324_v27, 2147483647 }
 0x241   : > { %8952 = vst [vmem:[#allocation76_spill] sm:$0xff] %v6812_v21  ;;  %2059 = vmin.xlane.f32.xlu0 %v6805_v0  ;;  %v1184_v58 = vpop.xlane.xlu1 %1183  ;;  %v2191_v4 = vshra.s32 %v6812_v21, 16  ;;  %8955 = vst [vmem:[#allocation79_spill] sm:$0xff] %v6826_v19 }
 0x242   : > { %vm1262_vm4 = vcmp.eq.f32.partialorder %v6261_v15, %v1184_v58  ;;  %v6818_v16 = vpop.xlane.xlu0 %1339  ;;  %v6835_v58 = vcvt.s32.f32 %v2116_v14 }
 0x243   : > { %v6822_v55 = vcvt.s32.f32 %v2191_v4  ;;  %v1326_v60 = vsel %vm1262_vm4, %v6243_v31, 64  ;;  %v2146_v4 = vshra.s32 %v6826_v19, 16  ;;  %vm1341_vm13 = vcmp.eq.f32.partialorder %v8974_v61, %v6818_v16  ;;  %v8978_v61 = vld [vmem:[#allocation28_spill] sm:$0xff] }
 0x244   : > { %8957 = vst [vmem:[#allocation81_spill] sm:$0xff] %v6835_v58  ;;  %v6839_v27 = vsel %vm1013_vm2, %v1326_v60, 2147483647 }
 0x245   : > { %8954 = vst [vmem:[#allocation78_spill] sm:$0xff] %v6822_v55  ;;  %2089 = vmin.xlane.f32.xlu0 %v6820_v39  ;;  %v1193_v0 = vpop.xlane.xlu1 %1192  ;;  %2194 = vmin.xlane.f32.xlu1 %v6822_v55  ;;  %v6850_v14 = vcvt.s32.f32 %v2146_v4  ;;  %v2176_v60 = vshra.s32 %v6839_v27, 16 }
 0x246   : > { %vm1265_vm5 = vcmp.eq.f32.partialorder %v6275_v17, %v1193_v0  ;;  %v6832_v15 = vpop.xlane.xlu0 %1384 }
 0x247   : > { %8956 = vst [vmem:[#allocation80_spill] sm:$0xff] %v6832_v15  ;;  %v1329_v23 = vsel %vm1265_vm5, %v6243_v31, 64  ;;  %8959 = vst [vmem:[#allocation83_spill] sm:$0xff] %v6850_v14  ;;  %v6864_v4 = vcvt.s32.f32 %v2176_v60  ;;  %vm1386_vm12 = vcmp.eq.f32.partialorder %v6298_v20, %v6832_v15  ;;  %v8976_v20 = vld [vmem:[#allocation26_spill] sm:$0xff] }
 0x248   : > { %v6842_v21 = vsel %vm1013_vm2, %v1329_v23, 2147483647 }
 0x249   : > { %8958 = vst [vmem:[#allocation82_spill] sm:$0xff] %v6842_v21  ;;  %2119 = vmin.xlane.f32.xlu0 %v6835_v58  ;;  %v1190_v39 = vpop.xlane.xlu1 %1189  ;;  %v2221_v55 = vshra.s32 %v6842_v21, 16  ;;  %8962 = vst [vmem:[#allocation86_spill] sm:$0xff] %v6864_v4 }
 0x24a   : > { %vm1264_vm6 = vcmp.eq.f32.partialorder %v6295_v63, %v1190_v39  ;;  %v6847_v17 = vpop.xlane.xlu0 %1369 }
 0x24b   : > { %v1328_v0 = vsel %vm1264_vm6, %v6243_v31, 64  ;;  %v6852_v19 = vcvt.s32.f32 %v2221_v55  ;;  %vm1371_vm15 = vcmp.eq.f32.partialorder %v8976_v20, %v6847_v17 }
 0x24c   : > { %v6856_v23 = vsel %vm1013_vm2, %v1328_v0, 2147483647 }
 0x24d   : > { %8960 = vst [vmem:[#allocation84_spill] sm:$0xff] %v6852_v19  ;;  %8961 = vst [vmem:[#allocation85_spill] sm:$0xff] %v6856_v23  ;;  %2149 = vmin.xlane.f32.xlu0 %v6850_v14  ;;  %v1199_v58 = vpop.xlane.xlu1 %1198  ;;  %2224 = vmin.xlane.f32.xlu1 %v6852_v19  ;;  %v2206_v55 = vshra.s32 %v6856_v23, 16 }
 0x24e   : > { %vm1267_vm7 = vcmp.eq.f32.partialorder %v6308_v26, %v1199_v58  ;;  %v6861_v63 = vpop.xlane.xlu0 %1414 }
 0x24f   : > { %v1331_v39 = vsel %vm1267_vm7, %v6243_v31, 64  ;;  %v6876_v58 = vcvt.s32.f32 %v2206_v55  ;;  %vm1416_vm14 = vcmp.eq.f32.partialorder %v6328_v40, %v6861_v63  ;;  %v8979_v40 = vld [vmem:[#allocation29_spill] sm:$0xff] }
 0x250   : > { %v6868_v21 = vsel %vm1013_vm2, %v1331_v39, 2147483647 }
 0x251   : > { %8963 = vst [vmem:[#allocation87_spill] sm:$0xff] %v6868_v21  ;;  %2179 = vmin.xlane.f32.xlu0 %v6864_v4  ;;  %v1196_v0 = vpop.xlane.xlu1 %1195  ;;  %v2251_v14 = vshra.s32 %v6868_v21, 16  ;;  %8964 = vst [vmem:[#allocation88_spill] sm:$0xff] %v6876_v58  ;;  %v8969_v21 = vld [vmem:[#allocation22_spill] sm:$0xff] }
 0x252   : > { %vm1266_vm8 = vcmp.eq.f32.partialorder %v6326_v18, %v1196_v0  ;;  %v6873_v19 = vpop.xlane.xlu0 %1399 }
 0x253   : > { %v1330_v26 = vsel %vm1266_vm8, %v6243_v31, 64  ;;  %v6878_v60 = vcvt.s32.f32 %v2251_v14  ;;  %vm1401_vm3 = vcmp.eq.f32.partialorder %v8979_v40, %v6873_v19 }
 0x254   : > { %v6881_v23 = vsel %vm1013_vm2, %v1330_v26, 2147483647 }
 0x255   : > { %8965 = vst [vmem:[#allocation89_spill] sm:$0xff] %v6878_v60  ;;  %8966 = vst [vmem:[#allocation90_spill] sm:$0xff] %v6881_v23  ;;  %2209 = vmin.xlane.f32.xlu0 %v6876_v58  ;;  %v1205_v39 = vpop.xlane.xlu1 %1204  ;;  %2254 = vmin.xlane.f32.xlu1 %v6878_v60  ;;  %v2236_v4 = vshra.s32 %v6881_v23, 16  ;;  %v1350_v60 = vand.u32 65535, %v8969_v21  ;;  %v1335_v21 = vand.u32 65535, %v6268_v45  ;;  %v8975_v45 = vld [vmem:[#allocation25_spill] sm:$0xff] }
 0x256   : > { %vm1269_vm9 = vcmp.eq.f32.partialorder %v6338_v35, %v1205_v39  ;;  %v6887_v18 = vpop.xlane.xlu0 %1444  ;;  %v1410_v33 = vand.u32 65535, %v8975_v45 }
 0x257   : > { %v1333_v0 = vsel %vm1269_vm9, %v6243_v31, 64  ;;  %v6890_v55 = vcvt.s32.f32 %v2236_v4  ;;  %vm1446_vm1 = vcmp.eq.f32.partialorder %v6358_v11, %v6887_v18  ;;  %v8983_v11 = vld [vmem:[#allocation33_spill] sm:$0xff] }
 0x258   : > { %v6893_v14 = vsel %vm1013_vm2, %v1333_v0, 2147483647  ;;  %v1412_v45 = vcvt.s32.f32 %v1410_v33 }
 0x259   : > { %8967 = vst [vmem:[#allocation91_spill] sm:$0xff] %v6890_v55  ;;  %8968 = vst [vmem:[#allocation92_spill] sm:$0xff] %v6893_v14  ;;  %2239 = vmin.xlane.f32.xlu0 %v6890_v55  ;;  %v1202_v26 = vpop.xlane.xlu1 %1201  ;;  %v2281_v58 = vshra.s32 %v6893_v14, 16  ;;  %v8972_v55 = vld [vmem:[#allocation23_spill] sm:$0xff]  ;;  %v1352_v14 = vcvt.s32.f32 %v1350_v60  ;;  %v1337_v60 = vcvt.s32.f32 %v1335_v21 }
 0x25a   : > { %vm1268_vm10 = vcmp.eq.f32.partialorder %v6356_v57, %v1202_v26  ;;  %v6899_v23 = vpop.xlane.xlu0 %1429  ;;  %v1380_v57 = vand.u32 65535, %v8972_v55 }
 0x25b   : > { %v1332_v35 = vsel %vm1268_vm10, %v6243_v31, 64  ;;  %v6902_v39 = vcvt.s32.f32 %v2281_v58  ;;  %v1357_v58 = vsel %vm1356_vm11, %v1352_v14, inf  ;;  %v8977_v14 = vld [vmem:[#allocation27_spill] sm:$0xff] }
 0x25c   : > { %v6905_v4 = vsel %vm1013_vm2, %v1332_v35, 2147483647  ;;  %v1365_v35 = vand.u32 65535, %v6286_v6  ;;  %v1440_v6 = vand.u32 65535, %v8978_v61 }
 0x25d   : > { %8970 = vst [vmem:[#allocation22_spill] sm:$0xff] %v6902_v39  ;;  %8971 = vst [vmem:[#allocation93_spill] sm:$0xff] %v6905_v4  ;;  %2284 = vmin.xlane.f32.xlu1 %v6902_v39  ;;  %v2266_v0 = vshra.s32 %v6905_v4, 16  ;;  %v1382_v39 = vcvt.s32.f32 %v1380_v57  ;;  %v1342_v4 = vsel %vm1341_vm13, %v1337_v60, inf  ;;  %v1417_v57 = vsel %vm1416_vm14, %v1412_v45, inf  ;;  %v8981_v60 = vld [vmem:[#allocation31_spill] sm:$0xff] }
 0x25e   : > { %v6913_v26 = vpop.xlane.xlu0 %1474  ;;  %v1455_v45 = vand.u32 65535, %v8983_v11 }
 0x25f   : > { %v6915_v31 = vcvt.s32.f32 %v2266_v0  ;;  %v1387_v0 = vsel %vm1386_vm12, %v1382_v39, inf  ;;  %v8980_v39 = vld [vmem:[#allocation30_spill] sm:$0xff]  ;;  %vm1476_vm4 = vcmp.eq.f32.partialorder %v6378_v44, %v6913_v26  ;;  %v8985_v44 = vld [vmem:[#allocation35_spill] sm:$0xff] }
 0x261   : > { %8973 = vst [vmem:[#allocation23_spill] sm:$0xff] %v6915_v31  ;;  %1358 = vmin.xlane.f32.xlu1 %v1357_v58  ;;  %2269 = vmin.xlane.f32.xlu0 %v6915_v31  ;;  %v1395_v58 = vand.u32 65535, %v8977_v14  ;;  %v1367_v31 = vcvt.s32.f32 %v1365_v35  ;;  %v1442_v14 = vcvt.s32.f32 %v1440_v6 }
 0x262   : > { %v6924_v55 = vpop.xlane.xlu0 %1459 }
 0x263   : > { %v1372_v21 = vsel %vm1371_vm15, %v1367_v31, inf  ;;  %v1397_v61 = vcvt.s32.f32 %v1395_v58  ;;  %v1447_v33 = vsel %vm1446_vm1, %v1442_v14, inf  ;;  %v8982_v31 = vld [vmem:[#allocation32_spill] sm:$0xff]  ;;  %vm1461_vm7 = vcmp.eq.f32.partialorder %v8985_v44, %v6924_v55 }
 0x264   : > { %vm1431_vm5 = vcmp.eq.f32.partialorder %v8982_v31, %v6899_v23  ;;  %v8986_v14 = vld [vmem:[#allocation36_spill] sm:$0xff] }
 0x265   : > { %1388 = vmin.xlane.f32.xlu1 %v1387_v0  ;;  %1343 = vmin.xlane.f32.xlu0 %v1342_v4  ;;  %v1425_v4 = vand.u32 65535, %v8980_v39  ;;  %v1470_v0 = vand.u32 65535, %v8981_v60  ;;  %v1402_v35 = vsel %vm1401_vm3, %v1397_v61, inf  ;;  %v1485_v61 = vand.u32 65535, %v8986_v14 }
 0x266   : > { %v6932_v15 = vpop.xlane.xlu0 %1504 }
 0x267   : > { %v1472_v39 = vcvt.s32.f32 %v1470_v0  ;;  %v1427_v60 = vcvt.s32.f32 %v1425_v4  ;;  %vm1506_vm6 = vcmp.eq.f32.partialorder %v6400_v25, %v6932_v15  ;;  %v8988_v25 = vld [vmem:[#allocation38_spill] sm:$0xff]  ;;  %v1487_v14 = vcvt.s32.f32 %v1485_v61 }
 0x269   : > { %1418 = vmin.xlane.f32.xlu1 %v1417_v57  ;;  %1373 = vmin.xlane.f32.xlu0 %v1372_v21  ;;  %v8984_v57 = vld [vmem:[#allocation34_spill] sm:$0xff]  ;;  %v1477_v6 = vsel %vm1476_vm4, %v1472_v39, inf  ;;  %v1432_v58 = vsel %vm1431_vm5, %v1427_v60, inf  ;;  %v8989_v39 = vld [vmem:[#allocation39_spill] sm:$0xff] }
 0x26a   : > { %v6940_v20 = vpop.xlane.xlu0 %1489  ;;  %v1500_v21 = vand.u32 65535, %v8984_v57  ;;  %v1457_v57 = vcvt.s32.f32 %v1455_v45  ;;  %v1515_v60 = vand.u32 65535, %v8989_v39 }
 0x26b   : > { %vm1491_vm9 = vcmp.eq.f32.partialorder %v8988_v25, %v6940_v20  ;;  %v1620_v25 = vand.u32 65535, %v6505_v59  ;;  %v1650_v59 = vand.u32 65535, %v6545_v38  ;;  %v1680_v38 = vand.u32 65535, %v6583_v32 }
 0x26c   : > { %v1502_v11 = vcvt.s32.f32 %v1500_v21  ;;  %v1462_v4 = vsel %vm1461_vm7, %v1457_v57, inf  ;;  %v1492_v45 = vsel %vm1491_vm9, %v1487_v14, inf  ;;  %v1517_v57 = vcvt.s32.f32 %v1515_v60 }
 0x26d   : > { %1448 = vmin.xlane.f32.xlu1 %v1447_v33  ;;  %1403 = vmin.xlane.f32.xlu0 %v1402_v35  ;;  %v8987_v33 = vld [vmem:[#allocation37_spill] sm:$0xff] }
 0x26e   : > { %v6948_v40 = vpop.xlane.xlu0 %1534  ;;  %v1530_v35 = vand.u32 65535, %v8987_v33  ;;  %v1507_v0 = vsel %vm1506_vm6, %v1502_v11, inf  ;;  %v1590_v33 = vand.u32 65535, %v6466_v29 }
 0x26f   : > { %vm1536_vm8 = vcmp.eq.f32.partialorder %v6422_v56, %v6948_v40  ;;  %v1545_v56 = vand.u32 65535, %v6446_v43 }
 0x270   : > { %v1532_v44 = vcvt.s32.f32 %v1530_v35 }
 0x271   : > { %1478 = vmin.xlane.f32.xlu1 %v1477_v6  ;;  %1433 = vmin.xlane.f32.xlu0 %v1432_v58  ;;  %v1560_v6 = vand.u32 65535, %v6429_v34 }
 0x272   : > { %v6956_v31 = vpop.xlane.xlu0 %1519  ;;  %v1537_v21 = vsel %vm1536_vm8, %v1532_v44, inf }
 0x273   : > { %vm1521_vm11 = vcmp.eq.f32.partialorder %v6437_v28, %v6956_v31  ;;  %v1562_v34 = vcvt.s32.f32 %v1560_v6  ;;  %v1592_v28 = vcvt.s32.f32 %v1590_v33  ;;  %v6987_v6 = vpop.xlane.xlu1 %1714 }
 0x274   : > { %v1522_v61 = vsel %vm1521_vm11, %v1517_v57, inf }
 0x275   : > { %1508 = vmin.xlane.f32.xlu1 %v1507_v0  ;;  %1463 = vmin.xlane.f32.xlu0 %v1462_v4  ;;  %v1547_v4 = vcvt.s32.f32 %v1545_v56  ;;  %v1635_v56 = vand.u32 65535, %v6564_v52  ;;  %v8990_v52 = vld [vmem:[#allocation40_spill] sm:$0xff] }
 0x276   : > { %v6964_v58 = vpop.xlane.xlu0 %1564 }
 0x277   : > { %vm1566_vm10 = vcmp.eq.f32.partialorder %v6457_v12, %v6964_v58  ;;  %v1575_v12 = vand.u32 65535, %v6487_v13  ;;  %v1605_v13 = vand.u32 65535, %v6526_v22 }
 0x278   : > { %v1567_v35 = vsel %vm1566_vm10, %v1562_v34, inf  ;;  %v1652_v34 = vcvt.s32.f32 %v1650_v59 }
 0x279   : > { %1538 = vmin.xlane.f32.xlu1 %v1537_v21  ;;  %1493 = vmin.xlane.f32.xlu0 %v1492_v45  ;;  %v1577_v60 = vcvt.s32.f32 %v1575_v12  ;;  %v1607_v45 = vcvt.s32.f32 %v1605_v13  ;;  %v1710_v12 = vand.u32 65535, %v8990_v52 }
 0x27a   : > { %v6972_v11 = vpop.xlane.xlu0 %1549 }
 0x27b   : > { %vm1551_vm12 = vcmp.eq.f32.partialorder %v6478_v50, %v6972_v11  ;;  %v1712_v13 = vcvt.s32.f32 %v1710_v12 }
 0x27c   : > { %v1552_v29 = vsel %vm1551_vm12, %v1547_v4, inf }
 0x27d   : > { %1568 = vmin.xlane.f32.xlu1 %v1567_v35  ;;  %1523 = vmin.xlane.f32.xlu0 %v1522_v61 }
 0x27e   : > { %v6977_v0 = vpop.xlane.xlu0 %1594 }
 0x27f   : > { %vm1596_vm13 = vcmp.eq.f32.partialorder %v6496_v8, %v6977_v0  ;;  %v1622_v8 = vcvt.s32.f32 %v1620_v25 }
 0x280   : > { %v1597_v43 = vsel %vm1596_vm13, %v1592_v28, inf  ;;  %v1665_v28 = vand.u32 65535, %v6599_v36 }
 0x281   : > { %1598 = vmin.xlane.f32.xlu1 %v1597_v43  ;;  %1553 = vmin.xlane.f32.xlu0 %v1552_v29  ;;  %v8991_v29 = vld [vmem:[#allocation41_spill] sm:$0xff] }
 0x282   : > { %v6982_v39 = vpop.xlane.xlu0 %1579  ;;  %vm1716_vm6 = vcmp.eq.f32.partialorder %v8991_v29, %v6987_v6  ;;  %v1667_v36 = vcvt.s32.f32 %v1665_v28 }
 0x283   : > { %vm1581_vm14 = vcmp.eq.f32.partialorder %v6517_v62, %v6982_v39  ;;  %v6998_v62 = vpop.xlane.xlu1 %1744 }
 0x284   : > { %v1582_v50 = vsel %vm1581_vm14, %v1577_v60, inf  ;;  %v1695_v60 = vand.u32 65535, %v6614_v49  ;;  %vm1746_vm8 = vcmp.eq.f32.partialorder %v6459_v48, %v6998_v62  ;;  %v8996_v48 = vld [vmem:[#allocation45_spill] sm:$0xff] }
 0x285   : > { %1583 = vmin.xlane.f32.xlu0 %v1582_v50 }
 0x286   : > { %v6989_v44 = vpop.xlane.xlu0 %1624 }
 0x287   : > { %vm1626_vm15 = vcmp.eq.f32.partialorder %v6536_v47, %v6989_v44  ;;  %v7006_v57 = vpop.xlane.xlu1 %1774 }
 0x288   : > { %v1627_v14 = vsel %vm1626_vm15, %v1622_v8, inf }
 0x289   : > { %1628 = vmin.xlane.f32.xlu1 %v1627_v14  ;;  %v8993_v14 = vld [vmem:[#allocation43_spill] sm:$0xff] }
 0x28a   : > { %v6994_v21 = vpop.xlane.xlu0 %1609  ;;  %v1770_v59 = vand.u32 65535, %v8993_v14 }
 0x28b   : > { %vm1611_vm1 = vcmp.eq.f32.partialorder %v6555_v1, %v6994_v21  ;;  %v1637_v1 = vcvt.s32.f32 %v1635_v56  ;;  %v7018_v32 = vpop.xlane.xlu1 %1804  ;;  %v1697_v56 = vcvt.s32.f32 %v1695_v60 }
 0x28c   : > { %v1612_v22 = vsel %vm1611_vm1, %v1607_v45, inf  ;;  %v1725_v45 = vand.u32 65535, %v6628_v41  ;;  %v1755_v41 = vand.u32 65535, %v6643_v10  ;;  %v1772_v28 = vcvt.s32.f32 %v1770_v59  ;;  %v9000_v59 = vld [vmem:[#allocation48_spill] sm:$0xff] }
 0x28d   : > { %1613 = vmin.xlane.f32.xlu0 %v1612_v22  ;;  %v1785_v10 = vand.u32 65535, %v6657_v37 }
 0x28e   : > { %v7001_v33 = vpop.xlane.xlu0 %1654  ;;  %v1727_v12 = vcvt.s32.f32 %v1725_v45  ;;  %v9001_v45 = vld [vmem:[#allocation64_spill] sm:$0xff] }
 0x28f   : > { %vm1656_vm3 = vcmp.eq.f32.partialorder %v6574_v7, %v7001_v33  ;;  %v1682_v7 = vcvt.s32.f32 %v1680_v38  ;;  %v7032_v22 = vpop.xlane.xlu1 %1834  ;;  %v1787_v37 = vcvt.s32.f32 %v1785_v10  ;;  %v9006_v10 = vld [vmem:[#allocation9_spill] sm:$0xff] }
 0x290   : > { %v1657_v47 = vsel %vm1656_vm3, %v1652_v34, inf  ;;  %vm1836_vm14 = vcmp.eq.f32.partialorder %v9000_v59, %v7032_v22 }
 0x291   : > { %1658 = vmin.xlane.f32.xlu1 %v1657_v47  ;;  %v8994_v47 = vld [vmem:[#allocation59_spill] sm:$0xff] }
 0x292   : > { %v7008_v35 = vpop.xlane.xlu0 %1639 }
 0x293   : > { %vm1641_vm4 = vcmp.eq.f32.partialorder %v6593_v2, %v7008_v35  ;;  %v8992_v2 = vld [vmem:[#allocation42_spill] sm:$0xff] }
 0x294   : > { %v1642_v61 = vsel %vm1641_vm4, %v1637_v1, inf  ;;  %v1740_v25 = vand.u32 65535, %v8992_v2  ;;  %v8995_v1 = vld [vmem:[#allocation44_spill] sm:$0xff]  ;;  %v8997_v2 = vld [vmem:[#allocation46_spill] sm:$0xff] }
 0x295   : > { %1643 = vmin.xlane.f32.xlu0 %v1642_v61  ;;  %vm1776_vm10 = vcmp.eq.f32.partialorder %v8995_v1, %v7006_v57  ;;  %v1800_v61 = vand.u32 65535, %v8996_v48  ;;  %vm1806_vm12 = vcmp.eq.f32.partialorder %v8997_v2, %v7018_v32  ;;  %v9003_v48 = vld [vmem:[#allocation65_spill] sm:$0xff]  ;;  %v1845_v2 = vand.u32 65535, %v6684_v5 }
 0x296   : > { %v7014_v4 = vpop.xlane.xlu0 %1684  ;;  %v1742_v34 = vcvt.s32.f32 %v1740_v25  ;;  %v1777_v29 = vsel %vm1776_vm10, %v1772_v28, inf  ;;  %v8998_v25 = vld [vmem:[#allocation47_spill] sm:$0xff] }
 0x297   : > { %vm1686_vm5 = vcmp.eq.f32.partialorder %v6607_v53, %v7014_v4  ;;  %v1717_v53 = vsel %vm1716_vm6, %v1712_v13, inf  ;;  %v1830_v60 = vand.u32 65535, %v8998_v25  ;;  %v1757_v13 = vcvt.s32.f32 %v1755_v41  ;;  %v9005_v25 = vld [vmem:[#allocation51_spill] sm:$0xff] }
 0x298   : > { %v1687_v43 = vsel %vm1686_vm5, %v1682_v7, inf  ;;  %v1747_v38 = vsel %vm1746_vm8, %v1742_v34, inf  ;;  %v7046_v7 = vpop.xlane.xlu1 %1864  ;;  %v1847_v59 = vcvt.s32.f32 %v1845_v2  ;;  %v1905_v2 = vand.u32 65535, %v6712_v30 }
 0x299   : > { %1688 = vmin.xlane.f32.xlu1 %v1687_v43  ;;  %v1935_v30 = vand.u32 65535, %v6725_v51 }
 0x29a   : > { %v7024_v50 = vpop.xlane.xlu0 %1669 }
 0x29b   : > { %vm1671_vm7 = vcmp.eq.f32.partialorder %v6622_v9, %v7024_v50 }
 0x29c   : > { %v1672_v8 = vsel %vm1671_vm7, %v1667_v36, inf  ;;  %v7059_v34 = vpop.xlane.xlu1 %1894 }
 0x29d   : > { %1673 = vmin.xlane.f32.xlu0 %v1672_v8  ;;  %1718 = vmin.xlane.f32.xlu1 %v1717_v53  ;;  %v1802_v8 = vcvt.s32.f32 %v1800_v61  ;;  %v8999_v53 = vld [vmem:[#allocation62_spill] sm:$0xff] }
 0x29e   : > { %v7034_v49 = vpop.xlane.xlu0 %1699 }
 0x29f   : > { %vm1701_vm9 = vcmp.eq.f32.partialorder %v8994_v47, %v7034_v49  ;;  %v1807_v14 = vsel %vm1806_vm12, %v1802_v8, inf }
 0x2a0   : > { %v1702_v9 = vsel %vm1701_vm9, %v1697_v56, inf  ;;  %v1815_v56 = vand.u32 65535, %v9001_v45 }
 0x2a1   : > { %1703 = vmin.xlane.f32.xlu0 %v1702_v9  ;;  %1748 = vmin.xlane.f32.xlu1 %v1747_v38  ;;  %v1832_v9 = vcvt.s32.f32 %v1830_v60  ;;  %v9002_v38 = vld [vmem:[#allocation49_spill] sm:$0xff]  ;;  %v1890_v60 = vand.u32 65535, %v9005_v25  ;;  %v9012_v25 = vld [vmem:[#allocation55_spill] sm:$0xff] }
 0x2a2   : > { %v7042_v52 = vpop.xlane.xlu0 %1729  ;;  %v1860_v1 = vand.u32 65535, %v9002_v38  ;;  %v9010_v38 = vld [vmem:[#allocation10_spill] sm:$0xff] }
 0x2a3   : > { %vm1731_vm11 = vcmp.eq.f32.partialorder %v6651_v46, %v7042_v52  ;;  %v1837_v41 = vsel %vm1836_vm14, %v1832_v9, inf  ;;  %v1892_v45 = vcvt.s32.f32 %v1890_v60  ;;  %v1950_v60 = vand.u32 65535, %v9012_v25 }
 0x2a4   : > { %v1732_v43 = vsel %vm1731_vm11, %v1727_v12, inf  ;;  %v9004_v12 = vld [vmem:[#allocation50_spill] sm:$0xff] }
 0x2a5   : > { %1733 = vmin.xlane.f32.xlu0 %v1732_v43  ;;  %1778 = vmin.xlane.f32.xlu1 %v1777_v29  ;;  %vm1866_vm1 = vcmp.eq.f32.partialorder %v9004_v12, %v7046_v7  ;;  %v1817_v43 = vcvt.s32.f32 %v1815_v56  ;;  %v1862_v29 = vcvt.s32.f32 %v1860_v1  ;;  %v9008_v56 = vld [vmem:[#allocation14_spill] sm:$0xff] }
 0x2a6   : > { %v7052_v36 = vpop.xlane.xlu0 %1759  ;;  %v1875_v5 = vand.u32 65535, %v9008_v56  ;;  %v1907_v56 = vcvt.s32.f32 %v1905_v2  ;;  %v1937_v2 = vcvt.s32.f32 %v1935_v30 }
 0x2a7   : > { %vm1761_vm13 = vcmp.eq.f32.partialorder %v8999_v53, %v7052_v36  ;;  %v1867_v53 = vsel %vm1866_vm1, %v1862_v29, inf }
 0x2a8   : > { %v1762_v46 = vsel %vm1761_vm13, %v1757_v13, inf  ;;  %v7074_v13 = vpop.xlane.xlu1 %1924 }
 0x2a9   : > { %1763 = vmin.xlane.f32.xlu0 %v1762_v46  ;;  %1808 = vmin.xlane.f32.xlu1 %v1807_v14  ;;  %v9007_v46 = vld [vmem:[#allocation52_spill] sm:$0xff] }
 0x2aa   : > { %v7061_v47 = vpop.xlane.xlu0 %1789  ;;  %vm1896_vm4 = vcmp.eq.f32.partialorder %v9007_v46, %v7059_v34  ;;  %v9014_v46 = vld [vmem:[#allocation56_spill] sm:$0xff] }
 0x2ab   : > { %vm1791_vm15 = vcmp.eq.f32.partialorder %v9003_v48, %v7061_v47  ;;  %v1897_v48 = vsel %vm1896_vm4, %v1892_v45, inf }
 0x2ac   : > { %v1792_v61 = vsel %vm1791_vm15, %v1787_v37, inf  ;;  %v9009_v37 = vld [vmem:[#allocation53_spill] sm:$0xff] }
 0x2ad   : > { %1793 = vmin.xlane.f32.xlu0 %v1792_v61  ;;  %1838 = vmin.xlane.f32.xlu1 %v1837_v41  ;;  %v1920_v9 = vand.u32 65535, %v9009_v37  ;;  %v9011_v61 = vld [vmem:[#allocation54_spill] sm:$0xff]  ;;  %v7086_v41 = vpop.xlane.xlu1 %1954  ;;  %v9015_v37 = vld [vmem:[#allocation57_spill] sm:$0xff] }
 0x2ae   : > { %v7068_v28 = vpop.xlane.xlu0 %1819  ;;  %vm1926_vm6 = vcmp.eq.f32.partialorder %v9011_v61, %v7074_v13  ;;  %vm1956_vm8 = vcmp.eq.f32.partialorder %v9014_v46, %v7086_v41  ;;  %v9017_v61 = vld [vmem:[#allocation58_spill] sm:$0xff] }
 0x2af   : > { %vm1821_vm3 = vcmp.eq.f32.partialorder %v9006_v10, %v7068_v28  ;;  %v1922_v29 = vcvt.s32.f32 %v1920_v9  ;;  %v9013_v10 = vld [vmem:[#allocation11_spill] sm:$0xff]  ;;  %v1980_v9 = vand.u32 65535, %v9015_v37 }
 0x2b0   : > { %v1822_v8 = vsel %vm1821_vm3, %v1817_v43, inf  ;;  %v1877_v43 = vcvt.s32.f32 %v1875_v5  ;;  %v1952_v5 = vcvt.s32.f32 %v1950_v60  ;;  %v9018_v60 = vld [vmem:[#allocation70_spill] sm:$0xff] }
 0x2b1   : > { %1823 = vmin.xlane.f32.xlu0 %v1822_v8  ;;  %1868 = vmin.xlane.f32.xlu1 %v1867_v53  ;;  %v1927_v53 = vsel %vm1926_vm6, %v1922_v29, inf  ;;  %v1982_v25 = vcvt.s32.f32 %v1980_v9  ;;  %v1965_v51 = vand.u32 65535, %v9018_v60  ;;  %v9024_v60 = vld [vmem:[#allocation15_spill] sm:$0xff] }
 0x2b2   : > { %v7078_v14 = vpop.xlane.xlu0 %1849 }
 0x2b3   : > { %vm1851_vm5 = vcmp.eq.f32.partialorder %v9010_v38, %v7078_v14  ;;  %v9016_v38 = vld [vmem:[#allocation12_spill] sm:$0xff]  ;;  %v1967_v30 = vcvt.s32.f32 %v1965_v51 }
 0x2b4   : > { %v1852_v1 = vsel %vm1851_vm5, %v1847_v59, inf  ;;  %v7096_v59 = vpop.xlane.xlu1 %1984 }
 0x2b5   : > { %1853 = vmin.xlane.f32.xlu0 %v1852_v1  ;;  %1898 = vmin.xlane.f32.xlu1 %v1897_v48  ;;  %v1957_v48 = vsel %vm1956_vm8, %v1952_v5, inf  ;;  %vm1986_vm10 = vcmp.eq.f32.partialorder %v9017_v61, %v7096_v59  ;;  %v9021_v5 = vld [vmem:[#allocation61_spill] sm:$0xff] }
 0x2b6   : > { %v7088_v12 = vpop.xlane.xlu0 %1879 }
 0x2b7   : > { %vm1881_vm7 = vcmp.eq.f32.partialorder %v9013_v10, %v7088_v12  ;;  %v9019_v10 = vld [vmem:[#allocation60_spill] sm:$0xff] }
 0x2b8   : > { %v1882_v8 = vsel %vm1881_vm7, %v1877_v43, inf  ;;  %v7106_v43 = vpop.xlane.xlu1 %2014 }
 0x2b9   : > { %1883 = vmin.xlane.f32.xlu0 %v1882_v8  ;;  %1928 = vmin.xlane.f32.xlu1 %v1927_v53  ;;  %v2010_v8 = vand.u32 65535, %v9019_v10  ;;  %v9020_v53 = vld [vmem:[#allocation13_spill] sm:$0xff]  ;;  %vm2016_vm12 = vcmp.eq.f32.partialorder %v9021_v5, %v7106_v43  ;;  %v9025_v10 = vld [vmem:[#allocation66_spill] sm:$0xff]  ;;  %v9029_v5 = vld [vmem:[#allocation67_spill] sm:$0xff] }
 0x2ba   : > { %v7098_v45 = vpop.xlane.xlu0 %1909 }
 0x2bb   : > { %vm1911_vm9 = vcmp.eq.f32.partialorder %v9016_v38, %v7098_v45  ;;  %v2012_v9 = vcvt.s32.f32 %v2010_v8 }
 0x2bc   : > { %v1912_v1 = vsel %vm1911_vm9, %v1907_v56, inf  ;;  %v1987_v56 = vsel %vm1986_vm10, %v1982_v25, inf  ;;  %v7116_v37 = vpop.xlane.xlu1 %2044 }
 0x2bd   : > { %1913 = vmin.xlane.f32.xlu0 %v1912_v1  ;;  %1958 = vmin.xlane.f32.xlu1 %v1957_v48  ;;  %9022 = vst [vmem:[#allocation24_spill] sm:$0xff] %v7116_v37  ;;  %v1995_v1 = vand.u32 65535, %v6753_v54  ;;  %v9023_v48 = vld [vmem:[#allocation63_spill] sm:$0xff]  ;;  %v2017_v25 = vsel %vm2016_vm12, %v2012_v9, inf  ;;  %vm2046_vm14 = vcmp.eq.f32.partialorder %v9025_v10, %v7116_v37  ;;  %v2055_v10 = vand.u32 65535, %v6780_v3 }
 0x2be   : > { %v7108_v29 = vpop.xlane.xlu0 %1939  ;;  %v2040_v61 = vand.u32 65535, %v9023_v48  ;;  %v2070_v48 = vand.u32 65535, %v9029_v5  ;;  %v9033_v37 = vld [vmem:[#allocation19_spill] sm:$0xff] }
 0x2bf   : > { %vm1941_vm11 = vcmp.eq.f32.partialorder %v9020_v53, %v7108_v29  ;;  %v1997_v51 = vcvt.s32.f32 %v1995_v1 }
 0x2c0   : > { %v1942_v46 = vsel %vm1941_vm11, %v1937_v2, inf  ;;  %v7126_v53 = vpop.xlane.xlu1 %2074  ;;  %v2042_v8 = vcvt.s32.f32 %v2040_v61  ;;  %v2072_v61 = vcvt.s32.f32 %v2070_v48 }
 0x2c1   : > { %1943 = vmin.xlane.f32.xlu0 %v1942_v46  ;;  %1988 = vmin.xlane.f32.xlu1 %v1987_v56  ;;  %9026 = vst [vmem:[#allocation25_spill] sm:$0xff] %v7126_v53  ;;  %v9028_v56 = vld [vmem:[#allocation73_spill] sm:$0xff] }
 0x2c2   : > { %v7118_v38 = vpop.xlane.xlu0 %1969  ;;  %v2025_v54 = vand.u32 65535, %v9028_v56  ;;  %v2047_v9 = vsel %vm2046_vm14, %v2042_v8, inf  ;;  %v9032_v56 = vld [vmem:[#allocation16_spill] sm:$0xff]  ;;  %v9034_v8 = vld [vmem:[#allocation69_spill] sm:$0xff] }
 0x2c3   : > { %vm1971_vm13 = vcmp.eq.f32.partialorder %v9024_v60, %v7118_v38  ;;  %v9030_v60 = vld [vmem:[#allocation68_spill] sm:$0xff]  ;;  %v2100_v5 = vand.u32 65535, %v9032_v56 }
 0x2c4   : > { %v1972_v2 = vsel %vm1971_vm13, %v1967_v30, inf  ;;  %vm2076_vm1 = vcmp.eq.f32.partialorder %v9030_v60, %v7126_v53  ;;  %v2027_v1 = vcvt.s32.f32 %v2025_v54  ;;  %v2057_v54 = vcvt.s32.f32 %v2055_v10  ;;  %v9037_v60 = vld [vmem:[#allocation74_spill] sm:$0xff]  ;;  %v9038_v53 = vld [vmem:[#allocation71_spill] sm:$0xff] }
 0x2c5   : > { %1973 = vmin.xlane.f32.xlu0 %v1972_v2  ;;  %2018 = vmin.xlane.f32.xlu1 %v2017_v25  ;;  %v7136_v2 = vpop.xlane.xlu1 %2104  ;;  %v2102_v48 = vcvt.s32.f32 %v2100_v5  ;;  %v2085_v3 = vand.u32 65535, %v9037_v60  ;;  %v2130_v56 = vand.u32 65535, %v9038_v53  ;;  %v9043_v60 = vld [vmem:[#allocation17_spill] sm:$0xff] }
 0x2c6   : > { %v7128_v46 = vpop.xlane.xlu0 %1999  ;;  %9031 = vst [vmem:[#allocation27_spill] sm:$0xff] %v7136_v2  ;;  %vm2106_vm4 = vcmp.eq.f32.partialorder %v9034_v8, %v7136_v2  ;;  %v2115_v8 = vand.u32 65535, %v6809_v24  ;;  %v2160_v53 = vand.u32 65535, %v9043_v60  ;;  %v9044_v2 = vld [vmem:[#allocation77_spill] sm:$0xff] }
 0x2c7   : > { %9027 = vst [vmem:[#allocation26_spill] sm:$0xff] %v7128_v46  ;;  %vm2001_vm15 = vcmp.eq.f32.partialorder %v6776_v42, %v7128_v46  ;;  %v9039_v46 = vld [vmem:[#allocation75_spill] sm:$0xff]  ;;  %v2087_v10 = vcvt.s32.f32 %v2085_v3  ;;  %v2132_v5 = vcvt.s32.f32 %v2130_v56 }
 0x2c8   : > { %v2002_v30 = vsel %vm2001_vm15, %v1997_v51, inf  ;;  %v2077_v51 = vsel %vm2076_vm1, %v2072_v61, inf  ;;  %v9040_v61 = vld [vmem:[#allocation72_spill] sm:$0xff]  ;;  %v2117_v3 = vcvt.s32.f32 %v2115_v8  ;;  %v2162_v56 = vcvt.s32.f32 %v2160_v53 }
 0x2c9   : > { %2003 = vmin.xlane.f32.xlu0 %v2002_v30  ;;  %2048 = vmin.xlane.f32.xlu1 %v2047_v9  ;;  %v7146_v30 = vpop.xlane.xlu1 %2134 }
 0x2ca   : > { %v7138_v25 = vpop.xlane.xlu0 %2029  ;;  %9035 = vst [vmem:[#allocation28_spill] sm:$0xff] %v7146_v30  ;;  %vm2136_vm6 = vcmp.eq.f32.partialorder %v9040_v61, %v7146_v30  ;;  %v9048_v61 = vld [vmem:[#allocation79_spill] sm:$0xff]  ;;  %v9049_v30 = vld [vmem:[#allocation76_spill] sm:$0xff] }
 0x2cb   : > { %vm2031_vm3 = vcmp.eq.f32.partialorder %v9033_v37, %v7138_v25  ;;  %v2145_v24 = vand.u32 65535, %v9048_v61  ;;  %v2190_v60 = vand.u32 65535, %v9049_v30  ;;  %v9054_v61 = vld [vmem:[#allocation82_spill] sm:$0xff] }
 0x2cc   : > { %v2032_v42 = vsel %vm2031_vm3, %v2027_v1, inf  ;;  %v2107_v1 = vsel %vm2106_vm4, %v2102_v48, inf  ;;  %v9045_v48 = vld [vmem:[#allocation18_spill] sm:$0xff]  ;;  %v2220_v30 = vand.u32 65535, %v9054_v61 }
 0x2cd   : > { %2033 = vmin.xlane.f32.xlu0 %v2032_v42  ;;  %2078 = vmin.xlane.f32.xlu1 %v2077_v51  ;;  %v7156_v42 = vpop.xlane.xlu1 %2164  ;;  %v2147_v8 = vcvt.s32.f32 %v2145_v24  ;;  %v2192_v53 = vcvt.s32.f32 %v2190_v60  ;;  %v9058_v24 = vld [vmem:[#allocation85_spill] sm:$0xff]  ;;  %v9060_v61 = vld [vmem:[#allocation86_spill] sm:$0xff] }
 0x2ce   : > { %v7148_v9 = vpop.xlane.xlu0 %2059  ;;  %9041 = vst [vmem:[#allocation30_spill] sm:$0xff] %v7156_v42  ;;  %vm2166_vm8 = vcmp.eq.f32.partialorder %v9045_v48, %v7156_v42  ;;  %v2175_v48 = vand.u32 65535, %v6839_v27  ;;  %v9055_v42 = vld [vmem:[#allocation83_spill] sm:$0xff]  ;;  %v2205_v60 = vand.u32 65535, %v9058_v24 }
 0x2cf   : > { %9036 = vst [vmem:[#allocation29_spill] sm:$0xff] %v7148_v9  ;;  %vm2061_vm5 = vcmp.eq.f32.partialorder %v9039_v46, %v7148_v9  ;;  %v9050_v9 = vld [vmem:[#allocation81_spill] sm:$0xff] }
 0x2d0   : > { %v2062_v37 = vsel %vm2061_vm5, %v2057_v54, inf  ;;  %v2137_v54 = vsel %vm2136_vm6, %v2132_v5, inf  ;;  %v9051_v5 = vld [vmem:[#allocation78_spill] sm:$0xff] }
 0x2d1   : > { %2063 = vmin.xlane.f32.xlu0 %v2062_v37  ;;  %2108 = vmin.xlane.f32.xlu1 %v2107_v1 }
 0x2d2   : > { %v7158_v51 = vpop.xlane.xlu0 %2089  ;;  %v7166_v37 = vpop.xlane.xlu1 %2194 }
 0x2d3   : > { %9042 = vst [vmem:[#allocation31_spill] sm:$0xff] %v7158_v51  ;;  %vm2091_vm7 = vcmp.eq.f32.partialorder %v9044_v2, %v7158_v51  ;;  %9046 = vst [vmem:[#allocation32_spill] sm:$0xff] %v7166_v37  ;;  %vm2196_vm10 = vcmp.eq.f32.partialorder %v9051_v5, %v7166_v37  ;;  %v2222_v5 = vcvt.s32.f32 %v2220_v30  ;;  %v9059_v37 = vld [vmem:[#allocation87_spill] sm:$0xff]  ;;  %v9064_v30 = vld [vmem:[#allocation88_spill] sm:$0xff] }
 0x2d4   : > { %v2092_v46 = vsel %vm2091_vm7, %v2087_v10, inf  ;;  %v2167_v10 = vsel %vm2166_vm8, %v2162_v56, inf  ;;  %v9056_v56 = vld [vmem:[#allocation84_spill] sm:$0xff]  ;;  %v2250_v27 = vand.u32 65535, %v9059_v37  ;;  %v9065_v37 = vld [vmem:[#allocation89_spill] sm:$0xff] }
 0x2d5   : > { %2093 = vmin.xlane.f32.xlu0 %v2092_v46  ;;  %2138 = vmin.xlane.f32.xlu1 %v2137_v54 }
 0x2d6   : > { %v7168_v1 = vpop.xlane.xlu0 %2119 }
 0x2d7   : > { %9047 = vst [vmem:[#allocation33_spill] sm:$0xff] %v7168_v1  ;;  %vm2121_vm9 = vcmp.eq.f32.partialorder %v9050_v9, %v7168_v1 }
 0x2d8   : > { %v2122_v2 = vsel %vm2121_vm9, %v2117_v3, inf  ;;  %v2197_v3 = vsel %vm2196_vm10, %v2192_v53, inf }
 0x2d9   : > { %2123 = vmin.xlane.f32.xlu0 %v2122_v2  ;;  %2168 = vmin.xlane.f32.xlu1 %v2167_v10  ;;  %v2177_v10 = vcvt.s32.f32 %v2175_v48 }
 0x2da   : > { %v7176_v46 = vpop.xlane.xlu0 %2149  ;;  %v7178_v54 = vpop.xlane.xlu1 %2224 }
 0x2db   : > { %9052 = vst [vmem:[#allocation34_spill] sm:$0xff] %v7176_v46  ;;  %9053 = vst [vmem:[#allocation35_spill] sm:$0xff] %v7178_v54  ;;  %vm2151_vm11 = vcmp.eq.f32.partialorder %v9055_v42, %v7176_v46  ;;  %vm2226_vm12 = vcmp.eq.f32.partialorder %v9056_v56, %v7178_v54  ;;  %v9063_v56 = vld [vmem:[#allocation90_spill] sm:$0xff] }
 0x2dc   : > { %v2152_v9 = vsel %vm2151_vm11, %v2147_v8, inf  ;;  %v2227_v42 = vsel %vm2226_vm12, %v2222_v5, inf  ;;  %v2235_v48 = vand.u32 65535, %v9063_v56  ;;  %v9067_v5 = vld [vmem:[#allocation92_spill] sm:$0xff] }
 0x2dd   : > { %2153 = vmin.xlane.f32.xlu0 %v2152_v9  ;;  %2198 = vmin.xlane.f32.xlu1 %v2197_v3  ;;  %v2207_v9 = vcvt.s32.f32 %v2205_v60  ;;  %v2252_v3 = vcvt.s32.f32 %v2250_v27  ;;  %v9068_v60 = vld [vmem:[#allocation91_spill] sm:$0xff] }
 0x2de   : > { %v7186_v2 = vpop.xlane.xlu0 %2179 }
 0x2df   : > { %9057 = vst [vmem:[#allocation36_spill] sm:$0xff] %v7186_v2  ;;  %vm2181_vm13 = vcmp.eq.f32.partialorder %v9060_v61, %v7186_v2 }
 0x2e0   : > { %v2182_v1 = vsel %vm2181_vm13, %v2177_v10, inf  ;;  %v2237_v10 = vcvt.s32.f32 %v2235_v48 }
 0x2e1   : > { %2183 = vmin.xlane.f32.xlu0 %v2182_v1  ;;  %2228 = vmin.xlane.f32.xlu1 %v2227_v42  ;;  %v2280_v42 = vand.u32 65535, %v9067_v5 }
 0x2e2   : > { %v7192_v8 = vpop.xlane.xlu0 %2209  ;;  %v7194_v53 = vpop.xlane.xlu1 %2254 }
 0x2e3   : > { %9061 = vst [vmem:[#allocation37_spill] sm:$0xff] %v7192_v8  ;;  %9062 = vst [vmem:[#allocation38_spill] sm:$0xff] %v7194_v53  ;;  %vm2211_vm14 = vcmp.eq.f32.partialorder %v9064_v30, %v7192_v8  ;;  %vm2256_vm15 = vcmp.eq.f32.partialorder %v9065_v37, %v7194_v53  ;;  %v2282_v30 = vcvt.s32.f32 %v2280_v42  ;;  %v9070_v8 = vld [vmem:[#allocation93_spill] sm:$0xff] }
 0x2e4   : > { %v2212_v24 = vsel %vm2211_vm14, %v2207_v9, inf  ;;  %v2257_v61 = vsel %vm2256_vm15, %v2252_v3, inf  ;;  %v2265_v54 = vand.u32 65535, %v9070_v8  ;;  %v9071_v9 = vld [vmem:[#allocation22_spill] sm:$0xff]  ;;  %v9072_v3 = vld [vmem:[#allocation21_spill] sm:$0xff] }
 0x2e5   : > { %2213 = vmin.xlane.f32.xlu0 %v2212_v24  ;;  %2258 = vmin.xlane.f32.xlu1 %v2257_v61  ;;  %v1361_v37 = vcvt.f32.s32 %v9072_v3 }
 0x2e6   : > { %v7201_v1 = vpop.xlane.xlu0 %2239  ;;  %v2267_v5 = vcvt.s32.f32 %v2265_v54 }
 0x2e7   : > { %9066 = vst [vmem:[#allocation39_spill] sm:$0xff] %v7201_v1  ;;  %vm2241_vm1 = vcmp.eq.f32.partialorder %v9068_v60, %v7201_v1  ;;  %v1346_v60 = vcvt.f32.s32 %v6818_v16  ;;  %v1362_v42 = vshll.u32 %v1361_v37, 16  ;;  %v9074_v1 = vld [vmem:[#allocation80_spill] sm:$0xff]  ;;  %v1421_v16 = vcvt.f32.s32 %v6861_v63 }
 0x2e8   : > { %v2242_v27 = vsel %vm2241_vm1, %v2237_v10, inf  ;;  %v9073_v10 = vld [vmem:[#allocation23_spill] sm:$0xff]  ;;  %v1391_v8 = vcvt.f32.s32 %v9074_v1  ;;  %v1451_v63 = vcvt.f32.s32 %v6887_v18 }
 0x2e9   : > { %2243 = vmin.xlane.f32.xlu0 %v2242_v27 }
 0x2ea   : > { %v7206_v56 = vpop.xlane.xlu1 %2284  ;;  %v1392_v46 = vshll.u32 %v1391_v8, 16  ;;  %v1436_v8 = vcvt.f32.s32 %v6899_v23 }
 0x2eb   : > { %9069 = vst [vmem:[#allocation40_spill] sm:$0xff] %v7206_v56  ;;  %vm2286_vm3 = vcmp.eq.f32.partialorder %v9071_v9, %v7206_v56  ;;  %v1376_v9 = vcvt.f32.s32 %v6847_v17  ;;  %v1347_v56 = vshll.u32 %v1346_v60, 16  ;;  %v1406_v17 = vcvt.f32.s32 %v6873_v19 }
 0x2ec   : > { %v2287_v24 = vsel %vm2286_vm3, %v2282_v30, inf  ;;  %v1422_v60 = vshll.u32 %v1421_v16, 16  ;;  %v1452_v16 = vshll.u32 %v1451_v63, 16 }
 0x2ed   : > { %2288 = vmin.xlane.f32.xlu1 %v2287_v24  ;;  %v1407_v18 = vshll.u32 %v1406_v17, 16 }
 0x2ee   : > { %v7212_v48 = vpop.xlane.xlu0 %2269  ;;  %v1359_v61 = vpop.xlane.xlu1 %1358 }
 0x2ef   : > { %vm2271_vm4 = vcmp.eq.f32.partialorder %v9073_v10, %v7212_v48  ;;  %v1360_v27 = vcvt.f32.s32 %v1359_v61  ;;  %v1377_v61 = vshll.u32 %v1376_v9, 16 }
 0x2f0   : > { %v2272_v53 = vsel %vm2271_vm4, %v2267_v5, inf }
 0x2f1   : > { %2273 = vmin.xlane.f32.xlu0 %v2272_v53  ;;  %v7219_v3 = vadd.s32 %v1362_v42, %v1360_v27  ;;  %v9075_v53 = vld [vmem:[#allocation20_spill] sm:$0xff] }
 0x2f2   : > { %v1344_v30 = vpop.xlane.xlu0 %1343  ;;  %v1389_v24 = vpop.xlane.xlu1 %1388 }
 0x2f3   : > { %v1345_v2 = vcvt.f32.s32 %v1344_v30  ;;  %v1390_v54 = vcvt.f32.s32 %v1389_v24  ;;  %vm2452_vm5 = vcmp.eq.s32.totalorder %v9075_v53, %v7219_v3 }
 0x2f5   : > { %v7222_v51 = vadd.s32 %v1347_v56, %v1345_v2  ;;  %v7224_v37 = vadd.s32 %v1392_v46, %v1390_v54  ;;  %v5683_v2 = vmov 0.0  }
 0x2f6   : > { %v1374_v1 = vpop.xlane.xlu0 %1373  ;;  %v1419_v5 = vpop.xlane.xlu1 %1418  ;;  %v4786_v42 = vsel %vm2452_vm5, 1.0, %v5683_v2 }
 0x2f7   : > { %v1375_v10 = vcvt.f32.s32 %v1374_v1  ;;  %v1420_v27 = vcvt.f32.s32 %v1419_v5  ;;  %vm2451_vm6 = vcmp.eq.s32.totalorder %v9075_v53, %v7222_v51  ;;  %vm2454_vm7 = vcmp.eq.s32.totalorder %v9075_v53, %v7224_v37 }
 0x2f8   : > { %v4785_v56 = vsel %vm2451_vm6, 1.0, %v5683_v2  ;;  %v4788_v5 = vsel %vm2454_vm7, 1.0, %v5683_v2 }
 0x2f9   : > { %v7233_v46 = vadd.s32 %v1377_v61, %v1375_v10  ;;  %5213 = vmatprep.mubr.msk.f32.mxu1 %vm1013_vm2, %v4785_v56  ;;  %v7238_v19 = vadd.s32 %v1422_v60, %v1420_v27  ;;  %v1481_v61 = vcvt.f32.s32 %v6913_v26  ;;  %v1437_v10 = vshll.u32 %v1436_v8, 16 }
 0x2fa   : > { %v1404_v9 = vpop.xlane.xlu0 %1403  ;;  %5214 = vmatmul.mubr.msk.f32.vlgmr.msra.gmra.mrb[0].mxu1 %vm1013_vm2, %v4786_v42  ;;  %v1449_v30 = vpop.xlane.xlu1 %1448  ;;  %v1466_v26 = vcvt.f32.s32 %v6924_v55 }
 0x2fb   : > { %v1405_v24 = vcvt.f32.s32 %v1404_v9  ;;  %v1450_v54 = vcvt.f32.s32 %v1449_v30  ;;  %vm2453_vm8 = vcmp.eq.s32.totalorder %v9075_v53, %v7233_v46  ;;  %vm2456_vm9 = vcmp.eq.s32.totalorder %v9075_v53, %v7238_v19 }
 0x2fc   : > { %v4787_v23 = vsel %vm2453_vm8, 1.0, %v5683_v2  ;;  %v1482_v42 = vshll.u32 %v1481_v61, 16  ;;  %v1511_v9 = vcvt.f32.s32 %v6932_v15  ;;  %v1467_v15 = vshll.u32 %v1466_v26, 16 }
 0x2fd   : > { %v7247_v1 = vadd.s32 %v1407_v18, %v1405_v24  ;;  %5216 = vmatprep.mubr.msk.f32.mxu1 %vm1013_vm2, %v4787_v23  ;;  %v7251_v27 = vadd.s32 %v1452_v16, %v1450_v54  ;;  %v4790_v18 = vsel %vm2456_vm9, 1.0, %v5683_v2  ;;  %v1496_v24 = vcvt.f32.s32 %v6940_v20 }
 0x2fe   : > { %v1434_v17 = vpop.xlane.xlu0 %1433  ;;  %5217 = vmatmul.mubr.msk.f32.gmra.mrb[2].mxu1 %vm1013_vm2, %v4788_v5  ;;  %v1479_v60 = vpop.xlane.xlu1 %1478  ;;  %v1512_v5 = vshll.u32 %v1511_v9, 16 }
 0x2ff   : > { %v1435_v63 = vcvt.f32.s32 %v1434_v17  ;;  %v1480_v56 = vcvt.f32.s32 %v1479_v60  ;;  %vm2455_vm10 = vcmp.eq.s32.totalorder %v9075_v53, %v7247_v1  ;;  %vm2458_vm11 = vcmp.eq.s32.totalorder %v9075_v53, %v7251_v27 }
 0x300   : > { %v4789_v8 = vsel %vm2455_vm10, 1.0, %v5683_v2  ;;  %v4792_v60 = vsel %vm2458_vm11, 1.0, %v5683_v2 }
 0x301   : > { %v7261_v30 = vadd.s32 %v1437_v10, %v1435_v63  ;;  %5219 = vmatprep.mubr.msk.f32.mxu1 %vm1013_vm2, %v4789_v8  ;;  %v7266_v54 = vadd.s32 %v1482_v42, %v1480_v56  ;;  %v1541_v10 = vcvt.f32.s32 %v6948_v40  ;;  %v1497_v63 = vshll.u32 %v1496_v24, 16 }
 0x302   : > { %v1464_v55 = vpop.xlane.xlu0 %1463  ;;  %5220 = vmatmul.mubr.msk.f32.gmra.mrb[4].mxu1 %vm1013_vm2, %v4790_v18  ;;  %v1509_v16 = vpop.xlane.xlu1 %1508  ;;  %v1526_v40 = vcvt.f32.s32 %v6956_v31 }
 0x303   : > { %v1465_v61 = vcvt.f32.s32 %v1464_v55  ;;  %v1510_v23 = vcvt.f32.s32 %v1509_v16  ;;  %vm2457_vm12 = vcmp.eq.s32.totalorder %v9075_v53, %v7261_v30  ;;  %vm2460_vm13 = vcmp.eq.s32.totalorder %v9075_v53, %v7266_v54 }
 0x304   : > { %v4791_v20 = vsel %vm2457_vm12, 1.0, %v5683_v2  ;;  %v1542_v18 = vshll.u32 %v1541_v10, 16  ;;  %v1571_v55 = vcvt.f32.s32 %v6964_v58  ;;  %v1527_v58 = vshll.u32 %v1526_v40, 16 }
 0x305   : > { %v7275_v17 = vadd.s32 %v1467_v15, %v1465_v61  ;;  %5222 = vmatprep.mubr.msk.f32.mxu1 %vm1013_vm2, %v4791_v20  ;;  %v7279_v56 = vadd.s32 %v1512_v5, %v1510_v23  ;;  %v4794_v15 = vsel %vm2460_vm13, 1.0, %v5683_v2  ;;  %v1556_v61 = vcvt.f32.s32 %v6972_v11 }
 0x306   : > { %v1494_v26 = vpop.xlane.xlu0 %1493  ;;  %5223 = vmatmul.mubr.msk.f32.gmra.mrb[6].mxu1 %vm1013_vm2, %v4792_v60  ;;  %v1539_v42 = vpop.xlane.xlu1 %1538  ;;  %v1572_v60 = vshll.u32 %v1571_v55, 16 }
 0x307   : > { %v1495_v9 = vcvt.f32.s32 %v1494_v26  ;;  %v1540_v8 = vcvt.f32.s32 %v1539_v42  ;;  %vm2459_vm14 = vcmp.eq.s32.totalorder %v9075_v53, %v7275_v17  ;;  %vm2462_vm15 = vcmp.eq.s32.totalorder %v9075_v53, %v7279_v56 }
 0x308   : > { %v4793_v24 = vsel %vm2459_vm14, 1.0, %v5683_v2  ;;  %v4796_v42 = vsel %vm2462_vm15, 1.0, %v5683_v2 }
 0x309   : > { %v7289_v16 = vadd.s32 %v1497_v63, %v1495_v9  ;;  %5225 = vmatprep.mubr.msk.f32.mxu1 %vm1013_vm2, %v4793_v24  ;;  %v7294_v23 = vadd.s32 %v1542_v18, %v1540_v8  ;;  %v1601_v63 = vcvt.f32.s32 %v6977_v0  ;;  %v1557_v9 = vshll.u32 %v1556_v61, 16 }
 0x30a   : > { %v1524_v31 = vpop.xlane.xlu0 %1523  ;;  %5226 = vmatmul.mubr.msk.f32.gmra.mrb[8].mxu1 %vm1013_vm2, %v4794_v15  ;;  %v1569_v5 = vpop.xlane.xlu1 %1568  ;;  %v1586_v0 = vcvt.f32.s32 %v6982_v39 }
 0x30b   : > { %v1525_v10 = vcvt.f32.s32 %v1524_v31  ;;  %v1570_v20 = vcvt.f32.s32 %v1569_v5  ;;  %vm2461_vm1 = vcmp.eq.s32.totalorder %v9075_v53, %v7289_v16  ;;  %vm2464_vm3 = vcmp.eq.s32.totalorder %v9075_v53, %v7294_v23 }
 0x30c   : > { %v4795_v11 = vsel %vm2461_vm1, 1.0, %v5683_v2  ;;  %v1602_v15 = vshll.u32 %v1601_v63, 16  ;;  %v4798_v5 = vsel %vm2464_vm3, 1.0, %v5683_v2  ;;  %v1587_v39 = vshll.u32 %v1586_v0, 16 }
 0x30d   : > { %v7303_v26 = vadd.s32 %v1527_v58, %v1525_v10  ;;  %5228 = vmatprep.mubr.msk.f32.mxu1 %vm1013_vm2, %v4795_v11  ;;  %v7307_v8 = vadd.s32 %v1572_v60, %v1570_v20  ;;  %v1631_v60 = vcvt.f32.s32 %v6989_v44 }
 0x30e   : > { %v1554_v40 = vpop.xlane.xlu0 %1553  ;;  %5229 = vmatmul.mubr.msk.f32.gmra.mrb[10].mxu1 %vm1013_vm2, %v4796_v42  ;;  %v1599_v18 = vpop.xlane.xlu1 %1598 }
 0x30f   : > { %v1555_v55 = vcvt.f32.s32 %v1554_v40  ;;  %v1600_v24 = vcvt.f32.s32 %v1599_v18  ;;  %vm2463_vm4 = vcmp.eq.s32.totalorder %v9075_v53, %v7303_v26  ;;  %vm2466_vm5 = vcmp.eq.s32.totalorder %v9075_v53, %v7307_v8 }
 0x310   : > { %v4797_v31 = vsel %vm2463_vm4, 1.0, %v5683_v2  ;;  %v4800_v42 = vsel %vm2466_vm5, 1.0, %v5683_v2  ;;  %v1616_v40 = vcvt.f32.s32 %v6994_v21  ;;  %v1632_v0 = vshll.u32 %v1631_v60, 16 }
 0x311   : > { %v7316_v61 = vadd.s32 %v1557_v9, %v1555_v55  ;;  %5231 = vmatprep.mubr.msk.f32.mxu1 %vm1013_vm2, %v4797_v31  ;;  %v1603_v58 = vadd.s32 %v1602_v15, %v1600_v24 }
 0x312   : > { %v1584_v10 = vpop.xlane.xlu0 %1583  ;;  %5232 = vmatmul.mubr.msk.f32.gmra.mrb[12].mxu1 %vm1013_vm2, %v4798_v5  ;;  %v1617_v31 = vshll.u32 %v1616_v40, 16 }
 0x313   : > { %v1585_v20 = vcvt.f32.s32 %v1584_v10  ;;  %vm2465_vm6 = vcmp.eq.s32.totalorder %v9075_v53, %v7316_v61  ;;  %vm2468_vm7 = vcmp.eq.s32.totalorder %v9075_v53, %v1603_v58  ;;  %v1661_v10 = vcvt.f32.s32 %v7001_v33 }
 0x314   : > { %v4799_v63 = vsel %vm2465_vm6, 1.0, %v5683_v2  ;;  %v4802_v55 = vsel %vm2468_vm7, 1.0, %v5683_v2 }
 0x315   : > { %v1588_v11 = vadd.s32 %v1587_v39, %v1585_v20  ;;  %5234 = vmatprep.mubr.msk.f32.mxu1 %vm1013_vm2, %v4799_v63  ;;  %v1646_v20 = vcvt.f32.s32 %v7008_v35  ;;  %v1662_v63 = vshll.u32 %v1661_v10, 16  ;;  %v1706_v10 = vcvt.f32.s32 %v7034_v49 }
 0x316   : > { %5235 = vmatmul.mubr.msk.f32.gmra.mrb[14].mxu1 %vm1013_vm2, %v4800_v42  ;;  %v1629_v9 = vpop.xlane.xlu1 %1628 }
 0x317   : > { %v1630_v18 = vcvt.f32.s32 %v1629_v9  ;;  %vm2467_vm8 = vcmp.eq.s32.totalorder %v9075_v53, %v1588_v11 }
 0x318   : > { %v4801_v44 = vsel %vm2467_vm8, 1.0, %v5683_v2 }
 0x319   : > { %5237 = vmatprep.mubr.msk.f32.mxu1 %vm1013_vm2, %v4801_v44  ;;  %v1633_v24 = vadd.s32 %v1632_v0, %v1630_v18  ;;  %v1691_v18 = vcvt.f32.s32 %v7014_v4  ;;  %v1676_v44 = vcvt.f32.s32 %v7024_v50 }
 0x31a   : > { %v1614_v15 = vpop.xlane.xlu0 %1613  ;;  %5238 = vmatmul.mubr.msk.f32.gmra.mrb[16].mxu1 %vm1013_vm2, %v4802_v55 }
 0x31b   : > { %v1615_v5 = vcvt.f32.s32 %v1614_v15  ;;  %vm2470_vm9 = vcmp.eq.s32.totalorder %v9075_v53, %v1633_v24  ;;  %v1692_v15 = vshll.u32 %v1691_v18, 16 }
 0x31c   : > { %v4804_v9 = vsel %vm2470_vm9, 1.0, %v5683_v2 }
 0x31d   : > { %v1618_v39 = vadd.s32 %v1617_v31, %v1615_v5  ;;  %v1677_v5 = vshll.u32 %v1676_v44, 16 }
 0x31e   : > { %2294 = vxpose.xlu0.b32.start [1/16] (narrow) %v7222_v51, 8  ;;  %v1659_v21 = vpop.xlane.xlu1 %1658  ;;  %v1647_v51 = vshll.u32 %v1646_v20, 16  ;;  %v1751_v20 = vcvt.f32.s32 %v6998_v62  ;;  %v1781_v62 = vcvt.f32.s32 %v7006_v57  ;;  %v1766_v57 = vcvt.f32.s32 %v7052_v36 }
 0x31f   : > { %v1660_v60 = vcvt.f32.s32 %v1659_v21  ;;  %vm2469_vm10 = vcmp.eq.s32.totalorder %v9075_v53, %v1618_v39  ;;  %v1796_v36 = vcvt.f32.s32 %v7061_v47  ;;  %v1841_v47 = vcvt.f32.s32 %v7032_v22 }
 0x320   : > { %2326 = vxpose.xlu1.b32.start [1/16] (narrow) %v1588_v11, 8  ;;  %v4803_v42 = vsel %vm2469_vm10, 1.0, %v5683_v2  ;;  %v1826_v22 = vcvt.f32.s32 %v7068_v28  ;;  %v1856_v28 = vcvt.f32.s32 %v7078_v14  ;;  %v1901_v14 = vcvt.f32.s32 %v7059_v34 }
 0x321   : > { %5240 = vmatprep.mubr.msk.f32.mxu1 %vm1013_vm2, %v4803_v42  ;;  %v7345_v33 = vadd.s32 %v1662_v63, %v1660_v60  ;;  %v1736_v63 = vcvt.f32.s32 %v7042_v52  ;;  %v1886_v34 = vcvt.f32.s32 %v7088_v12  ;;  %v1916_v12 = vcvt.f32.s32 %v7098_v45 }
 0x322   : > { %v1644_v40 = vpop.xlane.xlu0 %1643  ;;  %2295 = vxpose.xlu0.b32.cont [2/16] (narrow) %v7219_v3, 8  ;;  %5241 = vmatmul.mubr.msk.f32.gmra.mrb[18].mxu1 %vm1013_vm2, %v4804_v9  ;;  %v1721_v3 = vcvt.f32.s32 %v6987_v6  ;;  %v1961_v45 = vcvt.f32.s32 %v7086_v41  ;;  %v1946_v41 = vcvt.f32.s32 %v7108_v29  ;;  %v1976_v29 = vcvt.f32.s32 %v7118_v38 }
 0x323   : > { %v1645_v35 = vcvt.f32.s32 %v1644_v40  ;;  %vm2472_vm11 = vcmp.eq.s32.totalorder %v9075_v53, %v7345_v33  ;;  %v1707_v40 = vshll.u32 %v1706_v10, 16  ;;  %v1737_v18 = vshll.u32 %v1736_v63, 16 }
 0x324   : > { %2327 = vxpose.xlu1.b32.cont [2/16] (narrow) %v1603_v58, 8  ;;  %v4806_v4 = vsel %vm2472_vm11, 1.0, %v5683_v2  ;;  %v1797_v63 = vshll.u32 %v1796_v36, 16  ;;  %v2021_v38 = vcvt.f32.s32 %v7106_v43  ;;  %v9076_v43 = vld [vmem:[#allocation26_spill] sm:$0xff] }
 0x325   : > { %v1648_v0 = vadd.s32 %v1647_v51, %v1645_v35  ;;  %v1752_v35 = vshll.u32 %v1751_v20, 16 }
 0x326   : > { %2296 = vxpose.xlu0.b32.cont [3/16] (narrow) %v7233_v46, 8  ;;  %v1689_v11 = vpop.xlane.xlu1 %1688 }
 0x327   : > { %v1690_v55 = vcvt.f32.s32 %v1689_v11  ;;  %vm2471_vm12 = vcmp.eq.s32.totalorder %v9075_v53, %v1648_v0 }
 0x328   : > { %2328 = vxpose.xlu1.b32.cont [3/16] (narrow) %v1618_v39, 8  ;;  %v4805_v31 = vsel %vm2471_vm12, 1.0, %v5683_v2  ;;  %v1722_v39 = vshll.u32 %v1721_v3, 16 }
 0x329   : > { %5243 = vmatprep.mubr.msk.f32.mxu1 %vm1013_vm2, %v4805_v31  ;;  %v7359_v46 = vadd.s32 %v1692_v15, %v1690_v55  ;;  %v1782_v15 = vshll.u32 %v1781_v62, 16  ;;  %v1811_v31 = vcvt.f32.s32 %v7018_v32 }
 0x32a   : > { %v1674_v58 = vpop.xlane.xlu0 %1673  ;;  %2297 = vxpose.xlu0.b32.cont [4/16] (narrow) %v7224_v37, 8  ;;  %5244 = vmatmul.mubr.msk.f32.gmra.mrb[20].mxu1 %vm1013_vm2, %v4806_v4  ;;  %v1719_v50 = vpop.xlane.xlu1 %1718 }
 0x32b   : > { %v1675_v6 = vcvt.f32.s32 %v1674_v58  ;;  %v1720_v21 = vcvt.f32.s32 %v1719_v50  ;;  %vm2474_vm13 = vcmp.eq.s32.totalorder %v9075_v53, %v7359_v46 }
 0x32c   : > { %2329 = vxpose.xlu1.b32.cont [4/16] (narrow) %v1633_v24, 8 }
 0x32d   : > { %v1678_v60 = vadd.s32 %v1677_v5, %v1675_v6  ;;  %v7366_v42 = vadd.s32 %v1722_v39, %v1720_v21  ;;  %v1812_v21 = vshll.u32 %v1811_v31, 16 }
 0x32e   : > { %v1704_v9 = vpop.xlane.xlu0 %1703  ;;  %2298 = vxpose.xlu0.b32.cont [5/16] (narrow) %v7247_v1, 8  ;;  %v1749_v37 = vpop.xlane.xlu1 %1748  ;;  %v4808_v1 = vsel %vm2474_vm13, 1.0, %v5683_v2 }
 0x32f   : > { %v1705_v49 = vcvt.f32.s32 %v1704_v9  ;;  %v1750_v51 = vcvt.f32.s32 %v1749_v37  ;;  %vm2473_vm14 = vcmp.eq.s32.totalorder %v9075_v53, %v1678_v60  ;;  %vm2476_vm15 = vcmp.eq.s32.totalorder %v9075_v53, %v7366_v42 }
 0x330   : > { %2330 = vxpose.xlu1.b32.cont [5/16] (narrow) %v1648_v0, 8  ;;  %v4807_v52 = vsel %vm2473_vm14, 1.0, %v5683_v2  ;;  %v4810_v58 = vsel %vm2476_vm15, 1.0, %v5683_v2 }
 0x331   : > { %v7374_v24 = vadd.s32 %v1707_v40, %v1705_v49  ;;  %5246 = vmatprep.mubr.msk.f32.mxu1 %vm1013_vm2, %v4807_v52  ;;  %v7378_v11 = vadd.s32 %v1752_v35, %v1750_v51  ;;  %v1842_v51 = vshll.u32 %v1841_v47, 16  ;;  %v1871_v35 = vcvt.f32.s32 %v7046_v7 }
 0x332   : > { %v1734_v44 = vpop.xlane.xlu0 %1733  ;;  %2299 = vxpose.xlu0.b32.cont [6/16] (narrow) %v7238_v19, 8  ;;  %5247 = vmatmul.mubr.msk.f32.gmra.mrb[22].mxu1 %vm1013_vm2, %v4808_v1  ;;  %v1779_v55 = vpop.xlane.xlu1 %1778 }
 0x333   : > { %v1735_v0 = vcvt.f32.s32 %v1734_v44  ;;  %v1780_v3 = vcvt.f32.s32 %v1779_v55  ;;  %vm2475_vm1 = vcmp.eq.s32.totalorder %v9075_v53, %v7374_v24  ;;  %vm2478_vm3 = vcmp.eq.s32.totalorder %v9075_v53, %v7378_v11 }
 0x334   : > { %2331 = vxpose.xlu1.b32.cont [6/16] (narrow) %v7345_v33, 8  ;;  %v4809_v19 = vsel %vm2475_vm1, 1.0, %v5683_v2  ;;  %v1767_v33 = vshll.u32 %v1766_v57, 16  ;;  %v1872_v57 = vshll.u32 %v1871_v35, 16  ;;  %v1962_v35 = vshll.u32 %v1961_v45, 16 }
 0x335   : > { %v7390_v4 = vadd.s32 %v1737_v18, %v1735_v0  ;;  %5249 = vmatprep.mubr.msk.f32.mxu1 %vm1013_vm2, %v4809_v19  ;;  %v7395_v50 = vadd.s32 %v1782_v15, %v1780_v3  ;;  %v1857_v15 = vshll.u32 %v1856_v28, 16 }
 0x336   : > { %v1764_v5 = vpop.xlane.xlu0 %1763  ;;  %2300 = vxpose.xlu0.b32.cont [7/16] (narrow) %v7261_v30, 8  ;;  %5250 = vmatmul.mubr.msk.f32.gmra.mrb[24].mxu1 %vm1013_vm2, %v4810_v58  ;;  %v1809_v32 = vpop.xlane.xlu1 %1808  ;;  %v4812_v30 = vsel %vm2478_vm3, 1.0, %v5683_v2 }
 0x337   : > { %v1765_v10 = vcvt.f32.s32 %v1764_v5  ;;  %v1810_v6 = vcvt.f32.s32 %v1809_v32  ;;  %vm2477_vm4 = vcmp.eq.s32.totalorder %v9075_v53, %v7390_v4  ;;  %vm2480_vm5 = vcmp.eq.s32.totalorder %v9075_v53, %v7395_v50 }
 0x338   : > { %2332 = vxpose.xlu1.b32.cont [7/16] (narrow) %v1678_v60, 8  ;;  %v4811_v39 = vsel %vm2477_vm4, 1.0, %v5683_v2  ;;  %v4814_v52 = vsel %vm2480_vm5, 1.0, %v5683_v2  ;;  %v1902_v5 = vshll.u32 %v1901_v14, 16  ;;  %v1931_v32 = vcvt.f32.s32 %v7074_v13 }
 0x339   : > { %v7405_v20 = vadd.s32 %v1767_v33, %v1765_v10  ;;  %5252 = vmatprep.mubr.msk.f32.mxu1 %vm1013_vm2, %v4811_v39  ;;  %v7409_v9 = vadd.s32 %v1812_v21, %v1810_v6 }
 0x33a   : > { %v1794_v37 = vpop.xlane.xlu0 %1793  ;;  %2301 = vxpose.xlu0.b32.cont [8/16] (narrow) %v7251_v27, 8  ;;  %5253 = vmatmul.mubr.msk.f32.gmra.mrb[26].mxu1 %vm1013_vm2, %v4812_v30  ;;  %v1839_v40 = vpop.xlane.xlu1 %1838  ;;  %v1932_v30 = vshll.u32 %v1931_v32, 16 }
 0x33b   : > { %v1795_v60 = vcvt.f32.s32 %v1794_v37  ;;  %v1840_v49 = vcvt.f32.s32 %v1839_v40  ;;  %vm2479_vm6 = vcmp.eq.s32.totalorder %v9075_v53, %v7405_v20  ;;  %vm2482_vm7 = vcmp.eq.s32.totalorder %v9075_v53, %v7409_v9 }
 0x33c   : > { %2333 = vxpose.xlu1.b32.cont [8/16] (narrow) %v7359_v46, 8  ;;  %v4813_v27 = vsel %vm2479_vm6, 1.0, %v5683_v2  ;;  %v1827_v46 = vshll.u32 %v1826_v22, 16  ;;  %v4816_v3 = vsel %vm2482_vm7, 1.0, %v5683_v2  ;;  %v1917_v40 = vshll.u32 %v1916_v12, 16 }
 0x33d   : > { %v7421_v62 = vadd.s32 %v1797_v63, %v1795_v60  ;;  %5255 = vmatprep.mubr.msk.f32.mxu1 %vm1013_vm2, %v4813_v27  ;;  %v7426_v1 = vadd.s32 %v1842_v51, %v1840_v49  ;;  %v1991_v27 = vcvt.f32.s32 %v7096_v59 }
 0x33e   : > { %v1824_v18 = vpop.xlane.xlu0 %1823  ;;  %2302 = vxpose.xlu0.b32.cont [9/16] (narrow) %v7275_v17, 8  ;;  %5256 = vmatmul.mubr.msk.f32.gmra.mrb[28].mxu1 %vm1013_vm2, %v4814_v52  ;;  %v1869_v7 = vpop.xlane.xlu1 %1868 }
 0x33f   : > { %v1825_v44 = vcvt.f32.s32 %v1824_v18  ;;  %v1870_v55 = vcvt.f32.s32 %v1869_v7  ;;  %vm2481_vm8 = vcmp.eq.s32.totalorder %v9075_v53, %v7421_v62  ;;  %vm2484_vm9 = vcmp.eq.s32.totalorder %v9075_v53, %v7426_v1 }
 0x340   : > { %2334 = vxpose.xlu1.b32.cont [9/16] (narrow) %v7374_v24, 8  ;;  %v4815_v0 = vsel %vm2481_vm8, 1.0, %v5683_v2  ;;  %v4818_v10 = vsel %vm2484_vm9, 1.0, %v5683_v2 }
 0x341   : > { %v7437_v17 = vadd.s32 %v1827_v46, %v1825_v44  ;;  %5258 = vmatprep.mubr.msk.f32.mxu1 %vm1013_vm2, %v4815_v0  ;;  %v7441_v31 = vadd.s32 %v1872_v57, %v1870_v55  ;;  %v1992_v55 = vshll.u32 %v1991_v27, 16  ;;  %v1977_v0 = vshll.u32 %v1976_v29, 16  ;;  %v9080_v27 = vld [vmem:[#allocation27_spill] sm:$0xff] }
 0x342   : > { %v1854_v19 = vpop.xlane.xlu0 %1853  ;;  %2303 = vxpose.xlu0.b32.cont [10/16] (narrow) %v7266_v54, 8  ;;  %5259 = vmatmul.mubr.msk.f32.gmra.mrb[30].mxu1 %vm1013_vm2, %v4816_v3  ;;  %v1899_v58 = vpop.xlane.xlu1 %1898 }
 0x343   : > { %v1855_v24 = vcvt.f32.s32 %v1854_v19  ;;  %v1900_v36 = vcvt.f32.s32 %v1899_v58  ;;  %vm2483_vm10 = vcmp.eq.s32.totalorder %v9075_v53, %v7437_v17  ;;  %vm2486_vm11 = vcmp.eq.s32.totalorder %v9075_v53, %v7441_v31 }
 0x344   : > { %2335 = vxpose.xlu1.b32.cont [10/16] (narrow) %v7366_v42, 8  ;;  %v4817_v54 = vsel %vm2483_vm10, 1.0, %v5683_v2  ;;  %v1887_v42 = vshll.u32 %v1886_v34, 16  ;;  %v4820_v37 = vsel %vm2486_vm11, 1.0, %v5683_v2 }
 0x345   : > { %v7453_v33 = vadd.s32 %v1857_v15, %v1855_v24  ;;  %5261 = vmatprep.mubr.msk.f32.mxu1 %vm1013_vm2, %v4817_v54  ;;  %v7458_v6 = vadd.s32 %v1902_v5, %v1900_v36  ;;  %v2022_v24 = vshll.u32 %v2021_v38, 16  ;;  %v9077_v36 = vld [vmem:[#allocation24_spill] sm:$0xff] }
 0x346   : > { %v1884_v21 = vpop.xlane.xlu0 %1883  ;;  %2304 = vxpose.xlu0.b32.cont [11/16] (narrow) %v7289_v16, 8  ;;  %5262 = vmatmul.mubr.msk.f32.gmra.mrb[32].mxu1 %vm1013_vm2, %v4818_v10  ;;  %v1929_v13 = vpop.xlane.xlu1 %1928  ;;  %v2051_v5 = vcvt.f32.s32 %v9077_v36  ;;  %v2036_v10 = vcvt.f32.s32 %v7138_v25 }
 0x347   : > { %v1885_v47 = vcvt.f32.s32 %v1884_v21  ;;  %v1930_v39 = vcvt.f32.s32 %v1929_v13  ;;  %vm2485_vm12 = vcmp.eq.s32.totalorder %v9075_v53, %v7453_v33  ;;  %vm2488_vm13 = vcmp.eq.s32.totalorder %v9075_v53, %v7458_v6 }
 0x348   : > { %2336 = vxpose.xlu1.b32.cont [11/16] (narrow) %v7390_v4, 8  ;;  %v4819_v63 = vsel %vm2485_vm12, 1.0, %v5683_v2  ;;  %v4822_v28 = vsel %vm2488_vm13, 1.0, %v5683_v2 }
 0x349   : > { %v7469_v16 = vadd.s32 %v1887_v42, %v1885_v47  ;;  %5264 = vmatprep.mubr.msk.f32.mxu1 %vm1013_vm2, %v4819_v63  ;;  %v7473_v22 = vadd.s32 %v1932_v30, %v1930_v39  ;;  %v2052_v39 = vshll.u32 %v2051_v5, 16  ;;  %v9078_v30 = vld [vmem:[#allocation25_spill] sm:$0xff] }
 0x34a   : > { %v1914_v60 = vpop.xlane.xlu0 %1913  ;;  %2305 = vxpose.xlu0.b32.cont [12/16] (narrow) %v7279_v56, 8  ;;  %5265 = vmatmul.mubr.msk.f32.gmra.mrb[34].mxu1 %vm1013_vm2, %v4820_v37  ;;  %v1959_v49 = vpop.xlane.xlu1 %1958  ;;  %v2081_v25 = vcvt.f32.s32 %v9078_v30  ;;  %v2037_v37 = vshll.u32 %v2036_v10, 16  ;;  %v9084_v10 = vld [vmem:[#allocation30_spill] sm:$0xff] }
 0x34b   : > { %v1915_v4 = vcvt.f32.s32 %v1914_v60  ;;  %v1960_v51 = vcvt.f32.s32 %v1959_v49  ;;  %vm2487_vm14 = vcmp.eq.s32.totalorder %v9075_v53, %v7469_v16  ;;  %vm2490_vm15 = vcmp.eq.s32.totalorder %v9075_v53, %v7473_v22 }
 0x34c   : > { %2337 = vxpose.xlu1.b32.cont [12/16] (narrow) %v7378_v11, 8  ;;  %v4821_v56 = vsel %vm2487_vm14, 1.0, %v5683_v2  ;;  %v1947_v11 = vshll.u32 %v1946_v41, 16  ;;  %v4824_v14 = vsel %vm2490_vm15, 1.0, %v5683_v2 }
 0x34d   : > { %v7485_v52 = vadd.s32 %v1917_v40, %v1915_v4  ;;  %5267 = vmatprep.mubr.msk.f32.mxu1 %vm1013_vm2, %v4821_v56  ;;  %v7490_v18 = vadd.s32 %v1962_v35, %v1960_v51  ;;  %v2082_v35 = vshll.u32 %v2081_v25, 16  ;;  %v2111_v56 = vcvt.f32.s32 %v9080_v27 }
 0x34e   : > { %v1944_v7 = vpop.xlane.xlu0 %1943  ;;  %2306 = vxpose.xlu0.b32.cont [13/16] (narrow) %v7303_v26, 8  ;;  %5268 = vmatmul.mubr.msk.f32.gmra.mrb[36].mxu1 %vm1013_vm2, %v4822_v28  ;;  %v1989_v59 = vpop.xlane.xlu1 %1988 }
 0x34f   : > { %v1945_v46 = vcvt.f32.s32 %v1944_v7  ;;  %v1990_v44 = vcvt.f32.s32 %v1989_v59  ;;  %vm2489_vm1 = vcmp.eq.s32.totalorder %v9075_v53, %v7485_v52  ;;  %vm2492_vm3 = vcmp.eq.s32.totalorder %v9075_v53, %v7490_v18  ;;  %v9081_v7 = vld [vmem:[#allocation31_spill] sm:$0xff] }
 0x350   : > { %2338 = vxpose.xlu1.b32.cont [13/16] (narrow) %v7405_v20, 8  ;;  %v4823_v57 = vsel %vm2489_vm1, 1.0, %v5683_v2  ;;  %v2006_v20 = vcvt.f32.s32 %v9076_v43  ;;  %v4826_v54 = vsel %vm2492_vm3, 1.0, %v5683_v2  ;;  %v2096_v59 = vcvt.f32.s32 %v9081_v7 }
 0x351   : > { %v7501_v26 = vadd.s32 %v1947_v11, %v1945_v46  ;;  %5270 = vmatprep.mubr.msk.f32.mxu1 %vm1013_vm2, %v4823_v57  ;;  %v7505_v3 = vadd.s32 %v1992_v55, %v1990_v44  ;;  %v2112_v57 = vshll.u32 %v2111_v56, 16 }
 0x352   : > { %v1974_v15 = vpop.xlane.xlu0 %1973  ;;  %2307 = vxpose.xlu0.b32.cont [14/16] (narrow) %v7294_v23, 8  ;;  %5271 = vmatmul.mubr.msk.f32.gmra.mrb[38].mxu1 %vm1013_vm2, %v4824_v14  ;;  %v2019_v19 = vpop.xlane.xlu1 %2018  ;;  %v9082_v14 = vld [vmem:[#allocation28_spill] sm:$0xff]  ;;  %v2097_v43 = vshll.u32 %v2096_v59, 16 }
 0x353   : > { %v1975_v58 = vcvt.f32.s32 %v1974_v15  ;;  %v2020_v34 = vcvt.f32.s32 %v2019_v19  ;;  %vm2491_vm4 = vcmp.eq.s32.totalorder %v9075_v53, %v7501_v26  ;;  %vm2494_vm5 = vcmp.eq.s32.totalorder %v9075_v53, %v7505_v3 }
 0x354   : > { %2339 = vxpose.xlu1.b32.cont [14/16] (narrow) %v7395_v50, 8  ;;  %v4825_v23 = vsel %vm2491_vm4, 1.0, %v5683_v2  ;;  %v2007_v50 = vshll.u32 %v2006_v20, 16  ;;  %v4828_v63 = vsel %vm2494_vm5, 1.0, %v5683_v2 }
 0x355   : > { %v7517_v32 = vadd.s32 %v1977_v0, %v1975_v58  ;;  %5273 = vmatprep.mubr.msk.f32.mxu1 %vm1013_vm2, %v4825_v23  ;;  %v7522_v12 = vadd.s32 %v2022_v24, %v2020_v34  ;;  %v2141_v0 = vcvt.f32.s32 %v9082_v14  ;;  %v9083_v24 = vld [vmem:[#allocation33_spill] sm:$0xff] }
 0x356   : > { %v2004_v21 = vpop.xlane.xlu0 %2003  ;;  %2308 = vxpose.xlu0.b32.cont [15/16] (narrow) %v7316_v61, 8  ;;  %5274 = vmatmul.mubr.msk.f32.gmra.mrb[40].mxu1 %vm1013_vm2, %v4826_v54  ;;  %v2049_v13 = vpop.xlane.xlu1 %2048  ;;  %v2126_v36 = vcvt.f32.s32 %v9083_v24 }
 0x357   : > { %v2005_v42 = vcvt.f32.s32 %v2004_v21  ;;  %v2050_v47 = vcvt.f32.s32 %v2049_v13  ;;  %vm2493_vm6 = vcmp.eq.s32.totalorder %v9075_v53, %v7517_v32  ;;  %vm2496_vm7 = vcmp.eq.s32.totalorder %v9075_v53, %v7522_v12 }
 0x358   : > { %2340 = vxpose.xlu1.b32.cont [15/16] (narrow) %v7421_v62, 8  ;;  %v4827_v45 = vsel %vm2493_vm6, 1.0, %v5683_v2  ;;  %v9079_v62 = vld [vmem:[#allocation29_spill] sm:$0xff]  ;;  %v4830_v29 = vsel %vm2496_vm7, 1.0, %v5683_v2  ;;  %v2142_v54 = vshll.u32 %v2141_v0, 16  ;;  %v2171_v21 = vcvt.f32.s32 %v9084_v10 }
 0x359   : > { %v7533_v61 = vadd.s32 %v2007_v50, %v2005_v42  ;;  %5276 = vmatprep.mubr.msk.f32.mxu1 %vm1013_vm2, %v4827_v45  ;;  %v7537_v40 = vadd.s32 %v2052_v39, %v2050_v47  ;;  %v2066_v41 = vcvt.f32.s32 %v9079_v62  ;;  %v9085_v42 = vld [vmem:[#allocation34_spill] sm:$0xff]  ;;  %v2127_v45 = vshll.u32 %v2126_v36, 16 }
 0x35a   : > { %v2034_v60 = vpop.xlane.xlu0 %2033  ;;  %2309 = vxpose.xlu0.b32.end [16/16] (narrow) %v7307_v8, 8  ;;  %5277 = vmatmul.mubr.msk.f32.gmra.mrb[42].mxu1 %vm1013_vm2, %v4828_v63  ;;  %v2079_v49 = vpop.xlane.xlu1 %2078  ;;  %v2156_v47 = vcvt.f32.s32 %v9085_v42 }
 0x35b   : > { %v2035_v4 = vcvt.f32.s32 %v2034_v60  ;;  %v2080_v51 = vcvt.f32.s32 %v2079_v49  ;;  %vm2495_vm8 = vcmp.eq.s32.totalorder %v9075_v53, %v7533_v61  ;;  %vm2498_vm9 = vcmp.eq.s32.totalorder %v9075_v53, %v7537_v40  ;;  %v9086_v49 = vld [vmem:[#allocation32_spill] sm:$0xff] }
 0x35c   : > { %2341 = vxpose.xlu1.b32.end [16/16] (narrow) %v7409_v9, 8  ;;  %v4829_v8 = vsel %vm2495_vm8, 1.0, %v5683_v2  ;;  %v2067_v9 = vshll.u32 %v2066_v41, 16  ;;  %v2172_v60 = vshll.u32 %v2171_v21, 16  ;;  %v2201_v62 = vcvt.f32.s32 %v9086_v49  ;;  %v9091_v21 = vld [vmem:[#allocation39_spill] sm:$0xff] }
 0x35d   : > { %v7549_v28 = vadd.s32 %v2037_v37, %v2035_v4  ;;  %5279 = vmatprep.mubr.msk.f32.mxu1 %vm1013_vm2, %v4829_v8  ;;  %v2083_v11 = vadd.s32 %v2082_v35, %v2080_v51  ;;  %v2157_v51 = vshll.u32 %v2156_v47, 16  ;;  %v9087_v8 = vld [vmem:[#allocation36_spill] sm:$0xff] }
 0x35e   : > { %v2064_v46 = vpop.xlane.xlu0 %2063  ;;  %2358 = vxpose.xlu0.b32.start [1/16] (narrow) %v7437_v17, 8  ;;  %5280 = vmatmul.mubr.msk.f32.gmra.mrb[44].mxu1 %vm1013_vm2, %v4830_v29  ;;  %v2109_v44 = vpop.xlane.xlu1 %2108  ;;  %v4832_v17 = vsel %vm2498_vm9, 1.0, %v5683_v2  ;;  %v2186_v29 = vcvt.f32.s32 %v9087_v8 }
 0x35f   : > { %v2065_v55 = vcvt.f32.s32 %v2064_v46  ;;  %v2110_v38 = vcvt.f32.s32 %v2109_v44  ;;  %vm2497_vm10 = vcmp.eq.s32.totalorder %v9075_v53, %v7549_v28  ;;  %vm2500_vm11 = vcmp.eq.s32.totalorder %v9075_v53, %v2083_v11  ;;  %v9088_v46 = vld [vmem:[#allocation35_spill] sm:$0xff] }
 0x360   : > { %v4831_v15 = vsel %vm2497_vm10, 1.0, %v5683_v2  ;;  %v2231_v44 = vcvt.f32.s32 %v9088_v46 }
 0x361   : > { %v2068_v19 = vadd.s32 %v2067_v9, %v2065_v55  ;;  %5282 = vmatprep.mubr.msk.f32.mxu1 %vm1013_vm2, %v4831_v15  ;;  %v2113_v20 = vadd.s32 %v2112_v57, %v2110_v38  ;;  %v9089_v38 = vld [vmem:[#allocation37_spill] sm:$0xff] }
 0x362   : > { %v2094_v58 = vpop.xlane.xlu0 %2093  ;;  %2359 = vxpose.xlu0.b32.cont [2/16] (narrow) %v7426_v1, 8  ;;  %5283 = vmatmul.mubr.msk.f32.gmra.mrb[46].mxu1 %vm1013_vm2, %v4832_v17  ;;  %v2139_v34 = vpop.xlane.xlu1 %2138  ;;  %v4834_v1 = vsel %vm2500_vm11, 1.0, %v5683_v2  ;;  %v2216_v57 = vcvt.f32.s32 %v9089_v38  ;;  %v5464_v38 = vld [vmem:[%s5803_s6 + $0x20] sm:$0xff] }
 0x363   : > { %v2095_v5 = vcvt.f32.s32 %v2094_v58  ;;  %v2140_v23 = vcvt.f32.s32 %v2139_v34  ;;  %2390 = vxpose.xlu1.b32.start [1/16] (narrow) %v2068_v19, 8  ;;  %vm2499_vm12 = vcmp.eq.s32.totalorder %v9075_v53, %v2068_v19  ;;  %vm2502_vm13 = vcmp.eq.s32.totalorder %v9075_v53, %v2113_v20  ;;  %v9090_v34 = vld [vmem:[#allocation38_spill] sm:$0xff] }
 0x364   : > { %v4833_v13 = vsel %vm2499_vm12, 1.0, %v5683_v2  ;;  %v2187_v19 = vshll.u32 %v2186_v29, 16  ;;  %v2232_v58 = vshll.u32 %v2231_v44, 16  ;;  %v2261_v24 = vcvt.f32.s32 %v9090_v34 }
 0x365   : > { %v2098_v50 = vadd.s32 %v2097_v43, %v2095_v5  ;;  %5285 = vmatprep.mubr.msk.f32.mxu1 %vm1013_vm2, %v4833_v13  ;;  %v7574_v39 = vadd.s32 %v2142_v54, %v2140_v23  ;;  %v2217_v23 = vshll.u32 %v2216_v57, 16  ;;  %v2246_v13 = vcvt.f32.s32 %v9091_v21 }
 0x366   : > { %v2124_v30 = vpop.xlane.xlu0 %2123  ;;  %2360 = vxpose.xlu0.b32.cont [3/16] (narrow) %v7453_v33, 8  ;;  %5286 = vmatmul.mubr.msk.f32.gmra.mrb[48].mxu1 %vm1013_vm2, %v4834_v1  ;;  %v2169_v25 = vpop.xlane.xlu1 %2168  ;;  %v4836_v33 = vsel %vm2502_vm13, 1.0, %v5683_v2  ;;  %v2262_v42 = vshll.u32 %v2261_v24, 16  ;;  %vm3549_vm13 = vcmask (!%p4913_p11), 253952  }
 0x367   : > { %v2125_v63 = vcvt.f32.s32 %v2124_v30  ;;  %v2170_v37 = vcvt.f32.s32 %v2169_v25  ;;  %2391 = vxpose.xlu1.b32.cont [2/16] (narrow) %v2083_v11, 8  ;;  %vm2501_vm14 = vcmp.eq.s32.totalorder %v9075_v53, %v2098_v50  ;;  %vm2504_vm15 = vcmp.eq.s32.totalorder %v9075_v53, %v7574_v39 }
 0x368   : > { %v4835_v41 = vsel %vm2501_vm14, 1.0, %v5683_v2  ;;  %v2202_v11 = vshll.u32 %v2201_v62, 16 }
 0x369   : > { %v2128_v4 = vadd.s32 %v2127_v45, %v2125_v63  ;;  %5288 = vmatprep.mubr.msk.f32.mxu1 %vm1013_vm2, %v4835_v41  ;;  %v7584_v35 = vadd.s32 %v2172_v60, %v2170_v37  ;;  %v2247_v63 = vshll.u32 %v2246_v13, 16  ;;  %v9092_v60 = vld [vmem:[#allocation40_spill] sm:$0xff] }
 0x36a   : > { %v2154_v27 = vpop.xlane.xlu0 %2153  ;;  %2361 = vxpose.xlu0.b32.cont [4/16] (narrow) %v7441_v31, 8  ;;  %5289 = vmatmul.mubr.msk.f32.gmra.mrb[50].mxu1 %vm1013_vm2, %v4836_v33  ;;  %v2199_v56 = vpop.xlane.xlu1 %2198  ;;  %v4838_v31 = vsel %vm2504_vm15, 1.0, %v5683_v2  ;;  %v2291_v49 = vcvt.f32.s32 %v9092_v60  ;;  %v5468_v13 = vld [vmem:[%s5803_s6 + $0x40] sm:$0xff] }
 0x36b   : > { %v2155_v7 = vcvt.f32.s32 %v2154_v27  ;;  %v2200_v59 = vcvt.f32.s32 %v2199_v56  ;;  %2392 = vxpose.xlu1.b32.cont [3/16] (narrow) %v2098_v50, 8  ;;  %vm2503_vm1 = vcmp.eq.s32.totalorder %v9075_v53, %v2128_v4  ;;  %vm2506_vm3 = vcmp.eq.s32.totalorder %v9075_v53, %v7584_v35 }
 0x36c   : > { %v4837_v9 = vsel %vm2503_vm1, 1.0, %v5683_v2 }
 0x36d   : > { %v2158_v55 = vadd.s32 %v2157_v51, %v2155_v7  ;;  %5291 = vmatprep.mubr.msk.f32.mxu1 %vm1013_vm2, %v4837_v9  ;;  %v7597_v14 = vadd.s32 %v2202_v11, %v2200_v59  ;;  %v2292_v51 = vshll.u32 %v2291_v49, 16  ;;  %v5462_v11 = vld [vmem:[%s5803_s6 + $0x10] sm:$0xff]  ;;  %v5463_v9 = vld [vmem:[%s5803_s6 + $0x28] sm:$0xff] }
 0x36e   : > { %v2184_v0 = vpop.xlane.xlu0 %2183  ;;  %2362 = vxpose.xlu0.b32.cont [5/16] (narrow) %v7469_v16, 8  ;;  %5292 = vmatmul.mubr.msk.f32.gmra.mrb[52].mxu1 %vm1013_vm2, %v4838_v31  ;;  %v2229_v15 = vpop.xlane.xlu1 %2228  ;;  %v4840_v16 = vsel %vm2506_vm3, 1.0, %v5683_v2 }
 0x36f   : > { %v2185_v17 = vcvt.f32.s32 %v2184_v0  ;;  %v2230_v43 = vcvt.f32.s32 %v2229_v15  ;;  %2393 = vxpose.xlu1.b32.cont [4/16] (narrow) %v2113_v20, 8  ;;  %vm2505_vm4 = vcmp.eq.s32.totalorder %v9075_v53, %v2158_v55  ;;  %vm2508_vm5 = vcmp.eq.s32.totalorder %v9075_v53, %v7597_v14 }
 0x370   : > { %v4839_v36 = vsel %vm2505_vm4, 1.0, %v5683_v2 }
 0x371   : > { %v2188_v5 = vadd.s32 %v2187_v19, %v2185_v17  ;;  %5294 = vmatprep.mubr.msk.f32.mxu1 %vm1013_vm2, %v4839_v36  ;;  %v2233_v54 = vadd.s32 %v2232_v58, %v2230_v43  ;;  %v5465_v19 = vld [vmem:[%s5803_s6 + $0x38] sm:$0xff]  ;;  %v5466_v58 = vld [vmem:[%s5803_s6 + $0x30] sm:$0xff] }
 0x372   : > { %v2214_v10 = vpop.xlane.xlu0 %2213  ;;  %2363 = vxpose.xlu0.b32.cont [6/16] (narrow) %v7458_v6, 8  ;;  %5295 = vmatmul.mubr.msk.f32.gmra.mrb[54].mxu1 %vm1013_vm2, %v4840_v16  ;;  %v2259_v20 = vpop.xlane.xlu1 %2258  ;;  %v4842_v6 = vsel %vm2508_vm5, 1.0, %v5683_v2 }
 0x373   : > { %v2215_v50 = vcvt.f32.s32 %v2214_v10  ;;  %v2260_v1 = vcvt.f32.s32 %v2259_v20  ;;  %2394 = vxpose.xlu1.b32.cont [5/16] (narrow) %v2128_v4, 8  ;;  %vm2507_vm6 = vcmp.eq.s32.totalorder %v9075_v53, %v2188_v5  ;;  %vm2510_vm7 = vcmp.eq.s32.totalorder %v9075_v53, %v2233_v54  ;;  %v5467_v10 = vld [vmem:[%s5803_s6 + $0x48] sm:$0xff] }
 0x374   : > { %v4841_v47 = vsel %vm2507_vm6, 1.0, %v5683_v2  ;;  %v4844_v4 = vsel %vm2510_vm7, 1.0, %v5683_v2 }
 0x375   : > { %v2218_v30 = vadd.s32 %v2217_v23, %v2215_v50  ;;  %5297 = vmatprep.mubr.msk.f32.mxu1 %vm1013_vm2, %v4841_v47  ;;  %v2263_v25 = vadd.s32 %v2262_v42, %v2260_v1 }
 0x376   : > { %v2244_v45 = vpop.xlane.xlu0 %2243  ;;  %2364 = vxpose.xlu0.b32.cont [7/16] (narrow) %v7485_v52, 8  ;;  %5298 = vmatmul.mubr.msk.f32.gmra.mrb[56].mxu1 %vm1013_vm2, %v4842_v6  ;;  %v5469_v6 = vld [vmem:[%s5803_s6 + $0x58] sm:$0xff] }
 0x377   : > { %v2245_v37 = vcvt.f32.s32 %v2244_v45  ;;  %2395 = vxpose.xlu1.b32.cont [6/16] (narrow) %v7574_v39, 8  ;;  %vm2509_vm8 = vcmp.eq.s32.totalorder %v9075_v53, %v2218_v30  ;;  %vm2512_vm9 = vcmp.eq.s32.totalorder %v9075_v53, %v2263_v25  ;;  %v2276_v39 = vcvt.f32.s32 %v7212_v48 }
 0x378   : > { %v4843_v62 = vsel %vm2509_vm8, 1.0, %v5683_v2  ;;  %v4846_v56 = vsel %vm2512_vm9, 1.0, %v5683_v2 }
 0x379   : > { %v2248_v41 = vadd.s32 %v2247_v63, %v2245_v37  ;;  %5300 = vmatprep.mubr.msk.f32.mxu1 %vm1013_vm2, %v4843_v62  ;;  %v2277_v29 = vshll.u32 %v2276_v39, 16  ;;  %v5470_v63 = vld [vmem:[%s5803_s6 + $0x50] sm:$0xff] }
 0x37a   : > { %2365 = vxpose.xlu0.b32.cont [8/16] (narrow) %v7473_v22, 8  ;;  %5301 = vmatmul.mubr.msk.f32.gmra.mrb[58].mxu1 %vm1013_vm2, %v4844_v4  ;;  %v2289_v52 = vpop.xlane.xlu1 %2288  ;;  %v5471_v4 = vld [vmem:[%s5803_s6 + $0x68] sm:$0xff] }
 0x37b   : > { %v2290_v33 = vcvt.f32.s32 %v2289_v52  ;;  %2396 = vxpose.xlu1.b32.cont [7/16] (narrow) %v2158_v55, 8  ;;  %vm2511_vm10 = vcmp.eq.s32.totalorder %v9075_v53, %v2248_v41 }
 0x37c   : > { %v4845_v27 = vsel %vm2511_vm10, 1.0, %v5683_v2 }
 0x37d   : > { %5303 = vmatprep.mubr.msk.f32.mxu1 %vm1013_vm2, %v4845_v27  ;;  %v2293_v8 = vadd.s32 %v2292_v51, %v2290_v33  ;;  %v5472_v51 = vld [vmem:[%s5803_s6 + $0x60] sm:$0xff] }
 0x37e   : > { %v2274_v22 = vpop.xlane.xlu0 %2273  ;;  %2366 = vxpose.xlu0.b32.cont [9/16] (narrow) %v7501_v26, 8  ;;  %5304 = vmatmul.mubr.msk.f32.gmra.mrb[60].mxu1 %vm1013_vm2, %v4846_v56 }
 0x37f   : > { %v2275_v7 = vcvt.f32.s32 %v2274_v22  ;;  %2397 = vxpose.xlu1.b32.cont [8/16] (narrow) %v7584_v35, 8  ;;  %vm2514_vm11 = vcmp.eq.s32.totalorder %v9075_v53, %v2293_v8  ;;  %v5473_v22 = vld [vmem:[%s5803_s6 + $0x78] sm:$0xff] }
 0x380   : > { %v4848_v26 = vsel %vm2514_vm11, 1.0, %v5683_v2 }
 0x381   : > { %v2278_v48 = vadd.s32 %v2277_v29, %v2275_v7 }
 0x382   : > { %2367 = vxpose.xlu0.b32.cont [10/16] (narrow) %v7490_v18, 8 }
 0x383   : > { %2398 = vxpose.xlu1.b32.cont [9/16] (narrow) %v2188_v5, 8  ;;  %vm2513_vm12 = vcmp.eq.s32.totalorder %v9075_v53, %v2278_v48  ;;  %v9098_v5 = vlaneseq }
 0x384   : > { %v4847_v59 = vsel %vm2513_vm12, 1.0, %v5683_v2  ;;  %v5459_v2 = vld [vmem:[%s5803_s6 + $0x8] sm:$0xff] }
 0x385   : > { %5306 = vmatprep.mubr.msk.f32.mxu1 %vm1013_vm2, %v4847_v59  ;;  %v7698_v16 = vshrl.u32 %v9098_v5, 7  ;;  %v5474_v59 = vld [vmem:[%s5803_s6 + $0x70] sm:$0xff] }
 0x386   : > { %2368 = vxpose.xlu0.b32.cont [11/16] (narrow) %v7517_v32, 8  ;;  %5307 = vmatmul.mubr.msk.f32.gmra.mrb[62].mxu1 %vm1013_vm2, %v4848_v26  ;;  %v5460_v32 = vld [vmem:[%s5803_s6] sm:$0xff]  ;;  %vm2448_vm2 = vcmp.lt.s32.totalorder %v9098_v5, 512 }
 0x387   : > { %2399 = vxpose.xlu1.b32.cont [10/16] (narrow) %v7597_v14, 8  ;;  %v5684_v14 = vmov 1966171168   ;;  %9099 = vst [vmem:[#allocation45_spill] sm:$0xff] %v7698_v16 }
 0x388   : > { %v2425_v0 = vunpack.c.l.s4 %v5684_v14 }
 0x38a   : > { %2369 = vxpose.xlu0.b32.cont [12/16] (narrow) %v7505_v3, 8  ;;  %v2426_v36 = vunpack.c.0.s8 %v2425_v0  ;;  %v5479_v0 = vld [vmem:[%s5803_s6 + $0xa8] sm:$0xff] }
 0x38b   : > { %2400 = vxpose.xlu1.b32.cont [11/16] (narrow) %v2218_v30, 8 }
 0x38c   : > { %v2429_v1 = vsub.s32 %v2426_v36, %v7698_v16  ;;  %v5481_v36 = vld [vmem:[%s5803_s6 + $0xb8] sm:$0xff] }
 0x38e   : > { %2370 = vxpose.xlu0.b32.cont [13/16] (narrow) %v7533_v61, 8 }
 0x38f   : > { %2401 = vxpose.xlu1.b32.cont [12/16] (narrow) %v2233_v54, 8 }
 0x392   : > { %2371 = vxpose.xlu0.b32.cont [14/16] (narrow) %v7522_v12, 8 }
 0x393   : > { %2402 = vxpose.xlu1.b32.cont [13/16] (narrow) %v2248_v41, 8 }
 0x396   : > { %2372 = vxpose.xlu0.b32.cont [15/16] (narrow) %v7549_v28, 8 }
 0x397   : > { %2403 = vxpose.xlu1.b32.cont [14/16] (narrow) %v2263_v25, 8 }
 0x39a   : > { %2373 = vxpose.xlu0.b32.end [16/16] (narrow) %v7537_v40, 8  ;;  %v5461_v40 = vld [vmem:[%s5803_s6 + $0x18] sm:$0xff] }
 0x39b   : > { %2404 = vxpose.xlu1.b32.cont [15/16] (narrow) %v2278_v48, 8 }
 0x39e   : > { %v2310_v24 = vpop.trf.xlu0 }
 0x39f   : > { %2405 = vxpose.xlu1.b32.end [16/16] (narrow) %v2293_v8, 8 }
 0x3a0   : > { %v2342_v54 = vpop.trf.xlu1 }
 0x3a1   : > { %v2422_v42 = vcombine.low %v2310_v24, %v2342_v54  ;;  %v5482_v54 = vld [vmem:[%s5803_s6 + $0xb0] sm:$0xff] }
 0x3a3   : > { %v2430_v49 = vrot.slane %v2422_v42, %v2429_v1 }
 0x3cd   : > { %v5215_v53 = vpop.f32.mrb[0].mxu1 }
 0x3ce   : > { %3221 = vst.msk [vmem:[%s7655_s16 + $0x8] sm:$0xff] %vm339_vm0, %v5215_v53  ;;  %v7660_v18 = vsub.f32 %v5215_v53, %v5459_v2  ;;  %v2901_v3 = vpop.f32.mrb[1].mxu1  ;;  %v5475_v2 = vld [vmem:[%s5803_s6 + $0x88] sm:$0xff] }
 0x3cf   : > { %3220 = vst.msk [vmem:[%s7655_s16] sm:$0xff] %vm339_vm0, %v2901_v3  ;;  %v7665_v12 = vsub.f32 %v2901_v3, %v5460_v32 }
 0x3d0   : > { %9093 = vst [vmem:[#allocation41_spill] sm:$0xff] %v7660_v18 }
 0x3d1   : > { %9094 = vst [vmem:[#allocation42_spill] sm:$0xff] %v7665_v12  ;;  %v5218_v61 = vpop.f32.mrb[2].mxu1 }
 0x3d2   : > { %3223 = vst.msk [vmem:[%s7655_s16 + $0x18] sm:$0xff] %vm339_vm0, %v5218_v61  ;;  %v7670_v28 = vsub.f32 %v5218_v61, %v5461_v40  ;;  %v2911_v35 = vpop.f32.mrb[3].mxu1  ;;  %v5476_v61 = vld [vmem:[%s5803_s6 + $0x80] sm:$0xff] }
 0x3d3   : > { %3222 = vst.msk [vmem:[%s7655_s16 + $0x10] sm:$0xff] %vm339_vm0, %v2911_v35  ;;  %v7675_v46 = vsub.f32 %v2911_v35, %v5462_v11  ;;  %v5477_v11 = vld [vmem:[%s5803_s6 + $0x98] sm:$0xff] }
 0x3d4   : > { %9095 = vst [vmem:[#allocation43_spill] sm:$0xff] %v7670_v28 }
 0x3d5   : > { %9096 = vst [vmem:[#allocation59_spill] sm:$0xff] %v7675_v46  ;;  %v5221_v44 = vpop.f32.mrb[4].mxu1 }
 0x3d6   : > { %3225 = vst.msk [vmem:[%s7655_s16 + $0x28] sm:$0xff] %vm339_vm0, %v5221_v44  ;;  %v7680_v55 = vsub.f32 %v5221_v44, %v5463_v9  ;;  %v2921_v31 = vpop.f32.mrb[5].mxu1 }
 0x3d7   : > { %3224 = vst.msk [vmem:[%s7655_s16 + $0x20] sm:$0xff] %vm339_vm0, %v2921_v31  ;;  %v7685_v57 = vsub.f32 %v2921_v31, %v5464_v38  ;;  %v5478_v31 = vld [vmem:[%s5803_s6 + $0x90] sm:$0xff] }
 0x3d9   : > { %9097 = vst [vmem:[#allocation44_spill] sm:$0xff] %v7685_v57  ;;  %v5224_v15 = vpop.f32.mrb[6].mxu1 }
 0x3da   : > { %3227 = vst.msk [vmem:[%s7655_s16 + $0x38] sm:$0xff] %vm339_vm0, %v5224_v15  ;;  %v7690_v17 = vsub.f32 %v5224_v15, %v5465_v19  ;;  %v2931_v43 = vpop.f32.mrb[7].mxu1 }
 0x3db   : > { %3226 = vst.msk [vmem:[%s7655_s16 + $0x30] sm:$0xff] %vm339_vm0, %v2931_v43  ;;  %v7695_v34 = vsub.f32 %v2931_v43, %v5466_v58  ;;  %v5480_v43 = vld [vmem:[%s5803_s6 + $0xa0] sm:$0xff] }
 0x3dd   : > { %v5227_v23 = vpop.f32.mrb[8].mxu1 }
 0x3de   : > { %3229 = vst.msk [vmem:[%s7655_s16 + $0x48] sm:$0xff] %vm339_vm0, %v5227_v23  ;;  %v7703_v20 = vsub.f32 %v5227_v23, %v5467_v10  ;;  %v2941_v21 = vpop.f32.mrb[9].mxu1  ;;  %v2374_v30 = vpop.trf.xlu0 }
 0x3df   : > { %3228 = vst.msk [vmem:[%s7655_s16 + $0x40] sm:$0xff] %vm339_vm0, %v2941_v21  ;;  %v7708_v50 = vsub.f32 %v2941_v21, %v5468_v13  ;;  %v5483_v13 = vld [vmem:[%s5803_s6 + $0xc8] sm:$0xff] }
 0x3e1   : > { %v5230_v47 = vpop.f32.mrb[10].mxu1 }
 0x3e2   : > { %3231 = vst.msk [vmem:[%s7655_s16 + $0x58] sm:$0xff] %vm339_vm0, %v5230_v47  ;;  %v7714_v25 = vsub.f32 %v5230_v47, %v5469_v6  ;;  %v2951_v45 = vpop.f32.mrb[11].mxu1  ;;  %v5484_v47 = vld [vmem:[%s5803_s6 + $0xc0] sm:$0xff] }
 0x3e3   : > { %3230 = vst.msk [vmem:[%s7655_s16 + $0x50] sm:$0xff] %vm339_vm0, %v2951_v45  ;;  %v7719_v37 = vsub.f32 %v2951_v45, %v5470_v63  ;;  %v2406_v60 = vpop.trf.xlu1  ;;  %v5485_v45 = vld [vmem:[%s5803_s6 + $0xd8] sm:$0xff] }
 0x3e4   : > { %v2423_v62 = vcombine.low %v2374_v30, %v2406_v60 }
 0x3e5   : > { %v5233_v41 = vpop.f32.mrb[12].mxu1 }
 0x3e6   : > { %3233 = vst.msk [vmem:[%s7655_s16 + $0x68] sm:$0xff] %vm339_vm0, %v5233_v41  ;;  %v7724_v52 = vsub.f32 %v5233_v41, %v5471_v4  ;;  %v2961_v39 = vpop.f32.mrb[13].mxu1  ;;  %v2437_v33 = vrot.slane %v2423_v62, %v2429_v1  ;;  %v5487_v4 = vld [vmem:[%s5803_s6 + $0xe8] sm:$0xff] }
 0x3e7   : > { %3232 = vst.msk [vmem:[%s7655_s16 + $0x60] sm:$0xff] %vm339_vm0, %v2961_v39  ;;  %v7730_v27 = vsub.f32 %v2961_v39, %v5472_v51  ;;  %v5488_v51 = vld [vmem:[%s5803_s6 + $0xe0] sm:$0xff] }
 0x3e8   : > { %v2438_v56 = vcombine.low %v2430_v49, %v2437_v33  ;;  %v5486_v49 = vld [vmem:[%s5803_s6 + $0xd0] sm:$0xff] }
 0x3e9   : > { %v5236_v8 = vpop.f32.mrb[14].mxu1 }
 0x3ea   : > { %3235 = vst.msk [vmem:[%s7655_s16 + $0x78] sm:$0xff] %vm339_vm0, %v5236_v8  ;;  %v7736_v29 = vsub.f32 %v5236_v8, %v5473_v22  ;;  %v2971_v7 = vpop.f32.mrb[15].mxu1  ;;  %v2445_v48 = vrot.slane %v2438_v56, %v2429_v1  ;;  %v5489_v22 = vld [vmem:[%s5803_s6 + $0xf8] sm:$0xff] }
 0x3eb   : > { %3234 = vst.msk [vmem:[%s7655_s16 + $0x70] sm:$0xff] %vm339_vm0, %v2971_v7  ;;  %v7741_v26 = vsub.f32 %v2971_v7, %v5474_v59  ;;  %v5490_v59 = vld [vmem:[%s5803_s6 + $0xf0] sm:$0xff] }
 0x3ec   : > { %2450 = vst.msk [vmem:[%s7743_s23] sm:$0xf] %vm2448_vm2, %v2445_v48 }
 0x3ed   : > { %v5239_v53 = vpop.f32.mrb[16].mxu1 }
 0x3ee   : > { %3237 = vst.msk [vmem:[%s7655_s16 + $0x88] sm:$0xff] %vm339_vm0, %v5239_v53  ;;  %v7749_v3 = vsub.f32 %v5239_v53, %v5475_v2  ;;  %v2981_v32 = vpop.f32.mrb[17].mxu1 }
 0x3ef   : > { %3236 = vst.msk [vmem:[%s7655_s16 + $0x80] sm:$0xff] %vm339_vm0, %v2981_v32  ;;  %v7754_v40 = vsub.f32 %v2981_v32, %v5476_v61  ;;  %v5491_v32 = vld [vmem:[%s5803_s6 + $0x108] sm:$0xff] }
 0x3f5   : > { %v5242_v35 = vpop.f32.mrb[18].mxu1 }
 0x3f6   : > { %3239 = vst.msk [vmem:[%s7655_s16 + $0x98] sm:$0xff] %vm339_vm0, %v5242_v35  ;;  %v7759_v44 = vsub.f32 %v5242_v35, %v5477_v11  ;;  %v2991_v9 = vpop.f32.mrb[19].mxu1  ;;  %v5492_v11 = vld [vmem:[%s5803_s6 + $0x100] sm:$0xff] }
 0x3f7   : > { %3238 = vst.msk [vmem:[%s7655_s16 + $0x90] sm:$0xff] %vm339_vm0, %v2991_v9  ;;  %v7764_v38 = vsub.f32 %v2991_v9, %v5478_v31 }
 0x3fd   : > { %v5245_v14 = vpop.f32.mrb[20].mxu1 }
 0x3fe   : > { %3241 = vst.msk [vmem:[%s7655_s16 + $0xa8] sm:$0xff] %vm339_vm0, %v5245_v14  ;;  %v7769_v15 = vsub.f32 %v5245_v14, %v5479_v0  ;;  %v3001_v19 = vpop.f32.mrb[21].mxu1  ;;  %v5493_v14 = vld [vmem:[%s5803_s6 + $0x118] sm:$0xff] }
 0x3ff   : > { %3240 = vst.msk [vmem:[%s7655_s16 + $0xa0] sm:$0xff] %vm339_vm0, %v3001_v19  ;;  %v7774_v58 = vsub.f32 %v3001_v19, %v5480_v43  ;;  %v5494_v43 = vld [vmem:[%s5803_s6 + $0x110] sm:$0xff] }
 0x405   : > { %v5248_v24 = vpop.f32.mrb[22].mxu1 }
 0x406   : > { %3243 = vst.msk [vmem:[%s7655_s16 + $0xb8] sm:$0xff] %vm339_vm0, %v5248_v24  ;;  %v7779_v5 = vsub.f32 %v5248_v24, %v5481_v36  ;;  %v3011_v23 = vpop.f32.mrb[23].mxu1 }
 0x407   : > { %3242 = vst.msk [vmem:[%s7655_s16 + $0xb0] sm:$0xff] %vm339_vm0, %v3011_v23  ;;  %v7784_v10 = vsub.f32 %v3011_v23, %v5482_v54  ;;  %v5495_v23 = vld [vmem:[%s5803_s6 + $0x128] sm:$0xff] }
 0x409   : > { %v5251_v21 = vpop.f32.mrb[24].mxu1 }
 0x40a   : > { %3245 = vst.msk [vmem:[%s7655_s16 + $0xc8] sm:$0xff] %vm339_vm0, %v5251_v21  ;;  %v7789_v1 = vsub.f32 %v5251_v21, %v5483_v13  ;;  %v3021_v42 = vpop.f32.mrb[25].mxu1  ;;  %v5496_v13 = vld [vmem:[%s5803_s6 + $0x120] sm:$0xff] }
 0x40b   : > { %3244 = vst.msk [vmem:[%s7655_s16 + $0xc0] sm:$0xff] %vm339_vm0, %v3021_v42  ;;  %v7794_v30 = vsub.f32 %v3021_v42, %v5484_v47 }
 0x40d   : > { %v5254_v6 = vpop.f32.mrb[26].mxu1 }
 0x40e   : > { %3247 = vst.msk [vmem:[%s7655_s16 + $0xd8] sm:$0xff] %vm339_vm0, %v5254_v6  ;;  %v7799_v63 = vsub.f32 %v5254_v6, %v5485_v45  ;;  %v3031_v60 = vpop.f32.mrb[27].mxu1  ;;  %v5497_v6 = vld [vmem:[%s5803_s6 + $0x138] sm:$0xff] }
 0x40f   : > { %3246 = vst.msk [vmem:[%s7655_s16 + $0xd0] sm:$0xff] %vm339_vm0, %v3031_v60  ;;  %v7804_v62 = vsub.f32 %v3031_v60, %v5486_v49  ;;  %v5498_v49 = vld [vmem:[%s5803_s6 + $0x130] sm:$0xff] }
 0x411   : > { %v5257_v41 = vpop.f32.mrb[28].mxu1 }
 0x412   : > { %3249 = vst.msk [vmem:[%s7655_s16 + $0xe8] sm:$0xff] %vm339_vm0, %v5257_v41  ;;  %v7809_v39 = vsub.f32 %v5257_v41, %v5487_v4  ;;  %v3041_v33 = vpop.f32.mrb[29].mxu1 }
 0x413   : > { %3248 = vst.msk [vmem:[%s7655_s16 + $0xe0] sm:$0xff] %vm339_vm0, %v3041_v33  ;;  %v7814_v56 = vsub.f32 %v3041_v33, %v5488_v51  ;;  %v5499_v33 = vld [vmem:[%s5803_s6 + $0x148] sm:$0xff] }
 0x415   : > { %v5260_v8 = vpop.f32.mrb[30].mxu1 }
 0x416   : > { %3251 = vst.msk [vmem:[%s7655_s16 + $0xf8] sm:$0xff] %vm339_vm0, %v5260_v8  ;;  %v7819_v7 = vsub.f32 %v5260_v8, %v5489_v22  ;;  %v3051_v48 = vpop.f32.mrb[31].mxu1  ;;  %v5500_v22 = vld [vmem:[%s5803_s6 + $0x140] sm:$0xff] }
 0x417   : > { %3250 = vst.msk [vmem:[%s7655_s16 + $0xf0] sm:$0xff] %vm339_vm0, %v3051_v48  ;;  %v7824_v53 = vsub.f32 %v3051_v48, %v5490_v59 }
 0x419   : > { %v5263_v2 = vpop.f32.mrb[32].mxu1 }
 0x41a   : > { %3253 = vst.msk [vmem:[%s7655_s16 + $0x108] sm:$0xff] %vm339_vm0, %v5263_v2  ;;  %v7829_v61 = vsub.f32 %v5263_v2, %v5491_v32  ;;  %v3061_v35 = vpop.f32.mrb[33].mxu1  ;;  %v5501_v2 = vld [vmem:[%s5803_s6 + $0x158] sm:$0xff] }
 0x41b   : > { %3252 = vst.msk [vmem:[%s7655_s16 + $0x100] sm:$0xff] %vm339_vm0, %v3061_v35  ;;  %v7834_v9 = vsub.f32 %v3061_v35, %v5492_v11  ;;  %v5502_v11 = vld [vmem:[%s5803_s6 + $0x150] sm:$0xff] }
 0x41d   : > { %v5266_v31 = vpop.f32.mrb[34].mxu1 }
 0x41e   : > { %3255 = vst.msk [vmem:[%s7655_s16 + $0x118] sm:$0xff] %vm339_vm0, %v5266_v31  ;;  %v7839_v0 = vsub.f32 %v5266_v31, %v5493_v14  ;;  %v3071_v19 = vpop.f32.mrb[35].mxu1 }
 0x41f   : > { %3254 = vst.msk [vmem:[%s7655_s16 + $0x110] sm:$0xff] %vm339_vm0, %v3071_v19  ;;  %v7844_v24 = vsub.f32 %v3071_v19, %v5494_v43  ;;  %v5503_v19 = vld [vmem:[%s5803_s6 + $0x168] sm:$0xff] }
 0x421   : > { %v5269_v36 = vpop.f32.mrb[36].mxu1 }
 0x422   : > { %3257 = vst.msk [vmem:[%s7655_s16 + $0x128] sm:$0xff] %vm339_vm0, %v5269_v36  ;;  %v7849_v54 = vsub.f32 %v5269_v36, %v5495_v23  ;;  %v3081_v21 = vpop.f32.mrb[37].mxu1  ;;  %v5504_v23 = vld [vmem:[%s5803_s6 + $0x160] sm:$0xff] }
 0x423   : > { %3256 = vst.msk [vmem:[%s7655_s16 + $0x120] sm:$0xff] %vm339_vm0, %v3081_v21  ;;  %v7854_v42 = vsub.f32 %v3081_v21, %v5496_v13 }
 0x425   : > { %v5272_v47 = vpop.f32.mrb[38].mxu1 }
 0x426   : > { %3259 = vst.msk [vmem:[%s7655_s16 + $0x138] sm:$0xff] %vm339_vm0, %v5272_v47  ;;  %v7859_v45 = vsub.f32 %v5272_v47, %v5497_v6  ;;  %v3091_v60 = vpop.f32.mrb[39].mxu1  ;;  %v5505_v47 = vld [vmem:[%s5803_s6 + $0x178] sm:$0xff] }
 0x427   : > { %3258 = vst.msk [vmem:[%s7655_s16 + $0x130] sm:$0xff] %vm339_vm0, %v3091_v60  ;;  %v7864_v41 = vsub.f32 %v3091_v60, %v5498_v49  ;;  %v5506_v49 = vld [vmem:[%s5803_s6 + $0x170] sm:$0xff] }
 0x429   : > { %v5275_v4 = vpop.f32.mrb[40].mxu1 }
 0x42a   : > { %3261 = vst.msk [vmem:[%s7655_s16 + $0x148] sm:$0xff] %vm339_vm0, %v5275_v4  ;;  %v7869_v51 = vsub.f32 %v5275_v4, %v5499_v33  ;;  %v3101_v8 = vpop.f32.mrb[41].mxu1 }
 0x42b   : > { %3260 = vst.msk [vmem:[%s7655_s16 + $0x140] sm:$0xff] %vm339_vm0, %v3101_v8  ;;  %v7874_v48 = vsub.f32 %v3101_v8, %v5500_v22  ;;  %v5507_v8 = vld [vmem:[%s5803_s6 + $0x188] sm:$0xff] }
 0x42d   : > { %v5278_v59 = vpop.f32.mrb[42].mxu1 }
 0x42e   : > { %3263 = vst.msk [vmem:[%s7655_s16 + $0x158] sm:$0xff] %vm339_vm0, %v5278_v59  ;;  %v7879_v32 = vsub.f32 %v5278_v59, %v5501_v2  ;;  %v3111_v35 = vpop.f32.mrb[43].mxu1  ;;  %v5508_v2 = vld [vmem:[%s5803_s6 + $0x180] sm:$0xff] }
 0x42f   : > { %3262 = vst.msk [vmem:[%s7655_s16 + $0x150] sm:$0xff] %vm339_vm0, %v3111_v35  ;;  %v7884_v31 = vsub.f32 %v3111_v35, %v5502_v11 }
 0x431   : > { %v5281_v14 = vpop.f32.mrb[44].mxu1 }
 0x432   : > { %3265 = vst.msk [vmem:[%s7655_s16 + $0x168] sm:$0xff] %vm339_vm0, %v5281_v14  ;;  %v7889_v43 = vsub.f32 %v5281_v14, %v5503_v19  ;;  %v3121_v36 = vpop.f32.mrb[45].mxu1  ;;  %v5509_v14 = vld [vmem:[%s5803_s6 + $0x198] sm:$0xff] }
 0x433   : > { %3264 = vst.msk [vmem:[%s7655_s16 + $0x160] sm:$0xff] %vm339_vm0, %v3121_v36  ;;  %v7894_v21 = vsub.f32 %v3121_v36, %v5504_v23  ;;  %v5510_v23 = vld [vmem:[%s5803_s6 + $0x190] sm:$0xff] }
 0x435   : > { %v5284_v13 = vpop.f32.mrb[46].mxu1 }
 0x436   : > { %3267 = vst.msk [vmem:[%s7655_s16 + $0x178] sm:$0xff] %vm339_vm0, %v5284_v13  ;;  %v7899_v6 = vsub.f32 %v5284_v13, %v5505_v47  ;;  %v3131_v60 = vpop.f32.mrb[47].mxu1 }
 0x437   : > { %3266 = vst.msk [vmem:[%s7655_s16 + $0x170] sm:$0xff] %vm339_vm0, %v3131_v60  ;;  %v7904_v4 = vsub.f32 %v3131_v60, %v5506_v49  ;;  %v5511_v60 = vld [vmem:[%s5803_s6 + $0x1a8] sm:$0xff] }
 0x438   : > { %9100 = vst [vmem:[#allocation46_spill] sm:$0xff] %v7899_v6 }
 0x439   : > { %9101 = vst [vmem:[#allocation47_spill] sm:$0xff] %v7904_v4  ;;  %v5287_v33 = vpop.f32.mrb[48].mxu1 }
 0x43a   : > { %3269 = vst.msk [vmem:[%s7655_s16 + $0x188] sm:$0xff] %vm339_vm0, %v5287_v33  ;;  %v7909_v22 = vsub.f32 %v5287_v33, %v5507_v8  ;;  %v3141_v59 = vpop.f32.mrb[49].mxu1  ;;  %v5512_v8 = vld [vmem:[%s5803_s6 + $0x1a0] sm:$0xff] }
 0x43b   : > { %3268 = vst.msk [vmem:[%s7655_s16 + $0x180] sm:$0xff] %vm339_vm0, %v3141_v59  ;;  %v7914_v35 = vsub.f32 %v3141_v59, %v5508_v2 }
 0x43c   : > { %9102 = vst [vmem:[#allocation62_spill] sm:$0xff] %v7909_v22 }
 0x43d   : > { %9103 = vst [vmem:[#allocation48_spill] sm:$0xff] %v7914_v35  ;;  %v5290_v11 = vpop.f32.mrb[50].mxu1 }
 0x43e   : > { %3271 = vst.msk [vmem:[%s7655_s16 + $0x198] sm:$0xff] %vm339_vm0, %v5290_v11  ;;  %v7919_v19 = vsub.f32 %v5290_v11, %v5509_v14  ;;  %v3151_v36 = vpop.f32.mrb[51].mxu1  ;;  %v5513_v11 = vld [vmem:[%s5803_s6 + $0x1b8] sm:$0xff] }
 0x43f   : > { %3270 = vst.msk [vmem:[%s7655_s16 + $0x190] sm:$0xff] %vm339_vm0, %v3151_v36  ;;  %v7924_v13 = vsub.f32 %v3151_v36, %v5510_v23  ;;  %v5514_v23 = vld [vmem:[%s5803_s6 + $0x1b0] sm:$0xff] }
 0x440   : > { %9104 = vst [vmem:[#allocation64_spill] sm:$0xff] %v7919_v19 }
 0x441   : > { %9105 = vst [vmem:[#allocation49_spill] sm:$0xff] %v7924_v13  ;;  %v5293_v47 = vpop.f32.mrb[52].mxu1 }
 0x442   : > { %3273 = vst.msk [vmem:[%s7655_s16 + $0x1a8] sm:$0xff] %vm339_vm0, %v5293_v47  ;;  %v7929_v49 = vsub.f32 %v5293_v47, %v5511_v60  ;;  %v3161_v33 = vpop.f32.mrb[53].mxu1 }
 0x443   : > { %3272 = vst.msk [vmem:[%s7655_s16 + $0x1a0] sm:$0xff] %vm339_vm0, %v3161_v33  ;;  %v7934_v59 = vsub.f32 %v3161_v33, %v5512_v8  ;;  %v5515_v33 = vld [vmem:[%s5803_s6 + $0x1c8] sm:$0xff] }
 0x444   : > { %9106 = vst [vmem:[#allocation65_spill] sm:$0xff] %v7929_v49  ;;  %v5521_v49 = vld [vmem:[%s5803_s6 + $0x1f8] sm:$0xff] }
 0x445   : > { %9107 = vst [vmem:[#allocation50_spill] sm:$0xff] %v7934_v59  ;;  %v5296_v2 = vpop.f32.mrb[54].mxu1 }
 0x446   : > { %3275 = vst.msk [vmem:[%s7655_s16 + $0x1b8] sm:$0xff] %vm339_vm0, %v5296_v2  ;;  %v7939_v14 = vsub.f32 %v5296_v2, %v5513_v11  ;;  %v3171_v36 = vpop.f32.mrb[55].mxu1  ;;  %v5516_v2 = vld [vmem:[%s5803_s6 + $0x1c0] sm:$0xff] }
 0x447   : > { %3274 = vst.msk [vmem:[%s7655_s16 + $0x1b0] sm:$0xff] %vm339_vm0, %v3171_v36  ;;  %v7944_v47 = vsub.f32 %v3171_v36, %v5514_v23  ;;  %v5517_v36 = vld [vmem:[%s5803_s6 + $0x1d8] sm:$0xff] }
 0x448   : > { %9108 = vst [vmem:[#allocation51_spill] sm:$0xff] %v7939_v14 }
 0x449   : > { %9109 = vst [vmem:[#allocation9_spill] sm:$0xff] %v7944_v47  ;;  %v5299_v60 = vpop.f32.mrb[56].mxu1 }
 0x44a   : > { %3277 = vst.msk [vmem:[%s7655_s16 + $0x1c8] sm:$0xff] %vm339_vm0, %v5299_v60  ;;  %v7949_v8 = vsub.f32 %v5299_v60, %v5515_v33  ;;  %v3181_v16 = vpop.f32.mrb[57].mxu1  ;;  %v5518_v60 = vld [vmem:[%s5803_s6 + $0x1d0] sm:$0xff] }
 0x44b   : > { %3276 = vst.msk [vmem:[%s7655_s16 + $0x1c0] sm:$0xff] %vm339_vm0, %v3181_v16  ;;  %v7954_v11 = vsub.f32 %v3181_v16, %v5516_v2  ;;  %v5519_v16 = vld [vmem:[%s5803_s6 + $0x1e8] sm:$0xff] }
 0x44c   : > { %9110 = vst [vmem:[#allocation52_spill] sm:$0xff] %v7949_v8 }
 0x44d   : > { %9111 = vst [vmem:[#allocation14_spill] sm:$0xff] %v7954_v11  ;;  %v5302_v14 = vpop.f32.mrb[58].mxu1 }
 0x44e   : > { %3279 = vst.msk [vmem:[%s7655_s16 + $0x1d8] sm:$0xff] %vm339_vm0, %v5302_v14  ;;  %v7959_v23 = vsub.f32 %v5302_v14, %v5517_v36  ;;  %v3191_v47 = vpop.f32.mrb[59].mxu1  ;;  %v5520_v14 = vld [vmem:[%s5803_s6 + $0x1e0] sm:$0xff] }
 0x44f   : > { %3278 = vst.msk [vmem:[%s7655_s16 + $0x1d0] sm:$0xff] %vm339_vm0, %v3191_v47  ;;  %v7964_v33 = vsub.f32 %v3191_v47, %v5518_v60  ;;  %v5522_v60 = vld [vmem:[%s5803_s6 + $0x1f0] sm:$0xff] }
 0x450   : > { %9112 = vst [vmem:[#allocation53_spill] sm:$0xff] %v7959_v23 }
 0x451   : > { %9113 = vst [vmem:[#allocation10_spill] sm:$0xff] %v7964_v33  ;;  %v5305_v8 = vpop.f32.mrb[60].mxu1 }
 0x452   : > { %3281 = vst.msk [vmem:[%s7655_s16 + $0x1e8] sm:$0xff] %vm339_vm0, %v5305_v8  ;;  %v7969_v2 = vsub.f32 %v5305_v8, %v5519_v16  ;;  %v3201_v11 = vpop.f32.mrb[61].mxu1  ;;  %v3352_v8 = vmul.f32 (!%p4913_p11), %v7665_v12, %v7665_v12  ;;  %v3356_v16 = vmul.f32 (!%p4913_p11), %v7685_v57, %v7685_v57  ;;  %v3357_v12 = vmul.f32 (!%p4913_p11), %v7680_v55, %v7680_v55 }
 0x453   : > { %3280 = vst.msk [vmem:[%s7655_s16 + $0x1e0] sm:$0xff] %vm339_vm0, %v3201_v11  ;;  %v7974_v36 = vsub.f32 %v3201_v11, %v5520_v14  ;;  %v3353_v11 = vmul.f32 (!%p4913_p11), %v7660_v18, %v7660_v18 }
 0x454   : > { %9114 = vst [vmem:[#allocation54_spill] sm:$0xff] %v7969_v2  ;;  %v3416_v14 = vsel (!%p4913_p11), %vm339_vm0, %v3352_v8, 0.0  ;;  %v3359_v8 = vmul.f32 (!%p4913_p11), %v7690_v17, %v7690_v17 }
 0x455   : > { %9115 = vst [vmem:[#allocation55_spill] sm:$0xff] %v7974_v36 }
 0x457   : > { %3351 = sbr.rel (%p4913_p11) target bundleno = 1255 (0x4e7), region = 36 }
 0x459   : > { %v5308_v23 = vpop.f32.mrb[62].mxu1 }
 0x45a   : > { %3283 = vst.msk [vmem:[%s7655_s16 + $0x1f8] sm:$0xff] %vm339_vm0, %v5308_v23  ;;  %v7979_v59 = vsub.f32 %v5308_v23, %v5521_v49  ;;  %v3211_v47 = vpop.f32.mrb[63].mxu1  ;;  %v3354_v49 = vmul.f32 (!%p4913_p11), %v7675_v46, %v7675_v46  ;;  %v3355_v23 = vmul.f32 (!%p4913_p11), %v7670_v28, %v7670_v28  ;;  %v3358_v46 = vmul.f32 (!%p4913_p11), %v7695_v34, %v7695_v34 }
 0x45b   : > { %3282 = vst.msk [vmem:[%s7655_s16 + $0x1f0] sm:$0xff] %vm339_vm0, %v3211_v47  ;;  %v7984_v33 = vsub.f32 %v3211_v47, %v5522_v60  ;;  %v3417_v47 = vsel (!%p4913_p11), %vm339_vm0, %v3353_v11, 0.0  ;;  %v3423_v28 = vsel (!%p4913_p11), %vm339_vm0, %v3356_v16, 0.0  ;;  %v3425_v11 = vsel (!%p4913_p11), %vm339_vm0, %v3357_v12, 0.0 }
 0x45c   : > { %9116 = vst [vmem:[#allocation11_spill] sm:$0xff] %v7979_v59  ;;  %v3419_v60 = vsel (!%p4913_p11), %vm339_vm0, %v3354_v49, 0.0  ;;  %v3418_v59 = vadd.f32 (!%p4913_p11), %v3417_v47, %v3416_v14  ;;  %v3421_v18 = vsel (!%p4913_p11), %vm339_vm0, %v3355_v23, 0.0  ;;  %v3360_v49 = vmul.f32 (!%p4913_p11), %v7708_v50, %v7708_v50 }
 0x45d   : > { %9117 = vst [vmem:[#allocation56_spill] sm:$0xff] %v7984_v33  ;;  %v3427_v14 = vsel (!%p4913_p11), %vm339_vm0, %v3358_v46, 0.0  ;;  %v3429_v23 = vsel (!%p4913_p11), %vm339_vm0, %v3359_v8, 0.0  ;;  %v3363_v12 = vmul.f32 (!%p4913_p11), %v7714_v25, %v7714_v25  ;;  %v3364_v46 = vmul.f32 (!%p4913_p11), %v7730_v27, %v7730_v27 }
 0x45e   : > { %v3420_v33 = vadd.f32 %v3419_v60, %v3418_v59  ;;  %v3361_v59 = vmul.f32 %v7703_v20, %v7703_v20  ;;  %v3365_v8 = vmul.f32 %v7724_v52, %v7724_v52 }
 0x460   : > { %v3422_v2 = vadd.f32 %v3421_v18, %v3420_v33  ;;  %v3362_v18 = vmul.f32 %v7719_v37, %v7719_v37  ;;  %v3431_v33 = vsel %vm339_vm0, %v3360_v49, 0.0  ;;  %v3366_v49 = vmul.f32 %v7741_v26, %v7741_v26 }
 0x462   : > { %v3424_v57 = vadd.f32 %v3423_v28, %v3422_v2  ;;  %v3433_v28 = vsel %vm339_vm0, %v3361_v59, 0.0  ;;  %v3367_v59 = vmul.f32 %v7736_v29, %v7736_v29 }
 0x464   : > { %v3426_v47 = vadd.f32 %v3425_v11, %v3424_v57  ;;  %v3435_v57 = vsel %vm339_vm0, %v3362_v18, 0.0  ;;  %v3368_v18 = vmul.f32 %v7754_v40, %v7754_v40 }
 0x466   : > { %v3428_v60 = vadd.f32 %v3427_v14, %v3426_v47  ;;  %v3437_v14 = vsel %vm339_vm0, %v3363_v12, 0.0  ;;  %v3369_v12 = vmul.f32 %v7749_v3, %v7749_v3 }
 0x468   : > { %v3430_v16 = vadd.f32 %v3429_v23, %v3428_v60  ;;  %v3439_v23 = vsel %vm339_vm0, %v3364_v46, 0.0  ;;  %v3370_v46 = vmul.f32 %v7764_v38, %v7764_v38 }
 0x46a   : > { %v3432_v2 = vadd.f32 %v3431_v33, %v3430_v16  ;;  %v3441_v33 = vsel %vm339_vm0, %v3365_v8, 0.0  ;;  %v3371_v8 = vmul.f32 %v7759_v44, %v7759_v44 }
 0x46c   : > { %v3434_v11 = vadd.f32 %v3433_v28, %v3432_v2  ;;  %v3443_v28 = vsel %vm339_vm0, %v3366_v49, 0.0  ;;  %v3372_v49 = vmul.f32 %v7774_v58, %v7774_v58 }
 0x46e   : > { %v3436_v47 = vadd.f32 %v3435_v57, %v3434_v11  ;;  %v3445_v57 = vsel %vm339_vm0, %v3367_v59, 0.0  ;;  %v3373_v59 = vmul.f32 %v7769_v15, %v7769_v15 }
 0x470   : > { %v3438_v60 = vadd.f32 %v3437_v14, %v3436_v47  ;;  %v3447_v14 = vsel %vm339_vm0, %v3368_v18, 0.0  ;;  %v3374_v18 = vmul.f32 %v7784_v10, %v7784_v10 }
 0x472   : > { %v3440_v16 = vadd.f32 %v3439_v23, %v3438_v60  ;;  %v3449_v23 = vsel %vm339_vm0, %v3369_v12, 0.0  ;;  %v3375_v12 = vmul.f32 %v7779_v5, %v7779_v5 }
 0x474   : > { %v3442_v2 = vadd.f32 %v3441_v33, %v3440_v16  ;;  %v3451_v33 = vsel %vm339_vm0, %v3370_v46, 0.0  ;;  %v3376_v46 = vmul.f32 %v7794_v30, %v7794_v30 }
 0x476   : > { %v3444_v11 = vadd.f32 %v3443_v28, %v3442_v2  ;;  %v3453_v28 = vsel %vm339_vm0, %v3371_v8, 0.0  ;;  %v3377_v8 = vmul.f32 %v7789_v1, %v7789_v1 }
 0x478   : > { %v3446_v47 = vadd.f32 %v3445_v57, %v3444_v11  ;;  %v3455_v57 = vsel %vm339_vm0, %v3372_v49, 0.0  ;;  %v3378_v49 = vmul.f32 %v7804_v62, %v7804_v62 }
 0x47a   : > { %v3448_v60 = vadd.f32 %v3447_v14, %v3446_v47  ;;  %v3457_v14 = vsel %vm339_vm0, %v3373_v59, 0.0  ;;  %v3379_v59 = vmul.f32 %v7799_v63, %v7799_v63 }
 0x47c   : > { %v3450_v16 = vadd.f32 %v3449_v23, %v3448_v60  ;;  %v3459_v23 = vsel %vm339_vm0, %v3374_v18, 0.0  ;;  %v3380_v18 = vmul.f32 %v7814_v56, %v7814_v56 }
 0x47e   : > { %v3452_v2 = vadd.f32 %v3451_v33, %v3450_v16  ;;  %v3461_v33 = vsel %vm339_vm0, %v3375_v12, 0.0  ;;  %v3381_v12 = vmul.f32 %v7809_v39, %v7809_v39 }
 0x480   : > { %v3454_v11 = vadd.f32 %v3453_v28, %v3452_v2  ;;  %v3463_v28 = vsel %vm339_vm0, %v3376_v46, 0.0  ;;  %v3382_v46 = vmul.f32 %v7824_v53, %v7824_v53 }
 0x482   : > { %v3456_v47 = vadd.f32 %v3455_v57, %v3454_v11  ;;  %v3465_v57 = vsel %vm339_vm0, %v3377_v8, 0.0  ;;  %v3383_v8 = vmul.f32 %v7819_v7, %v7819_v7 }
 0x484   : > { %v3458_v60 = vadd.f32 %v3457_v14, %v3456_v47  ;;  %v3467_v14 = vsel %vm339_vm0, %v3378_v49, 0.0  ;;  %v3384_v49 = vmul.f32 %v7834_v9, %v7834_v9 }
 0x486   : > { %v3460_v16 = vadd.f32 %v3459_v23, %v3458_v60  ;;  %v3469_v23 = vsel %vm339_vm0, %v3379_v59, 0.0  ;;  %v3385_v59 = vmul.f32 %v7829_v61, %v7829_v61 }
 0x488   : > { %v3462_v2 = vadd.f32 %v3461_v33, %v3460_v16  ;;  %v3471_v33 = vsel %vm339_vm0, %v3380_v18, 0.0  ;;  %v3386_v18 = vmul.f32 %v7844_v24, %v7844_v24 }
 0x48a   : > { %v3464_v11 = vadd.f32 %v3463_v28, %v3462_v2  ;;  %v3473_v28 = vsel %vm339_vm0, %v3381_v12, 0.0  ;;  %v3387_v12 = vmul.f32 %v7839_v0, %v7839_v0 }
 0x48c   : > { %v3466_v47 = vadd.f32 %v3465_v57, %v3464_v11  ;;  %v3475_v57 = vsel %vm339_vm0, %v3382_v46, 0.0  ;;  %v3388_v46 = vmul.f32 %v7854_v42, %v7854_v42 }
 0x48e   : > { %v3468_v60 = vadd.f32 %v3467_v14, %v3466_v47  ;;  %v3477_v14 = vsel %vm339_vm0, %v3383_v8, 0.0  ;;  %v3389_v8 = vmul.f32 %v7849_v54, %v7849_v54 }
 0x490   : > { %v3470_v16 = vadd.f32 %v3469_v23, %v3468_v60  ;;  %v3479_v23 = vsel %vm339_vm0, %v3384_v49, 0.0  ;;  %v3390_v49 = vmul.f32 %v7864_v41, %v7864_v41 }
 0x492   : > { %v3472_v2 = vadd.f32 %v3471_v33, %v3470_v16  ;;  %v3481_v33 = vsel %vm339_vm0, %v3385_v59, 0.0  ;;  %v3391_v59 = vmul.f32 %v7859_v45, %v7859_v45 }
 0x494   : > { %v3474_v11 = vadd.f32 %v3473_v28, %v3472_v2  ;;  %v3483_v28 = vsel %vm339_vm0, %v3386_v18, 0.0  ;;  %v3392_v18 = vmul.f32 %v7874_v48, %v7874_v48 }
 0x496   : > { %v3476_v47 = vadd.f32 %v3475_v57, %v3474_v11  ;;  %v3485_v57 = vsel %vm339_vm0, %v3387_v12, 0.0  ;;  %v3393_v12 = vmul.f32 %v7869_v51, %v7869_v51 }
 0x498   : > { %v3478_v60 = vadd.f32 %v3477_v14, %v3476_v47  ;;  %v3487_v14 = vsel %vm339_vm0, %v3388_v46, 0.0  ;;  %v3394_v46 = vmul.f32 %v7884_v31, %v7884_v31 }
 0x49a   : > { %v3480_v16 = vadd.f32 %v3479_v23, %v3478_v60  ;;  %v3489_v23 = vsel %vm339_vm0, %v3389_v8, 0.0  ;;  %v3395_v8 = vmul.f32 %v7879_v32, %v7879_v32 }
 0x49c   : > { %v3482_v2 = vadd.f32 %v3481_v33, %v3480_v16  ;;  %v3491_v33 = vsel %vm339_vm0, %v3390_v49, 0.0  ;;  %v3396_v49 = vmul.f32 %v7894_v21, %v7894_v21 }
 0x49e   : > { %v3484_v11 = vadd.f32 %v3483_v28, %v3482_v2  ;;  %v3493_v28 = vsel %vm339_vm0, %v3391_v59, 0.0  ;;  %v3397_v59 = vmul.f32 %v7889_v43, %v7889_v43 }
 0x4a0   : > { %v3486_v47 = vadd.f32 %v3485_v57, %v3484_v11  ;;  %v3495_v57 = vsel %vm339_vm0, %v3392_v18, 0.0  ;;  %v3398_v18 = vmul.f32 %v7904_v4, %v7904_v4 }
 0x4a2   : > { %v3488_v60 = vadd.f32 %v3487_v14, %v3486_v47  ;;  %v3497_v14 = vsel %vm339_vm0, %v3393_v12, 0.0  ;;  %v3399_v12 = vmul.f32 %v7899_v6, %v7899_v6 }
 0x4a4   : > { %v3490_v16 = vadd.f32 %v3489_v23, %v3488_v60  ;;  %v3499_v23 = vsel %vm339_vm0, %v3394_v46, 0.0  ;;  %v3400_v46 = vmul.f32 %v7914_v35, %v7914_v35 }
 0x4a6   : > { %v3492_v2 = vadd.f32 %v3491_v33, %v3490_v16  ;;  %v3501_v33 = vsel %vm339_vm0, %v3395_v8, 0.0  ;;  %v3401_v8 = vmul.f32 %v7909_v22, %v7909_v22 }
 0x4a8   : > { %v3494_v11 = vadd.f32 %v3493_v28, %v3492_v2  ;;  %v3503_v28 = vsel %vm339_vm0, %v3396_v49, 0.0  ;;  %v3402_v49 = vmul.f32 %v7924_v13, %v7924_v13 }
 0x4aa   : > { %v3496_v47 = vadd.f32 %v3495_v57, %v3494_v11  ;;  %v3505_v57 = vsel %vm339_vm0, %v3397_v59, 0.0  ;;  %v3403_v59 = vmul.f32 %v7919_v19, %v7919_v19 }
 0x4ac   : > { %v3498_v60 = vadd.f32 %v3497_v14, %v3496_v47  ;;  %v3507_v14 = vsel %vm339_vm0, %v3398_v18, 0.0  ;;  %v9118_v18 = vld [vmem:[#allocation50_spill] sm:$0xff] }
 0x4ae   : > { %v3500_v16 = vadd.f32 %v3499_v23, %v3498_v60  ;;  %v3509_v23 = vsel %vm339_vm0, %v3399_v12, 0.0  ;;  %v9119_v12 = vld [vmem:[#allocation65_spill] sm:$0xff] }
 0x4b0   : > { %v3502_v2 = vadd.f32 %v3501_v33, %v3500_v16  ;;  %v3511_v33 = vsel %vm339_vm0, %v3400_v46, 0.0  ;;  %v9120_v46 = vld [vmem:[#allocation9_spill] sm:$0xff] }
 0x4b2   : > { %v3504_v11 = vadd.f32 %v3503_v28, %v3502_v2  ;;  %v3513_v28 = vsel %vm339_vm0, %v3401_v8, 0.0  ;;  %v9121_v8 = vld [vmem:[#allocation51_spill] sm:$0xff] }
 0x4b4   : > { %v3506_v47 = vadd.f32 %v3505_v57, %v3504_v11  ;;  %v3404_v57 = vmul.f32 %v9118_v18, %v9118_v18  ;;  %v3515_v11 = vsel %vm339_vm0, %v3402_v49, 0.0  ;;  %v9122_v49 = vld [vmem:[#allocation14_spill] sm:$0xff] }
 0x4b6   : > { %v3508_v60 = vadd.f32 %v3507_v14, %v3506_v47  ;;  %v3405_v14 = vmul.f32 %v9119_v12, %v9119_v12  ;;  %v3517_v47 = vsel %vm339_vm0, %v3403_v59, 0.0  ;;  %v9123_v59 = vld [vmem:[#allocation52_spill] sm:$0xff] }
 0x4b8   : > { %v3510_v16 = vadd.f32 %v3509_v23, %v3508_v60  ;;  %v3406_v23 = vmul.f32 %v9120_v46, %v9120_v46  ;;  %v3519_v60 = vsel %vm339_vm0, %v3404_v57, 0.0  ;;  %v9124_v57 = vld [vmem:[#allocation10_spill] sm:$0xff] }
 0x4ba   : > { %v3512_v2 = vadd.f32 %v3511_v33, %v3510_v16  ;;  %v3407_v33 = vmul.f32 %v9121_v8, %v9121_v8  ;;  %v3521_v16 = vsel %vm339_vm0, %v3405_v14, 0.0  ;;  %v9125_v14 = vld [vmem:[#allocation53_spill] sm:$0xff] }
 0x4bc   : > { %v3514_v22 = vadd.f32 %v3513_v28, %v3512_v2  ;;  %v3408_v28 = vmul.f32 %v9122_v49, %v9122_v49  ;;  %v3523_v2 = vsel %vm339_vm0, %v3406_v23, 0.0  ;;  %v3412_v23 = vmul.f32 %v7974_v36, %v7974_v36 }
 0x4be   : > { %v3516_v13 = vadd.f32 %v3515_v11, %v3514_v22  ;;  %v3409_v22 = vmul.f32 %v9123_v59, %v9123_v59  ;;  %v3525_v11 = vsel %vm339_vm0, %v3407_v33, 0.0  ;;  %v9126_v33 = vld [vmem:[#allocation54_spill] sm:$0xff] }
 0x4c0   : > { %v3518_v19 = vadd.f32 %v3517_v47, %v3516_v13  ;;  %v3410_v13 = vmul.f32 %v9124_v57, %v9124_v57  ;;  %v3527_v47 = vsel %vm339_vm0, %v3408_v28, 0.0  ;;  %v9127_v28 = vld [vmem:[#allocation56_spill] sm:$0xff] }
 0x4c2   : > { %v3520_v18 = vadd.f32 %v3519_v60, %v3518_v19  ;;  %v3411_v19 = vmul.f32 %v9125_v14, %v9125_v14  ;;  %v3529_v60 = vsel %vm339_vm0, %v3409_v22, 0.0  ;;  %v9128_v22 = vld [vmem:[#allocation11_spill] sm:$0xff] }
 0x4c4   : > { %v3522_v12 = vadd.f32 %v3521_v16, %v3520_v18  ;;  %v3531_v16 = vsel %vm339_vm0, %v3410_v13, 0.0 }
 0x4c6   : > { %v3524_v46 = vadd.f32 %v3523_v2, %v3522_v12  ;;  %v3413_v2 = vmul.f32 %v9126_v33, %v9126_v33  ;;  %v3533_v12 = vsel %vm339_vm0, %v3411_v19, 0.0 }
 0x4c8   : > { %v3526_v8 = vadd.f32 %v3525_v11, %v3524_v46  ;;  %v3414_v11 = vmul.f32 %v9127_v28, %v9127_v28  ;;  %v3535_v46 = vsel %vm339_vm0, %v3412_v23, 0.0 }
 0x4ca   : > { %v3528_v49 = vadd.f32 %v3527_v47, %v3526_v8  ;;  %v3415_v47 = vmul.f32 %v9128_v22, %v9128_v22  ;;  %v3537_v8 = vsel %vm339_vm0, %v3413_v2, 0.0  ;;  %v3539_v14 = vsel %vm339_vm0, %v3414_v11, 0.0 }
 0x4cc   : > { %v3530_v18 = vadd.f32 %v3529_v60, %v3528_v49  ;;  %v3541_v49 = vsel %vm339_vm0, %v3415_v47, 0.0 }
 0x4ce   : > { %v3532_v59 = vadd.f32 %v3531_v16, %v3530_v18 }
 0x4d0   : > { %v3534_v57 = vadd.f32 %v3533_v12, %v3532_v59 }
 0x4d2   : > { %v3536_v13 = vadd.f32 %v3535_v46, %v3534_v57 }
 0x4d4   : > { %v3538_v60 = vadd.f32 %v3537_v8, %v3536_v13 }
 0x4d6   : > { %v3540_v19 = vadd.f32 %v3539_v14, %v3538_v60 }
 0x4d8   : > { %v3542_v16 = vadd.f32 %v3541_v49, %v3540_v19 }
 0x4da   : > { %v3543_v18 = vrot.slane %v3542_v16, 4 }
 0x4dc   : > { %v3544_v33 = vadd.f32 %v3543_v18, %v3542_v16 }
 0x4de   : > { %v3545_v28 = vrot.slane %v3544_v33, 2 }
 0x4e0   : > { %v3546_v36 = vadd.f32 %v3545_v28, %v3544_v33 }
 0x4e2   : > { %v3547_v23 = vrot.slane %v3546_v36, 1 }
 0x4e4   : > { %v3548_v12 = vadd.f32 %v3547_v23, %v3546_v36 }
 0x4e6   : > { %3550 = vst.msk [vmem:[%s7987_s25] sm:$0x1] %vm3549_vm13, %v3548_v12 }
 0x4e7 PF: > { %p4914_p12 = scmp.ne.s32.totalorder %s5738_s22, 1 }
 0x4e8   : > { %s4915_s26 = sshll.u32 (!%p4914_p12), %s5738_s22, 9  ;;  %v9129_v2 = vld [vmem:[#allocation45_spill] sm:$0xff] (!%p4914_p12)  ;;  %v9130_v18 = vld [vmem:[#allocation42_spill] sm:$0xff] (!%p4914_p12)  ;;  %v9132_v12 = vld [vmem:[#allocation59_spill] sm:$0xff] (!%p4914_p12) }
 0x4e9   : > { %3554 = sbr.rel (%p4914_p12) target bundleno = 1407 (0x57f), region = 40  ;;  %v3557_v59 = vadd.s32 (!%p4914_p12), 8, %v9129_v2  ;;  %v3558_v11 = vadd.s32 (!%p4914_p12), 16, %v9129_v2  ;;  %v8187_v46 = vstv (!%p4914_p12), %s4915_s26  ;;  %v3559_v57 = vadd.s32 (!%p4914_p12), 24, %v9129_v2  ;;  %v9131_v28 = vld [vmem:[#allocation41_spill] sm:$0xff] (!%p4914_p12) }
 0x4ea   : > { %v3560_v22 = vadd.s32 (!%p4914_p12), 32, %v9129_v2  ;;  %v3622_v36 = vadd.s32 (!%p4914_p12), %v8187_v46, %v9129_v2  ;;  %v3561_v13 = vadd.s32 (!%p4914_p12), 40, %v9129_v2  ;;  %v3562_v60 = vadd.s32 (!%p4914_p12), 48, %v9129_v2 }
 0x4eb   : > { %v3623_v47 = vadd.s32 (!%p4914_p12), %v8187_v46, %v3557_v59  ;;  %v3624_v8 = vadd.s32 (!%p4914_p12), %v8187_v46, %v3558_v11  ;;  %v3625_v14 = vadd.s32 (!%p4914_p12), %v8187_v46, %v3559_v57  ;;  %v3563_v19 = vadd.s32 (!%p4914_p12), 56, %v9129_v2 }
 0x4ec   : > { %v3626_v49 = vadd.s32 (!%p4914_p12), %v8187_v46, %v3560_v22  ;;  %vm3686_vm14 = vcmp.lt.s32.totalorder (!%p4914_p12), %v3622_v36, 640  ;;  %v3627_v16 = vadd.s32 (!%p4914_p12), %v8187_v46, %v3561_v13  ;;  %v3564_v11 = vadd.s32 (!%p4914_p12), 64, %v9129_v2 }
 0x4ed   : > { %vm3687_vm15 = vcmp.lt.s32.totalorder (!%p4914_p12), %v3623_v47, 640  ;;  %vm3688_vm1 = vcmp.lt.s32.totalorder (!%p4914_p12), %v3624_v8, 640  ;;  %vm3689_vm3 = vcmp.lt.s32.totalorder (!%p4914_p12), %v3625_v14, 640  ;;  %v3878_v33 = vsel (!%p4914_p12), %vm3686_vm14, %v9130_v18, 0.0  ;;  %v9133_v47 = vld [vmem:[#allocation43_spill] sm:$0xff] (!%p4914_p12)  ;;  %v9134_v18 = vld [vmem:[#allocation44_spill] sm:$0xff] (!%p4914_p12) }
 0x4ee   : > { %v3879_v23 = vsel (!%p4914_p12), %vm3687_vm15, %v9131_v28, 0.0  ;;  %v3880_v59 = vsel (!%p4914_p12), %vm3688_vm1, %v9132_v12, 0.0  ;;  %v3628_v57 = vadd.s32 (!%p4914_p12), %v8187_v46, %v3562_v60  ;;  %vm3690_vm4 = vcmp.lt.s32.totalorder (!%p4914_p12), %v3626_v49, 640 }
 0x4ef   : > { %v3565_v22 = vadd.s32 (!%p4914_p12), 72, %v9129_v2  ;;  %v3629_v36 = vadd.s32 (!%p4914_p12), %v8187_v46, %v3563_v19  ;;  %v3881_v8 = vsel (!%p4914_p12), %vm3689_vm3, %v9133_v47, 0.0  ;;  %vm3691_vm5 = vcmp.lt.s32.totalorder (!%p4914_p12), %v3627_v16, 640 }
 0x4f0   : > { %v3942_v13 = vmul.f32 %v3878_v33, %v3878_v33  ;;  %v3943_v14 = vmul.f32 %v3879_v23, %v3879_v23  ;;  %v3944_v35 = vmul.f32 %v3880_v59, %v3880_v59  ;;  %v3882_v6 = vsel %vm3690_vm4, %v9134_v18, 0.0 }
 0x4f1   : > { %v3566_v28 = vadd.s32 80, %v9129_v2  ;;  %v3630_v12 = vadd.s32 %v8187_v46, %v3564_v11  ;;  %vm3692_vm6 = vcmp.lt.s32.totalorder %v3628_v57, 640  ;;  %v3945_v4 = vmul.f32 %v3881_v8, %v3881_v8 }
 0x4f2   : > { %v3567_v60 = vadd.s32 88, %v9129_v2  ;;  %v3631_v49 = vadd.s32 %v8187_v46, %v3565_v22  ;;  %vm3693_vm7 = vcmp.lt.s32.totalorder %v3629_v36, 640  ;;  %v3883_v19 = vsel %vm3691_vm5, %v7680_v55, 0.0 }
 0x4f3   : > { %v3946_v47 = vmul.f32 %v3882_v6, %v3882_v6  ;;  %v4006_v16 = vsel %vm339_vm0, %v3942_v13, 0.0  ;;  %v4007_v33 = vsel %vm339_vm0, %v3943_v14, 0.0  ;;  %v4009_v23 = vsel %vm339_vm0, %v3944_v35, 0.0 }
 0x4f4   : > { %v3568_v59 = vadd.s32 96, %v9129_v2  ;;  %v3884_v11 = vsel %vm3692_vm6, %v7695_v34, 0.0  ;;  %v4008_v57 = vadd.f32 %v4007_v33, %v4006_v16  ;;  %v3632_v8 = vadd.s32 %v8187_v46, %v3566_v28 }
 0x4f5   : > { %vm3694_vm8 = vcmp.lt.s32.totalorder %v3630_v12, 640  ;;  %v3947_v18 = vmul.f32 %v3883_v19, %v3883_v19  ;;  %v4011_v22 = vsel %vm339_vm0, %v3945_v4, 0.0  ;;  %v3569_v55 = vadd.s32 104, %v9129_v2 }
 0x4f6   : > { %v3885_v6 = vsel %vm3693_vm7, %v7690_v17, 0.0  ;;  %v4010_v36 = vadd.f32 %v4009_v23, %v4008_v57  ;;  %v3633_v13 = vadd.s32 %v8187_v46, %v3567_v60  ;;  %vm3695_vm9 = vcmp.lt.s32.totalorder %v3631_v49, 640 }
 0x4f7   : > { %v3948_v35 = vmul.f32 %v3884_v11, %v3884_v11  ;;  %v4013_v14 = vsel %vm339_vm0, %v3946_v47, 0.0  ;;  %v3570_v34 = vadd.s32 112, %v9129_v2  ;;  %v3886_v16 = vsel %vm3694_vm8, %v7708_v50, 0.0 }
 0x4f8   : > { %v4012_v28 = vadd.f32 %v4011_v22, %v4010_v36  ;;  %v3634_v12 = vadd.s32 %v8187_v46, %v3568_v59  ;;  %vm3696_vm10 = vcmp.lt.s32.totalorder %v3632_v8, 640  ;;  %v3949_v4 = vmul.f32 %v3885_v6, %v3885_v6 }
 0x4f9   : > { %v4015_v19 = vsel %vm339_vm0, %v3947_v18, 0.0  ;;  %v3571_v17 = vadd.s32 120, %v9129_v2  ;;  %v3887_v33 = vsel %vm3695_vm9, %v7703_v20, 0.0  ;;  %v3635_v49 = vadd.s32 %v8187_v46, %v3569_v55 }
 0x4fa   : > { %v4014_v60 = vadd.f32 %v4013_v14, %v4012_v28  ;;  %vm3697_vm11 = vcmp.lt.s32.totalorder %v3633_v13, 640  ;;  %v3950_v47 = vmul.f32 %v3886_v16, %v3886_v16  ;;  %v4017_v23 = vsel %vm339_vm0, %v3948_v35, 0.0 }
 0x4fb   : > { %v3572_v50 = vadd.s32 128, %v9129_v2  ;;  %v3888_v11 = vsel %vm3696_vm10, %v7719_v37, 0.0  ;;  %v3636_v57 = vadd.s32 %v8187_v46, %v3570_v34  ;;  %vm3698_vm12 = vcmp.lt.s32.totalorder %v3634_v12, 640 }
 0x4fc   : > { %v4016_v59 = vadd.f32 %v4015_v19, %v4014_v60  ;;  %v3951_v8 = vmul.f32 %v3887_v33, %v3887_v33  ;;  %v4019_v18 = vsel %vm339_vm0, %v3949_v4, 0.0  ;;  %v3573_v20 = vadd.s32 136, %v9129_v2 }
 0x4fd   : > { %v3889_v22 = vsel %vm3697_vm11, %v7714_v25, 0.0  ;;  %v3637_v6 = vadd.s32 %v8187_v46, %v3571_v17  ;;  %vm3699_vm2 = vcmp.lt.s32.totalorder %v3635_v49, 640  ;;  %v3952_v36 = vmul.f32 %v3888_v11, %v3888_v11 }
 0x4fe   : > { %v4018_v55 = vadd.f32 %v4017_v23, %v4016_v59  ;;  %v4021_v13 = vsel %vm339_vm0, %v3950_v47, 0.0  ;;  %v3574_v37 = vadd.s32 144, %v9129_v2  ;;  %v3890_v35 = vsel %vm3698_vm12, %v7730_v27, 0.0 }
 0x4ff   : > { %v3638_v34 = vadd.s32 %v8187_v46, %v3572_v50  ;;  %vm3700_vm13 = vcmp.lt.s32.totalorder %v3636_v57, 640  ;;  %v3953_v16 = vmul.f32 %v3889_v22, %v3889_v22  ;;  %v4023_v28 = vsel %vm339_vm0, %v3951_v8, 0.0 }
 0x500   : > { %v4020_v14 = vadd.f32 %v4019_v18, %v4018_v55  ;;  %v3575_v25 = vadd.s32 152, %v9129_v2  ;;  %v3891_v12 = vsel %vm3699_vm2, %v7724_v52, 0.0  ;;  %v3639_v19 = vadd.s32 %v8187_v46, %v3573_v20 }
 0x501   : > { %vm3701_vm14 = vcmp.lt.s32.totalorder %v3637_v6, 640  ;;  %v3954_v17 = vmul.f32 %v3890_v35, %v3890_v35  ;;  %v4025_v33 = vsel %vm339_vm0, %v3952_v36, 0.0  ;;  %v3576_v27 = vadd.s32 160, %v9129_v2 }
 0x502   : > { %v4022_v4 = vadd.f32 %v4021_v13, %v4020_v14  ;;  %v3892_v60 = vsel %vm3700_vm13, %v7741_v26, 0.0  ;;  %v3640_v47 = vadd.s32 %v8187_v46, %v3574_v37  ;;  %vm3702_vm15 = vcmp.lt.s32.totalorder %v3638_v34, 640 }
 0x503   : > { %v3955_v23 = vmul.f32 %v3891_v12, %v3891_v12  ;;  %v4027_v50 = vsel %vm339_vm0, %v3953_v16, 0.0  ;;  %v3577_v52 = vadd.s32 168, %v9129_v2  ;;  %v3893_v11 = vsel %vm3701_vm14, %v7736_v29, 0.0 }
 0x504   : > { %v4024_v49 = vadd.f32 %v4023_v28, %v4022_v4  ;;  %v3641_v57 = vadd.s32 %v8187_v46, %v3575_v25  ;;  %vm3703_vm1 = vcmp.lt.s32.totalorder %v3639_v19, 640  ;;  %v3956_v8 = vmul.f32 %v3892_v60, %v3892_v60 }
 0x505   : > { %v4029_v18 = vsel %vm339_vm0, %v3954_v17, 0.0  ;;  %v3578_v26 = vadd.s32 176, %v9129_v2  ;;  %v3894_v20 = vsel %vm3702_vm15, %v7754_v40, 0.0  ;;  %v3642_v55 = vadd.s32 %v8187_v46, %v3576_v27 }
 0x506   : > { %v4026_v59 = vadd.f32 %v4025_v33, %v4024_v49  ;;  %vm3704_vm3 = vcmp.lt.s32.totalorder %v3640_v47, 640  ;;  %v3957_v6 = vmul.f32 %v3893_v11, %v3893_v11  ;;  %v4031_v36 = vsel %vm339_vm0, %v3955_v23, 0.0 }
 0x507   : > { %v3579_v29 = vadd.s32 184, %v9129_v2  ;;  %v3895_v13 = vsel %vm3703_vm1, %v7749_v3, 0.0  ;;  %v3643_v35 = vadd.s32 %v8187_v46, %v3577_v52  ;;  %vm3705_vm4 = vcmp.lt.s32.totalorder %v3641_v57, 640 }
 0x508   : > { %v4028_v22 = vadd.f32 %v4027_v50, %v4026_v59  ;;  %v3958_v14 = vmul.f32 %v3894_v20, %v3894_v20  ;;  %v4033_v34 = vsel %vm339_vm0, %v3956_v8, 0.0  ;;  %v3580_v40 = vadd.s32 192, %v9129_v2 }
 0x509   : > { %v3896_v16 = vsel %vm3704_vm3, %v7764_v38, 0.0  ;;  %v3644_v25 = vadd.s32 %v8187_v46, %v3578_v26  ;;  %vm3706_vm5 = vcmp.lt.s32.totalorder %v3642_v55, 640  ;;  %v3959_v12 = vmul.f32 %v3895_v13, %v3895_v13 }
 0x50a   : > { %v4030_v37 = vadd.f32 %v4029_v18, %v4028_v22  ;;  %v4035_v4 = vsel %vm339_vm0, %v3957_v6, 0.0  ;;  %v3581_v3 = vadd.s32 200, %v9129_v2  ;;  %v3897_v19 = vsel %vm3705_vm4, %v7759_v44, 0.0 }
 0x50b   : > { %v3645_v33 = vadd.s32 %v8187_v46, %v3579_v29  ;;  %vm3707_vm6 = vcmp.lt.s32.totalorder %v3643_v35, 640  ;;  %v3960_v27 = vmul.f32 %v3896_v16, %v3896_v16  ;;  %v4037_v60 = vsel %vm339_vm0, %v3958_v14, 0.0 }
 0x50c   : > { %v4032_v28 = vadd.f32 %v4031_v36, %v4030_v37  ;;  %v3582_v38 = vadd.s32 208, %v9129_v2  ;;  %v3898_v49 = vsel %vm3706_vm5, %v7774_v58, 0.0  ;;  %v3646_v23 = vadd.s32 %v8187_v46, %v3580_v40 }
 0x50d   : > { %vm3708_vm7 = vcmp.lt.s32.totalorder %v3644_v25, 640  ;;  %v3961_v50 = vmul.f32 %v3897_v19, %v3897_v19  ;;  %v4039_v52 = vsel %vm339_vm0, %v3959_v12, 0.0  ;;  %v3583_v44 = vadd.s32 216, %v9129_v2 }
 0x50e   : > { %v4034_v17 = vadd.f32 %v4033_v34, %v4032_v28  ;;  %v3899_v11 = vsel %vm3707_vm6, %v7769_v15, 0.0  ;;  %v3647_v57 = vadd.s32 %v8187_v46, %v3581_v3  ;;  %vm3709_vm8 = vcmp.lt.s32.totalorder %v3645_v33, 640 }
 0x50f   : > { %v3962_v8 = vmul.f32 %v3898_v49, %v3898_v49  ;;  %v4041_v18 = vsel %vm339_vm0, %v3960_v27, 0.0  ;;  %v3584_v58 = vadd.s32 224, %v9129_v2  ;;  %v3900_v26 = vsel %vm3708_vm7, %v7784_v10, 0.0 }
 0x510   : > { %v4036_v47 = vadd.f32 %v4035_v4, %v4034_v17  ;;  %v3648_v22 = vadd.s32 %v8187_v46, %v3582_v38  ;;  %vm3710_vm9 = vcmp.lt.s32.totalorder %v3646_v23, 640  ;;  %v3963_v55 = vmul.f32 %v3899_v11, %v3899_v11 }
 0x511   : > { %v4043_v6 = vsel %vm339_vm0, %v3961_v50, 0.0  ;;  %v3585_v15 = vadd.s32 232, %v9129_v2  ;;  %v3901_v36 = vsel %vm3709_vm8, %v7779_v5, 0.0  ;;  %v3649_v13 = vadd.s32 %v8187_v46, %v3583_v44 }
 0x512   : > { %v4038_v59 = vadd.f32 %v4037_v60, %v4036_v47  ;;  %vm3711_vm10 = vcmp.lt.s32.totalorder %v3647_v57, 640  ;;  %v3964_v37 = vmul.f32 %v3900_v26, %v3900_v26  ;;  %v4045_v35 = vsel %vm339_vm0, %v3962_v8, 0.0 }
 0x513   : > { %v3586_v10 = vadd.s32 240, %v9129_v2  ;;  %v3902_v14 = vsel %vm3710_vm9, %v7794_v30, 0.0  ;;  %v3650_v40 = vadd.s32 %v8187_v46, %v3584_v58  ;;  %vm3712_vm11 = vcmp.lt.s32.totalorder %v3648_v22, 640 }
 0x514   : > { %v4040_v20 = vadd.f32 %v4039_v52, %v4038_v59  ;;  %v3965_v16 = vmul.f32 %v3901_v36, %v3901_v36  ;;  %v4047_v28 = vsel %vm339_vm0, %v3963_v55, 0.0  ;;  %v3587_v5 = vadd.s32 248, %v9129_v2 }
 0x515   : > { %v3903_v25 = vsel %vm3711_vm10, %v7789_v1, 0.0  ;;  %v3651_v4 = vadd.s32 %v8187_v46, %v3585_v15  ;;  %vm3713_vm12 = vcmp.lt.s32.totalorder %v3649_v13, 640  ;;  %v3966_v3 = vmul.f32 %v3902_v14, %v3902_v14 }
 0x516   : > { %v4042_v29 = vadd.f32 %v4041_v18, %v4040_v20  ;;  %v4049_v19 = vsel %vm339_vm0, %v3964_v37, 0.0  ;;  %v3588_v30 = vadd.s32 256, %v9129_v2  ;;  %v3904_v17 = vsel %vm3712_vm11, %v7804_v62, 0.0 }
 0x517   : > { %v3652_v27 = vadd.s32 %v8187_v46, %v3586_v10  ;;  %vm3714_vm2 = vcmp.lt.s32.totalorder %v3650_v40, 640  ;;  %v3967_v60 = vmul.f32 %v3903_v25, %v3903_v25  ;;  %v4051_v38 = vsel %vm339_vm0, %v3965_v16, 0.0 }
 0x518   : > { %v4044_v34 = vadd.f32 %v4043_v6, %v4042_v29  ;;  %v3589_v1 = vadd.s32 264, %v9129_v2  ;;  %v3905_v49 = vsel %vm3713_vm12, %v7799_v63, 0.0  ;;  %v3653_v23 = vadd.s32 %v8187_v46, %v3587_v5 }
 0x519   : > { %vm3715_vm13 = vcmp.lt.s32.totalorder %v3651_v4, 640  ;;  %v3968_v50 = vmul.f32 %v3904_v17, %v3904_v17  ;;  %v4053_v52 = vsel %vm339_vm0, %v3966_v3, 0.0  ;;  %v3590_v62 = vadd.s32 272, %v9129_v2 }
 0x51a   : > { %v4046_v12 = vadd.f32 %v4045_v35, %v4044_v34  ;;  %v3906_v44 = vsel %vm3714_vm2, %v7814_v56, 0.0  ;;  %v3654_v59 = vadd.s32 %v8187_v46, %v3588_v30  ;;  %vm3716_vm14 = vcmp.lt.s32.totalorder %v3652_v27, 640 }
 0x51b   : > { %v3969_v57 = vmul.f32 %v3905_v49, %v3905_v49  ;;  %v4055_v8 = vsel %vm339_vm0, %v3967_v60, 0.0  ;;  %v3591_v63 = vadd.s32 280, %v9129_v2  ;;  %v3907_v18 = vsel %vm3715_vm13, %v7809_v39, 0.0 }
 0x51c   : > { %v4048_v33 = vadd.f32 %v4047_v28, %v4046_v12  ;;  %v3655_v26 = vadd.s32 %v8187_v46, %v3589_v1  ;;  %vm3717_vm15 = vcmp.lt.s32.totalorder %v3653_v23, 640  ;;  %v3970_v20 = vmul.f32 %v3906_v44, %v3906_v44 }
 0x51d   : > { %v4057_v22 = vsel %vm339_vm0, %v3968_v50, 0.0  ;;  %v3592_v56 = vadd.s32 288, %v9129_v2  ;;  %v3908_v55 = vsel %vm3716_vm14, %v7824_v53, 0.0  ;;  %v3656_v15 = vadd.s32 %v8187_v46, %v3590_v62 }
 0x51e   : > { %v4050_v47 = vadd.f32 %v4049_v19, %v4048_v33  ;;  %vm3718_vm1 = vcmp.lt.s32.totalorder %v3654_v59, 640  ;;  %v3971_v36 = vmul.f32 %v3907_v18, %v3907_v18  ;;  %v4059_v29 = vsel %vm339_vm0, %v3969_v57, 0.0 }
 0x51f   : > { %v3593_v39 = vadd.s32 296, %v9129_v2  ;;  %v3909_v13 = vsel %vm3717_vm15, %v7819_v7, 0.0  ;;  %v3657_v35 = vadd.s32 %v8187_v46, %v3591_v63  ;;  %vm3719_vm3 = vcmp.lt.s32.totalorder %v3655_v26, 640 }
 0x520   : > { %v4052_v11 = vadd.f32 %v4051_v38, %v4050_v47  ;;  %v3972_v10 = vmul.f32 %v3908_v55, %v3908_v55  ;;  %v4061_v14 = vsel %vm339_vm0, %v3970_v20, 0.0  ;;  %v3594_v53 = vadd.s32 304, %v9129_v2 }
 0x521   : > { %v3910_v34 = vsel %vm3718_vm1, %v7834_v9, 0.0  ;;  %v3658_v16 = vadd.s32 %v8187_v46, %v3592_v56  ;;  %vm3720_vm4 = vcmp.lt.s32.totalorder %v3656_v15, 640  ;;  %v3973_v28 = vmul.f32 %v3909_v13, %v3909_v13 }
 0x522   : > { %v4054_v58 = vadd.f32 %v4053_v52, %v4052_v11  ;;  %v4063_v5 = vsel %vm339_vm0, %v3971_v36, 0.0  ;;  %v3595_v7 = vadd.s32 312, %v9129_v2  ;;  %v3911_v25 = vsel %vm3719_vm3, %v7829_v61, 0.0 }
 0x523   : > { %v3659_v4 = vadd.s32 %v8187_v46, %v3593_v39  ;;  %vm3721_vm5 = vcmp.lt.s32.totalorder %v3657_v35, 640  ;;  %v3974_v3 = vmul.f32 %v3910_v34, %v3910_v34  ;;  %v4065_v19 = vsel %vm339_vm0, %v3972_v10, 0.0 }
 0x524   : > { %v4056_v6 = vadd.f32 %v4055_v8, %v4054_v58  ;;  %v3596_v9 = vadd.s32 320, %v9129_v2  ;;  %v3912_v30 = vsel %vm3720_vm4, %v7844_v24, 0.0  ;;  %v3660_v33 = vadd.s32 %v8187_v46, %v3594_v53 }
 0x525   : > { %vm3722_vm6 = vcmp.lt.s32.totalorder %v3658_v16, 640  ;;  %v3975_v27 = vmul.f32 %v3911_v25, %v3911_v25  ;;  %v4067_v60 = vsel %vm339_vm0, %v3973_v28, 0.0  ;;  %v3597_v61 = vadd.s32 328, %v9129_v2 }
 0x526   : > { %v4058_v37 = vadd.f32 %v4057_v22, %v4056_v6  ;;  %v3913_v38 = vsel %vm3721_vm5, %v7839_v0, 0.0  ;;  %v3661_v49 = vadd.s32 %v8187_v46, %v3595_v7  ;;  %vm3723_vm7 = vcmp.lt.s32.totalorder %v3659_v4, 640 }
 0x527   : > { %v3976_v47 = vmul.f32 %v3912_v30, %v3912_v30  ;;  %v4069_v23 = vsel %vm339_vm0, %v3974_v3, 0.0  ;;  %v3598_v24 = vadd.s32 336, %v9129_v2  ;;  %v3914_v50 = vsel %vm3722_vm6, %v7854_v42, 0.0 }
 0x528   : > { %v4060_v40 = vadd.f32 %v4059_v29, %v4058_v37  ;;  %v3662_v62 = vadd.s32 %v8187_v46, %v3596_v9  ;;  %vm3724_vm8 = vcmp.lt.s32.totalorder %v3660_v33, 640  ;;  %v3977_v44 = vmul.f32 %v3913_v38, %v3913_v38 }
 0x529   : > { %v4071_v11 = vsel %vm339_vm0, %v3975_v27, 0.0  ;;  %v3599_v0 = vadd.s32 344, %v9129_v2  ;;  %v3915_v59 = vsel %vm3723_vm7, %v7849_v54, 0.0  ;;  %v3663_v8 = vadd.s32 %v8187_v46, %v3597_v61 }
 0x52a   : > { %v4062_v12 = vadd.f32 %v4061_v14, %v4060_v40  ;;  %vm3725_vm9 = vcmp.lt.s32.totalorder %v3661_v49, 640  ;;  %v3978_v63 = vmul.f32 %v3914_v50, %v3914_v50  ;;  %v4073_v18 = vsel %vm339_vm0, %v3976_v47, 0.0 }
 0x52b   : > { %v3600_v42 = vadd.s32 352, %v9129_v2  ;;  %v3916_v58 = vsel %vm3724_vm8, %v7864_v41, 0.0  ;;  %v3664_v20 = vadd.s32 %v8187_v46, %v3598_v24  ;;  %vm3726_vm10 = vcmp.lt.s32.totalorder %v3662_v62, 640  ;;  %v9135_v24 = vld [vmem:[#allocation47_spill] sm:$0xff] }
 0x52c   : > { %v4064_v17 = vadd.f32 %v4063_v5, %v4062_v12  ;;  %v3979_v22 = vmul.f32 %v3915_v59, %v3915_v59  ;;  %v4075_v56 = vsel %vm339_vm0, %v3977_v44, 0.0  ;;  %v3601_v54 = vadd.s32 360, %v9129_v2 }
 0x52d   : > { %v3917_v55 = vsel %vm3725_vm9, %v7859_v45, 0.0  ;;  %v3665_v15 = vadd.s32 %v8187_v46, %v3599_v0  ;;  %vm3727_vm11 = vcmp.lt.s32.totalorder %v3663_v8, 640  ;;  %v3980_v36 = vmul.f32 %v3916_v58, %v3916_v58  ;;  %v9136_v0 = vld [vmem:[#allocation46_spill] sm:$0xff]  ;;  %v9137_v58 = vld [vmem:[#allocation48_spill] sm:$0xff] }
 0x52e   : > { %v4066_v1 = vadd.f32 %v4065_v19, %v4064_v17  ;;  %v4077_v29 = vsel %vm339_vm0, %v3978_v63, 0.0  ;;  %v3602_v41 = vadd.s32 368, %v9129_v2  ;;  %v3918_v39 = vsel %vm3726_vm10, %v7874_v48, 0.0 }
 0x52f   : > { %v3666_v37 = vadd.s32 %v8187_v46, %v3600_v42  ;;  %vm3728_vm12 = vcmp.lt.s32.totalorder %v3664_v20, 640  ;;  %v3981_v35 = vmul.f32 %v3917_v55, %v3917_v55  ;;  %v4079_v10 = vsel %vm339_vm0, %v3979_v22, 0.0 }
 0x530   : > { %v4068_v52 = vadd.f32 %v4067_v60, %v4066_v1  ;;  %v3603_v45 = vadd.s32 376, %v9129_v2  ;;  %v3919_v14 = vsel %vm3727_vm11, %v7869_v51, 0.0  ;;  %v3667_v34 = vadd.s32 %v8187_v46, %v3601_v54 }
 0x531   : > { %vm3729_vm2 = vcmp.lt.s32.totalorder %v3665_v15, 640  ;;  %v3982_v40 = vmul.f32 %v3918_v39, %v3918_v39  ;;  %v4081_v16 = vsel %vm339_vm0, %v3980_v36, 0.0  ;;  %v3604_v48 = vadd.s32 384, %v9129_v2 }
 0x532   : > { %v4070_v57 = vadd.f32 %v4069_v23, %v4068_v52  ;;  %v3920_v28 = vsel %vm3728_vm12, %v7884_v31, 0.0  ;;  %v3668_v7 = vadd.s32 %v8187_v46, %v3602_v41  ;;  %vm3730_vm13 = vcmp.lt.s32.totalorder %v3666_v37, 640  ;;  %v9139_v37 = vld [vmem:[#allocation49_spill] sm:$0xff] }
 0x533   : > { %v3983_v25 = vmul.f32 %v3919_v14, %v3919_v14  ;;  %v4083_v12 = vsel %vm339_vm0, %v3981_v35, 0.0  ;;  %v3605_v51 = vadd.s32 392, %v9129_v2  ;;  %v3921_v4 = vsel %vm3729_vm2, %v7879_v32, 0.0 }
 0x534   : > { %v4072_v26 = vadd.f32 %v4071_v11, %v4070_v57  ;;  %v3669_v19 = vadd.s32 %v8187_v46, %v3603_v45  ;;  %vm3731_vm14 = vcmp.lt.s32.totalorder %v3667_v34, 640  ;;  %v3984_v9 = vmul.f32 %v3920_v28, %v3920_v28 }
 0x535   : > { %v4085_v30 = vsel %vm339_vm0, %v3982_v40, 0.0  ;;  %v3606_v31 = vadd.s32 400, %v9129_v2  ;;  %v3922_v17 = vsel %vm3730_vm13, %v7894_v21, 0.0  ;;  %v3670_v27 = vadd.s32 %v8187_v46, %v3604_v48  ;;  %v9140_v40 = vld [vmem:[#allocation64_spill] sm:$0xff] }
 0x536   : > { %v4074_v6 = vadd.f32 %v4073_v18, %v4072_v26  ;;  %vm3732_vm15 = vcmp.lt.s32.totalorder %v3668_v7, 640  ;;  %v3985_v60 = vmul.f32 %v3921_v4, %v3921_v4  ;;  %v4087_v61 = vsel %vm339_vm0, %v3983_v25, 0.0 }
 0x537   : > { %v3607_v32 = vadd.s32 408, %v9129_v2  ;;  %v3923_v38 = vsel %vm3731_vm14, %v7889_v43, 0.0  ;;  %v3671_v49 = vadd.s32 %v8187_v46, %v3605_v51  ;;  %vm3733_vm1 = vcmp.lt.s32.totalorder %v3669_v19, 640 }
 0x538   : > { %v4076_v13 = vadd.f32 %v4075_v56, %v4074_v6  ;;  %v3986_v47 = vmul.f32 %v3922_v17, %v3922_v17  ;;  %v4089_v23 = vsel %vm339_vm0, %v3984_v9, 0.0  ;;  %v3608_v21 = vadd.s32 416, %v9129_v2  ;;  %v9138_v6 = vld [vmem:[#allocation62_spill] sm:$0xff] }
 0x539   : > { %v3924_v50 = vsel %vm3732_vm15, %v9135_v24, 0.0  ;;  %v3672_v62 = vadd.s32 %v8187_v46, %v3606_v31  ;;  %vm3734_vm3 = vcmp.lt.s32.totalorder %v3670_v27, 640  ;;  %v3987_v44 = vmul.f32 %v3923_v38, %v3923_v38  ;;  %v9142_v31 = vld [vmem:[#allocation65_spill] sm:$0xff] }
 0x53a   : > { %v4078_v53 = vadd.f32 %v4077_v29, %v4076_v13  ;;  %v4091_v11 = vsel %vm339_vm0, %v3985_v60, 0.0  ;;  %v3609_v43 = vadd.s32 424, %v9129_v2  ;;  %v3925_v59 = vsel %vm3733_vm1, %v9136_v0, 0.0  ;;  %v9143_v38 = vld [vmem:[#allocation9_spill] sm:$0xff] }
 0x53b   : > { %v3673_v8 = vadd.s32 %v8187_v46, %v3607_v32  ;;  %vm3735_vm4 = vcmp.lt.s32.totalorder %v3671_v49, 640  ;;  %v3988_v63 = vmul.f32 %v3924_v50, %v3924_v50  ;;  %v4093_v18 = vsel %vm339_vm0, %v3986_v47, 0.0  ;;  %v9144_v50 = vld [vmem:[#allocation51_spill] sm:$0xff] }
 0x53c   : > { %v4080_v5 = vadd.f32 %v4079_v10, %v4078_v53  ;;  %v3610_v42 = vadd.s32 432, %v9129_v2  ;;  %v3926_v26 = vsel %vm3734_vm3, %v9137_v58, 0.0  ;;  %v3674_v22 = vadd.s32 %v8187_v46, %v3608_v21 }
 0x53d   : > { %vm3736_vm5 = vcmp.lt.s32.totalorder %v3672_v62, 640  ;;  %v3989_v56 = vmul.f32 %v3925_v59, %v3925_v59  ;;  %v4095_v54 = vsel %vm339_vm0, %v3987_v44, 0.0  ;;  %v3611_v55 = vadd.s32 440, %v9129_v2  ;;  %v9145_v59 = vld [vmem:[#allocation14_spill] sm:$0xff] }
 0x53e   : > { %v4082_v3 = vadd.f32 %v4081_v16, %v4080_v5  ;;  %v3927_v15 = vsel %vm3735_vm4, %v9138_v6, 0.0  ;;  %v3675_v29 = vadd.s32 %v8187_v46, %v3609_v43  ;;  %vm3737_vm6 = vcmp.lt.s32.totalorder %v3673_v8, 640  ;;  %v9147_v6 = vld [vmem:[#allocation10_spill] sm:$0xff] }
 0x53f   : > { %v3990_v41 = vmul.f32 %v3926_v26, %v3926_v26  ;;  %v4097_v39 = vsel %vm339_vm0, %v3988_v63, 0.0  ;;  %v3612_v13 = vadd.s32 448, %v9129_v2  ;;  %v3928_v35 = vsel %vm3736_vm5, %v9139_v37, 0.0  ;;  %v9146_v26 = vld [vmem:[#allocation52_spill] sm:$0xff] }
 0x540   : > { %v4084_v33 = vadd.f32 %v4083_v12, %v4082_v3  ;;  %v3676_v45 = vadd.s32 %v8187_v46, %v3610_v42  ;;  %vm3738_vm7 = vcmp.lt.s32.totalorder %v3674_v22, 640  ;;  %v3991_v14 = vmul.f32 %v3927_v15, %v3927_v15  ;;  %v9141_v12 = vld [vmem:[#allocation50_spill] sm:$0xff] }
 0x541   : > { %v4099_v53 = vsel %vm339_vm0, %v3989_v56, 0.0  ;;  %v3613_v34 = vadd.s32 456, %v9129_v2  ;;  %v3929_v16 = vsel %vm3737_vm6, %v9140_v40, 0.0  ;;  %v3677_v28 = vadd.s32 %v8187_v46, %v3611_v55 }
 0x542   : > { %v4086_v1 = vadd.f32 %v4085_v30, %v4084_v33  ;;  %vm3739_vm8 = vcmp.lt.s32.totalorder %v3675_v29, 640  ;;  %v3992_v5 = vmul.f32 %v3928_v35, %v3928_v35  ;;  %v4101_v7 = vsel %vm339_vm0, %v3990_v41, 0.0 }
 0x543   : > { %v3614_v25 = vadd.s32 464, %v9129_v2  ;;  %v3930_v51 = vsel %vm3738_vm7, %v9141_v12, 0.0  ;;  %v3678_v3 = vadd.s32 %v8187_v46, %v3612_v13  ;;  %vm3740_vm9 = vcmp.lt.s32.totalorder %v3676_v45, 640  ;;  %v9148_v13 = vld [vmem:[#allocation53_spill] sm:$0xff]  ;;  %v9151_v12 = vld [vmem:[#allocation56_spill] sm:$0xff] }
 0x544   : > { %v4088_v52 = vadd.f32 %v4087_v61, %v4086_v1  ;;  %v3993_v19 = vmul.f32 %v3929_v16, %v3929_v16  ;;  %v4103_v9 = vsel %vm339_vm0, %v3991_v14, 0.0  ;;  %v3615_v30 = vadd.s32 472, %v9129_v2  ;;  %v9149_v14 = vld [vmem:[#allocation55_spill] sm:$0xff] }
 0x545   : > { %v3931_v17 = vsel %vm3739_vm8, %v9142_v31, 0.0  ;;  %v3679_v27 = vadd.s32 %v8187_v46, %v3613_v34  ;;  %vm3741_vm10 = vcmp.lt.s32.totalorder %v3677_v28, 640  ;;  %v3994_v60 = vmul.f32 %v3930_v51, %v3930_v51 }
 0x546   : > { %v4090_v57 = vadd.f32 %v4089_v23, %v4088_v52  ;;  %v4105_v61 = vsel %vm339_vm0, %v3992_v5, 0.0  ;;  %v3616_v32 = vadd.s32 480, %v9129_v2  ;;  %v3932_v1 = vsel %vm3740_vm9, %v9143_v38, 0.0 }
 0x547   : > { %v3680_v47 = vadd.s32 %v8187_v46, %v3614_v25  ;;  %vm3742_vm11 = vcmp.lt.s32.totalorder %v3678_v3, 640  ;;  %v3995_v23 = vmul.f32 %v3931_v17, %v3931_v17  ;;  %v4107_v21 = vsel %vm339_vm0, %v3993_v19, 0.0  ;;  %v9152_v19 = vld [vmem:[#allocation11_spill] sm:$0xff] }
 0x548   : > { %v4092_v20 = vadd.f32 %v4091_v11, %v4090_v57  ;;  %v3617_v24 = vadd.s32 488, %v9129_v2  ;;  %v3933_v52 = vsel %vm3741_vm10, %v9144_v50, 0.0  ;;  %v3681_v44 = vadd.s32 %v8187_v46, %v3615_v30 }
 0x549   : > { %vm3743_vm12 = vcmp.lt.s32.totalorder %v3679_v27, 640  ;;  %v3996_v11 = vmul.f32 %v3932_v1, %v3932_v1  ;;  %v4109_v43 = vsel %vm339_vm0, %v3994_v60, 0.0  ;;  %v3618_v0 = vadd.s32 496, %v9129_v2 }
 0x54a   : > { %v4094_v36 = vadd.f32 %v4093_v18, %v4092_v20  ;;  %v3934_v57 = vsel %vm3742_vm11, %v9145_v59, 0.0  ;;  %v3682_v63 = vadd.s32 %v8187_v46, %v3616_v32  ;;  %vm3744_vm2 = vcmp.lt.s32.totalorder %v3680_v47, 640 }
 0x54b   : > { %v3997_v18 = vmul.f32 %v3933_v52, %v3933_v52  ;;  %v4111_v42 = vsel %vm339_vm0, %v3995_v23, 0.0  ;;  %v3619_v58 = vadd.s32 504, %v9129_v2  ;;  %v3935_v20 = vsel %vm3743_vm12, %v9146_v26, 0.0 }
 0x54c   : > { %v4096_v10 = vadd.f32 %v4095_v54, %v4094_v36  ;;  %v3683_v56 = vadd.s32 %v8187_v46, %v3617_v24  ;;  %vm3745_vm13 = vcmp.lt.s32.totalorder %v3681_v44, 640  ;;  %v3998_v54 = vmul.f32 %v3934_v57, %v3934_v57 }
 0x54d   : > { %v4113_v55 = vsel %vm339_vm0, %v3996_v11, 0.0  ;;  %v3936_v15 = vsel %vm3744_vm2, %v9147_v6, 0.0  ;;  %v3684_v29 = vadd.s32 %v8187_v46, %v3618_v0  ;;  %vm3746_vm14 = vcmp.lt.s32.totalorder %v3682_v63, 640 }
 0x54e   : > { %v4098_v48 = vadd.f32 %v4097_v39, %v4096_v10  ;;  %v3999_v41 = vmul.f32 %v3935_v20, %v3935_v20  ;;  %v4115_v39 = vsel %vm339_vm0, %v3997_v18, 0.0  ;;  %v3937_v2 = vsel %vm3745_vm13, %v9148_v13, 0.0 }
 0x54f   : > { %v3685_v35 = vadd.s32 %v8187_v46, %v3619_v58  ;;  %vm3747_vm15 = vcmp.lt.s32.totalorder %v3683_v56, 640  ;;  %v4000_v10 = vmul.f32 %v3936_v15, %v3936_v15  ;;  %v4117_v45 = vsel %vm339_vm0, %v3998_v54, 0.0 }
 0x550   : > { %v4100_v4 = vadd.f32 %v4099_v53, %v4098_v48  ;;  %v3938_v53 = vsel %vm3746_vm14, %v9149_v14, 0.0  ;;  %vm3748_vm1 = vcmp.lt.s32.totalorder %v3684_v29, 640  ;;  %v4001_v40 = vmul.f32 %v3937_v2, %v3937_v2  ;;  %v9150_v48 = vld [vmem:[#allocation54_spill] sm:$0xff] }
 0x551   : > { %v4119_v16 = vsel %vm339_vm0, %v3999_v41, 0.0  ;;  %v3939_v28 = vsel %vm3747_vm15, %v9150_v48, 0.0  ;;  %vm3749_vm3 = vcmp.lt.s32.totalorder %v3685_v35, 640  ;;  %v4121_v25 = vsel %vm339_vm0, %v4000_v10, 0.0 }
 0x552   : > { %v4102_v33 = vadd.f32 %v4101_v7, %v4100_v4  ;;  %v4002_v7 = vmul.f32 %v3938_v53, %v3938_v53  ;;  %v3940_v46 = vsel %vm3748_vm1, %v9151_v12, 0.0  ;;  %v4003_v4 = vmul.f32 %v3939_v28, %v3939_v28 }
 0x553   : > { %v4123_v3 = vsel %vm339_vm0, %v4001_v40, 0.0  ;;  %v4004_v31 = vmul.f32 %v3940_v46, %v3940_v46  ;;  %vm4139_vm4 = vcmask 253952  }
 0x554   : > { %v4104_v49 = vadd.f32 %v4103_v9, %v4102_v33  ;;  %v3941_v9 = vsel %vm3749_vm3, %v9152_v19, 0.0  ;;  %v4125_v17 = vsel %vm339_vm0, %v4002_v7, 0.0  ;;  %v4127_v60 = vsel %vm339_vm0, %v4003_v4, 0.0 }
 0x555   : > { %v4005_v27 = vmul.f32 %v3941_v9, %v3941_v9  ;;  %v4129_v32 = vsel %vm339_vm0, %v4004_v31, 0.0 }
 0x556   : > { %v4106_v62 = vadd.f32 %v4105_v61, %v4104_v49 }
 0x557   : > { %v4131_v1 = vsel %vm339_vm0, %v4005_v27, 0.0 }
 0x558   : > { %v4108_v8 = vadd.f32 %v4107_v21, %v4106_v62 }
 0x55a   : > { %v4110_v22 = vadd.f32 %v4109_v43, %v4108_v8 }
 0x55c   : > { %v4112_v36 = vadd.f32 %v4111_v42, %v4110_v22 }
 0x55e   : > { %v4114_v37 = vadd.f32 %v4113_v55, %v4112_v36 }
 0x560   : > { %v4116_v34 = vadd.f32 %v4115_v39, %v4114_v37 }
 0x562   : > { %v4118_v5 = vadd.f32 %v4117_v45, %v4116_v34 }
 0x564   : > { %v4120_v51 = vadd.f32 %v4119_v16, %v4118_v5 }
 0x566   : > { %v4122_v30 = vadd.f32 %v4121_v25, %v4120_v51 }
 0x568   : > { %v4124_v33 = vadd.f32 %v4123_v3, %v4122_v30 }
 0x56a   : > { %v4126_v61 = vadd.f32 %v4125_v17, %v4124_v33 }
 0x56c   : > { %v4128_v38 = vadd.f32 %v4127_v60, %v4126_v61 }
 0x56e   : > { %v4130_v49 = vadd.f32 %v4129_v32, %v4128_v38 }
 0x570   : > { %v4132_v47 = vadd.f32 %v4131_v1, %v4130_v49 }
 0x572   : > { %v4133_v23 = vrot.slane %v4132_v47, 4 }
 0x574   : > { %v4134_v21 = vadd.f32 %v4133_v23, %v4132_v47 }
 0x576   : > { %v4135_v24 = vrot.slane %v4134_v21, 2 }
 0x578   : > { %v4136_v50 = vadd.f32 %v4135_v24, %v4134_v21 }
 0x57a   : > { %v4137_v52 = vrot.slane %v4136_v50, 1 }
 0x57c   : > { %v4138_v62 = vadd.f32 %v4137_v52, %v4136_v50 }
 0x57e   : > { %4140 = vst.msk [vmem:[%s7987_s25] sm:$0x1] %vm4139_vm4, %v4138_v62 }
 0x57f PF: > { %4156 = sbr.rel (!%p5755_p5) target bundleno = 1486 (0x5ce), region = 44  ;;  %s4158_s7 = ssub.s32 (%p5755_p5), 80, %s5775_s11 }
 0x580   : > { %s4937_s8 = sshll.u32 (%p5755_p5), %s5738_s22, 9  ;;  %p4159_p13 = scmp.lt.s32.totalorder (%p5755_p5), %s4158_s7, 64 }
 0x581   : > { %s9153_s3 = sld [smem:[#allocation97_spill]] (%p5755_p5) }
 0x586   : > { %s9166_s7 = smov (!%p4159_p13, %s4158_s7), 64 }
 0x587   : > { %s8453_s12 = scalar_lea.vmem %s9153_s3, %s4937_s8   ;;  %s4919_s13 = sshll.u32 %s9166_s7, 7 }
 0x588   : > { %p4922_p0 = scmp.eq.s32.totalorder %s4919_s13, 0 }
 0x589   : > { %s8459_s15 = sshrl.u32 (!%p4922_p0), %s9166_s7, 6 }
 0x58a   : > { %4167 = sbr.rel (%p4922_p0) target bundleno = 1486 (0x5ce), region = 48  ;;  %p4923_p1 = scmp.le.s32.totalorder (!%p4922_p0), %s8459_s15, 0 }
 0x591   : > { %4642 = sbr.rel (%p4923_p1) target bundleno = 1465 (0x5b9), region = 158  ;;  %s9154_s17 = smov (!%p4923_p1), %s8453_s12 }
 0x592   : > { %s9155_s26 = smov (!%p4923_p1), %s7655_s16  ;;  %s8468_s8 = smov (!%p4923_p1), 0  }
 0x593   : > { %s8470_s9 = smov (!%p4923_p1), 0  }
 0x598 LB: >> { %v4355_v44 = vld [vmem:[%s5657_s26] sm:$0xff]  ;;  %v4357_v11 = vld [vmem:[%s5657_s26 + $0x8] sm:$0xff]  ;;  %v4359_v43 = vld [vmem:[%s5657_s26 + $0x10] sm:$0xff]  ;;  %s4483_s10 = sadd.s32 1, %s5661_s8  ;;  %s4349_s9 = sadd.s32 1, %s5665_s9   ;;  %s5665_s9 = sphi %s8470_s9, %s4349_s9   ;;  %s5661_s8 = sphi %s8468_s8, %s9158_s8   ;;  %s5657_s26 = sphi %s9155_s26, %s9157_s26   ;;  %s5653_s17 = sphi %s9154_s17, %s9156_s17  }
 0x599   : >> { %4356 = vst [vmem:[%s5653_s17] sm:$0xff] %v4355_v44  ;;  %4358 = vst [vmem:[%s5653_s17 + $0x8] sm:$0xff] %v4357_v11  ;;  %v4361_v0 = vld [vmem:[%s5657_s26 + $0x18] sm:$0xff]  ;;  %v4363_v59 = vld [vmem:[%s5657_s26 + $0x20] sm:$0xff]  ;;  %p4484_p2 = scmp.ge.s32.totalorder %s4483_s10, %s8459_s15  ;;  %p4348_p3 = scmp.ge.s32.totalorder %s4349_s9, %s8459_s15 }
 0x59a   : >> { %4360 = vst [vmem:[%s5653_s17 + $0x10] sm:$0xff] %v4359_v43  ;;  %v4365_v57 = vld [vmem:[%s5657_s26 + $0x28] sm:$0xff]  ;;  %4362 = vst [vmem:[%s5653_s17 + $0x18] sm:$0xff] %v4361_v0  ;;  %v4367_v8 = vld [vmem:[%s5657_s26 + $0x30] sm:$0xff] }
 0x59b   : >> { %4364 = vst [vmem:[%s5653_s17 + $0x20] sm:$0xff] %v4363_v59  ;;  %4366 = vst [vmem:[%s5653_s17 + $0x28] sm:$0xff] %v4365_v57  ;;  %v4369_v63 = vld [vmem:[%s5657_s26 + $0x38] sm:$0xff]  ;;  %v4371_v18 = vld [vmem:[%s5657_s26 + $0x40] sm:$0xff]  ;;  %s9168_s10 = smov (%p4484_p2, %s4483_s10), 0 }
 0x59c   : >> { %4368 = vst [vmem:[%s5653_s17 + $0x30] sm:$0xff] %v4367_v8  ;;  %4370 = vst [vmem:[%s5653_s17 + $0x38] sm:$0xff] %v4369_v63  ;;  %v4373_v42 = vld [vmem:[%s5657_s26 + $0x48] sm:$0xff]  ;;  %v4375_v58 = vld [vmem:[%s5657_s26 + $0x50] sm:$0xff]  ;;  %s4924_s13 = sshll.u32 %s9168_s10, 9 }
 0x59d   : >> { %4372 = vst [vmem:[%s5653_s17 + $0x40] sm:$0xff] %v4371_v18  ;;  %v4377_v26 = vld [vmem:[%s5657_s26 + $0x58] sm:$0xff]  ;;  %4374 = vst [vmem:[%s5653_s17 + $0x48] sm:$0xff] %v4373_v42  ;;  %v4379_v20 = vld [vmem:[%s5657_s26 + $0x60] sm:$0xff]  ;;  %s8526_s8 = scalar_lea.vmem %s7655_s16, %s4924_s13 [#allocation2]   ;;  %s8529_s6 = scalar_lea.vmem %s8453_s12, %s4924_s13  }
 0x59e   : >> { %4376 = vst [vmem:[%s5653_s17 + $0x50] sm:$0xff] %v4375_v58  ;;  %4378 = vst [vmem:[%s5653_s17 + $0x58] sm:$0xff] %v4377_v26  ;;  %v4381_v22 = vld [vmem:[%s5657_s26 + $0x68] sm:$0xff]  ;;  %v4383_v56 = vld [vmem:[%s5657_s26 + $0x70] sm:$0xff] }
 0x59f   : >> { %4380 = vst [vmem:[%s5653_s17 + $0x60] sm:$0xff] %v4379_v20  ;;  %4382 = vst [vmem:[%s5653_s17 + $0x68] sm:$0xff] %v4381_v22  ;;  %v4385_v54 = vld [vmem:[%s5657_s26 + $0x78] sm:$0xff]  ;;  %v4387_v55 = vld [vmem:[%s5657_s26 + $0x80] sm:$0xff] }
 0x5a0   : >> { %4384 = vst [vmem:[%s5653_s17 + $0x70] sm:$0xff] %v4383_v56  ;;  %v4389_v6 = vld [vmem:[%s5657_s26 + $0x88] sm:$0xff]  ;;  %4386 = vst [vmem:[%s5653_s17 + $0x78] sm:$0xff] %v4385_v54  ;;  %v4391_v15 = vld [vmem:[%s5657_s26 + $0x90] sm:$0xff] }
 0x5a1   : >> { %4388 = vst [vmem:[%s5653_s17 + $0x80] sm:$0xff] %v4387_v55  ;;  %4390 = vst [vmem:[%s5653_s17 + $0x88] sm:$0xff] %v4389_v6  ;;  %v4393_v36 = vld [vmem:[%s5657_s26 + $0x98] sm:$0xff]  ;;  %v4395_v29 = vld [vmem:[%s5657_s26 + $0xa0] sm:$0xff] }
 0x5a2   : >> { %4392 = vst [vmem:[%s5653_s17 + $0x90] sm:$0xff] %v4391_v15  ;;  %4394 = vst [vmem:[%s5653_s17 + $0x98] sm:$0xff] %v4393_v36  ;;  %v4397_v41 = vld [vmem:[%s5657_s26 + $0xa8] sm:$0xff]  ;;  %v4399_v39 = vld [vmem:[%s5657_s26 + $0xb0] sm:$0xff] }
 0x5a3   : >> { %4396 = vst [vmem:[%s5653_s17 + $0xa0] sm:$0xff] %v4395_v29  ;;  %v4401_v13 = vld [vmem:[%s5657_s26 + $0xb8] sm:$0xff]  ;;  %4398 = vst [vmem:[%s5653_s17 + $0xa8] sm:$0xff] %v4397_v41  ;;  %v4403_v2 = vld [vmem:[%s5657_s26 + $0xc0] sm:$0xff] }
 0x5a4   : >> { %4400 = vst [vmem:[%s5653_s17 + $0xb0] sm:$0xff] %v4399_v39  ;;  %4402 = vst [vmem:[%s5653_s17 + $0xb8] sm:$0xff] %v4401_v13  ;;  %v4405_v37 = vld [vmem:[%s5657_s26 + $0xc8] sm:$0xff]  ;;  %v4407_v35 = vld [vmem:[%s5657_s26 + $0xd0] sm:$0xff] }
 0x5a5   : >> { %4404 = vst [vmem:[%s5653_s17 + $0xc0] sm:$0xff] %v4403_v2  ;;  %4406 = vst [vmem:[%s5653_s17 + $0xc8] sm:$0xff] %v4405_v37  ;;  %v4409_v10 = vld [vmem:[%s5657_s26 + $0xd8] sm:$0xff]  ;;  %v4411_v45 = vld [vmem:[%s5657_s26 + $0xe0] sm:$0xff] }
 0x5a6   : >> { %4408 = vst [vmem:[%s5653_s17 + $0xd0] sm:$0xff] %v4407_v35  ;;  %v4413_v14 = vld [vmem:[%s5657_s26 + $0xe8] sm:$0xff]  ;;  %4410 = vst [vmem:[%s5653_s17 + $0xd8] sm:$0xff] %v4409_v10  ;;  %v4415_v53 = vld [vmem:[%s5657_s26 + $0xf0] sm:$0xff] }
 0x5a7   : >> { %4412 = vst [vmem:[%s5653_s17 + $0xe0] sm:$0xff] %v4411_v45  ;;  %4414 = vst [vmem:[%s5653_s17 + $0xe8] sm:$0xff] %v4413_v14  ;;  %v4417_v34 = vld [vmem:[%s5657_s26 + $0xf8] sm:$0xff]  ;;  %v4419_v40 = vld [vmem:[%s5657_s26 + $0x100] sm:$0xff] }
 0x5a8   : >> { %4416 = vst [vmem:[%s5653_s17 + $0xf0] sm:$0xff] %v4415_v53  ;;  %4418 = vst [vmem:[%s5653_s17 + $0xf8] sm:$0xff] %v4417_v34  ;;  %v4421_v16 = vld [vmem:[%s5657_s26 + $0x108] sm:$0xff]  ;;  %v4423_v48 = vld [vmem:[%s5657_s26 + $0x110] sm:$0xff] }
 0x5a9   : >> { %4420 = vst [vmem:[%s5653_s17 + $0x100] sm:$0xff] %v4419_v40  ;;  %v4425_v28 = vld [vmem:[%s5657_s26 + $0x118] sm:$0xff]  ;;  %4422 = vst [vmem:[%s5653_s17 + $0x108] sm:$0xff] %v4421_v16  ;;  %v4427_v5 = vld [vmem:[%s5657_s26 + $0x120] sm:$0xff] }
 0x5aa   : >> { %4424 = vst [vmem:[%s5653_s17 + $0x110] sm:$0xff] %v4423_v48  ;;  %4426 = vst [vmem:[%s5653_s17 + $0x118] sm:$0xff] %v4425_v28  ;;  %v4429_v7 = vld [vmem:[%s5657_s26 + $0x128] sm:$0xff]  ;;  %v4431_v25 = vld [vmem:[%s5657_s26 + $0x130] sm:$0xff] }
 0x5ab   : >> { %4428 = vst [vmem:[%s5653_s17 + $0x120] sm:$0xff] %v4427_v5  ;;  %4430 = vst [vmem:[%s5653_s17 + $0x128] sm:$0xff] %v4429_v7  ;;  %v4433_v12 = vld [vmem:[%s5657_s26 + $0x138] sm:$0xff]  ;;  %v4435_v46 = vld [vmem:[%s5657_s26 + $0x140] sm:$0xff] }
 0x5ac   : >> { %4432 = vst [vmem:[%s5653_s17 + $0x130] sm:$0xff] %v4431_v25  ;;  %v4437_v51 = vld [vmem:[%s5657_s26 + $0x148] sm:$0xff]  ;;  %4434 = vst [vmem:[%s5653_s17 + $0x138] sm:$0xff] %v4433_v12  ;;  %v4439_v4 = vld [vmem:[%s5657_s26 + $0x150] sm:$0xff] }
 0x5ad   : >> { %4436 = vst [vmem:[%s5653_s17 + $0x140] sm:$0xff] %v4435_v46  ;;  %4438 = vst [vmem:[%s5653_s17 + $0x148] sm:$0xff] %v4437_v51  ;;  %v4441_v3 = vld [vmem:[%s5657_s26 + $0x158] sm:$0xff]  ;;  %v4443_v19 = vld [vmem:[%s5657_s26 + $0x160] sm:$0xff] }
 0x5ae   : >> { %4440 = vst [vmem:[%s5653_s17 + $0x150] sm:$0xff] %v4439_v4  ;;  %4442 = vst [vmem:[%s5653_s17 + $0x158] sm:$0xff] %v4441_v3  ;;  %v4445_v9 = vld [vmem:[%s5657_s26 + $0x168] sm:$0xff]  ;;  %v4447_v30 = vld [vmem:[%s5657_s26 + $0x170] sm:$0xff] }
 0x5af   : >> { %4444 = vst [vmem:[%s5653_s17 + $0x160] sm:$0xff] %v4443_v19  ;;  %v4449_v31 = vld [vmem:[%s5657_s26 + $0x178] sm:$0xff]  ;;  %4446 = vst [vmem:[%s5653_s17 + $0x168] sm:$0xff] %v4445_v9  ;;  %v4451_v17 = vld [vmem:[%s5657_s26 + $0x180] sm:$0xff] }
 0x5b0   : >> { %4448 = vst [vmem:[%s5653_s17 + $0x170] sm:$0xff] %v4447_v30  ;;  %4450 = vst [vmem:[%s5653_s17 + $0x178] sm:$0xff] %v4449_v31  ;;  %v4453_v33 = vld [vmem:[%s5657_s26 + $0x188] sm:$0xff]  ;;  %v4455_v27 = vld [vmem:[%s5657_s26 + $0x190] sm:$0xff] }
 0x5b1   : >> { %4452 = vst [vmem:[%s5653_s17 + $0x180] sm:$0xff] %v4451_v17  ;;  %4454 = vst [vmem:[%s5653_s17 + $0x188] sm:$0xff] %v4453_v33  ;;  %v4457_v60 = vld [vmem:[%s5657_s26 + $0x198] sm:$0xff]  ;;  %v4459_v61 = vld [vmem:[%s5657_s26 + $0x1a0] sm:$0xff] }
 0x5b2   : >> { %4456 = vst [vmem:[%s5653_s17 + $0x190] sm:$0xff] %v4455_v27  ;;  %v4461_v32 = vld [vmem:[%s5657_s26 + $0x1a8] sm:$0xff]  ;;  %4458 = vst [vmem:[%s5653_s17 + $0x198] sm:$0xff] %v4457_v60  ;;  %v4463_v38 = vld [vmem:[%s5657_s26 + $0x1b0] sm:$0xff]  ;;  %4351 = sbr.rel (!%p4348_p3) target bundleno = 1432 (0x598), region = 164 }
 0x5b3   : >> { %4460 = vst [vmem:[%s5653_s17 + $0x1a0] sm:$0xff] %v4459_v61  ;;  %4462 = vst [vmem:[%s5653_s17 + $0x1a8] sm:$0xff] %v4461_v32  ;;  %v4465_v1 = vld [vmem:[%s5657_s26 + $0x1b8] sm:$0xff]  ;;  %v4467_v49 = vld [vmem:[%s5657_s26 + $0x1c0] sm:$0xff] }
 0x5b4   : >> { %4464 = vst [vmem:[%s5653_s17 + $0x1b0] sm:$0xff] %v4463_v38  ;;  %4466 = vst [vmem:[%s5653_s17 + $0x1b8] sm:$0xff] %v4465_v1  ;;  %v4469_v47 = vld [vmem:[%s5657_s26 + $0x1c8] sm:$0xff]  ;;  %v4471_v23 = vld [vmem:[%s5657_s26 + $0x1d0] sm:$0xff] }
 0x5b5   : >> { %4468 = vst [vmem:[%s5653_s17 + $0x1c0] sm:$0xff] %v4467_v49  ;;  %v4473_v21 = vld [vmem:[%s5657_s26 + $0x1d8] sm:$0xff]  ;;  %4470 = vst [vmem:[%s5653_s17 + $0x1c8] sm:$0xff] %v4469_v47  ;;  %v4475_v24 = vld [vmem:[%s5657_s26 + $0x1e0] sm:$0xff] }
 0x5b6   : >> { %4472 = vst [vmem:[%s5653_s17 + $0x1d0] sm:$0xff] %v4471_v23  ;;  %4474 = vst [vmem:[%s5653_s17 + $0x1d8] sm:$0xff] %v4473_v21  ;;  %v4477_v50 = vld [vmem:[%s5657_s26 + $0x1e8] sm:$0xff]  ;;  %v4479_v52 = vld [vmem:[%s5657_s26 + $0x1f0] sm:$0xff] }
 0x5b7   : >> { %4476 = vst [vmem:[%s5653_s17 + $0x1e0] sm:$0xff] %v4475_v24  ;;  %4478 = vst [vmem:[%s5653_s17 + $0x1e8] sm:$0xff] %v4477_v50  ;;  %v4481_v62 = vld [vmem:[%s5657_s26 + $0x1f8] sm:$0xff]  ;;  %s9157_s26 = smov %s8526_s8  ;;  %s9158_s8 = smov %s9168_s10 }
 0x5b8   : >> { %4480 = vst [vmem:[%s5653_s17 + $0x1f0] sm:$0xff] %v4479_v52  ;;  %4482 = vst [vmem:[%s5653_s17 + $0x1f8] sm:$0xff] %v4481_v62  ;;  %s9156_s17 = smov %s8529_s6 }
 0x5b9 PF: > { %s8634_s13 = sand.u32 63, %s9166_s7   ;;  %s4938_s30 = sshll.u32 %s8459_s15, 9 }
 0x5ba   : > { %s4494_s0 = scalar_lea.vmem %s7655_s16, %s4938_s30 [#allocation2]   ;;  %s4496_s1 = scalar_lea.vmem %s8453_s12, %s4938_s30  }
 0x5bb   : > { %p4929_p4 = scmp.le.s32.totalorder %s8634_s13, 0 }
 0x5bc   : > { %s5667_s6 = smov (!%p4929_p4), %s4496_s1   ;;  %s5671_s2 = smov (!%p4929_p4), %s4494_s0  }
 0x5bd   : > { %4656 = sbr.rel (%p4929_p4) target bundleno = 1486 (0x5ce), region = 169  ;;  %s5675_s3 = smov (!%p4929_p4), 0  }
 0x5be   : > { %s5679_s10 = smov (!%p4929_p4), 0  }
 0x5c4 LB: >> { %v4506_v44 = vld [vmem:[%s5673_s2] sm:$0xff]  ;;  %s4508_s7 = sadd.s32 1, %s5677_s3  ;;  %s4500_s10 = sadd.s32 1, %s5681_s10   ;;  %s5681_s10 = sphi %s5679_s10, %s4500_s10   ;;  %s5677_s3 = sphi %s5675_s3, %s5676_s3   ;;  %s5673_s2 = sphi %s5671_s2, %s4513_s2   ;;  %s5669_s6 = sphi %s5667_s6, %s4514_s6  }
 0x5c5   : >> { %4507 = vst [vmem:[%s5669_s6] sm:$0xff] %v4506_v44  ;;  %p4509_p7 = scmp.ge.s32.totalorder %s4508_s7, %s8634_s13  ;;  %p4499_p8 = scmp.ge.s32.totalorder %s4500_s10, %s8634_s13 }
 0x5c7   : >> { %s9170_s7 = smov (%p4509_p7, %s4508_s7), 0  ;;  %4502 = sbr.rel (!%p4499_p8) target bundleno = 1476 (0x5c4), region = 175 }
 0x5c8   : >> { %s4930_s16 = sshll.u32 %s9170_s7, 3  ;;  %s5676_s3 = smov %s9170_s7  }
 0x5c9   : >> { %s4513_s2 = scalar_lea.vmem %s4494_s0, %s4930_s16 [#allocation2]   ;;  %s4514_s6 = scalar_lea.vmem %s4496_s1, %s4930_s16  }
 0x5ce PF: > { %s8646_s12 = scalar_lea.hbm %s8715_s4, %s5775_s11  ;;  %s4528_s15 = sshll.u32 %s7743_s23, 4  ;;  %s4529_s15 = int_to_ptr.vmem [resolvable:$true] %s4528_s15 }
 0x5cf   : > { %s4934_s17 = sshll.u32 %s5738_s22, 4  ;;  %s5523_s26 = scalar_lea.vmem %s4529_s15, 64 }
 0x5d0   : > { %p5524_p9 = scmp.ne.s32.totalorder %s4529_s15, %s5523_s26  ;;  %s5685_s0 = smov [#allocation3]  }
 0x5d1   : > { %s5527_s1 = sshll.u32 %s5685_s0, 4  ;;  %s5528_s1 = int_to_ptr.vmem [resolvable:$false] %s5527_s1 }
 0x5d2   : > { %p5525_p10 = pnand %p5524_p9, %p5755_p5  ;;  %s5529_s2 = scalar_lea.vmem %s5528_s1, 128 }
 0x5d3   : > { %p5530_p12 = scmp.lt.s32.totalorder %s4529_s15, %s5528_s1  ;;  %p5531_p13 = scmp.lt.s32.totalorder %s5529_s2, %s5523_s26 }
 0x5d4   : > { %p5526_p11 = pneg %p5525_p10 }
 0x5d5   : > { %p5532_p0 = por %p5531_p13, %p5530_p12 }
 0x5d7   : > { %p5533_p1 = pnand %p5532_p0, %p5526_p11 }
 0x5d9   : > { %5536 = shalt.err (!%p5533_p1)
}
 0x5da   : > { %s5537_s22 = scalar_lea.hbm %s8646_s12, 64  ;;  %s5541_s9 = scalar_lea.hbm %s8715_s4, 128 }
 0x5db   : > { %p5538_p2 = scmp.ne.s32.totalorder %s8646_s12, %s5537_s22  ;;  %p5542_p7 = scmp.lt.u32.totalorder %s8646_s12, %s8715_s4 }
 0x5dc   : > { %p5543_p8 = scmp.lt.u32.totalorder %s5541_s9, %s5537_s22  ;;  %p5545_p10 = scmp.lt.u32.totalorder %s5537_s22, %s8646_s12 }
 0x5dd   : > { %p5539_p3 = pnand %p5538_p2, %p5755_p5 }
 0x5de   : > { %p5544_p9 = por %p5543_p8, %p5542_p7 }
 0x5df   : > { %p5540_p4 = pneg %p5539_p3 }
 0x5e0   : > { %p5546_p11 = por %p5545_p10, %p5544_p9 }
 0x5e2   : > { %p5547_p12 = pnand %p5546_p11, %p5540_p4 }
 0x5e4   : > { %5550 = shalt.err (!%p5547_p12)
}
 0x5e5   : > { %s9159_s6 = scalar_lea.sflag [#allocation4], %s7651_s14  ;;  %s8672_s16 = scalar_lea.hbm %s8716_s5, %s4934_s17 }
 0x5e6   : > { %5349 = dma.vmem_to_hbm [thread:$0]  (%p5755_p5), %s4529_s15, 64, %s8646_s12, %s9159_s6  }
 0x5e7   : > { %s4541_s30 = sshll.u32 %s7987_s25, 4  ;;  %s5686_s26 = smov [#allocation5]   ;;  %s4542_s30 = int_to_ptr.vmem [resolvable:$true] %s4541_s30 }
 0x5e8   : > { %s5551_s3 = scalar_lea.vmem %s4542_s30, 16  ;;  %s5555_s0 = sshll.u32 %s5686_s26, 4  ;;  %s5556_s0 = int_to_ptr.vmem [resolvable:$false] %s5555_s0 }
 0x5e9   : > { %p5552_p13 = scmp.ne.s32.totalorder %s4542_s30, %s5551_s3  ;;  %s5557_s1 = scalar_lea.vmem %s5556_s0, 32 }
 0x5ea   : > { %p5558_p2 = scmp.lt.s32.totalorder %s4542_s30, %s5556_s0  ;;  %p5559_p3 = scmp.lt.s32.totalorder %s5557_s1, %s5551_s3 }
 0x5eb   : > { %p5553_p0 = pnand %p5552_p13, %p5755_p5 }
 0x5ec   : > { %p5560_p4 = por %p5559_p3, %p5558_p2 }
 0x5ed   : > { %p5554_p1 = pneg %p5553_p0 }
 0x5ef   : > { %p5561_p7 = pnand %p5560_p4, %p5554_p1 }
 0x5f1   : > { %5564 = shalt.err (!%p5561_p7)
}
 0x5f2   : > { %s5565_s25 = scalar_lea.hbm %s8672_s16, 16  ;;  %s5569_s17 = scalar_lea.hbm %s8716_s5, 32 }
 0x5f3   : > { %p5566_p8 = scmp.ne.s32.totalorder %s8672_s16, %s5565_s25  ;;  %p5570_p11 = scmp.lt.u32.totalorder %s8672_s16, %s8716_s5 }
 0x5f4   : > { %p5571_p12 = scmp.lt.u32.totalorder %s5569_s17, %s5565_s25  ;;  %p5573_p0 = scmp.lt.u32.totalorder %s5565_s25, %s8672_s16 }
 0x5f5   : > { %p5567_p9 = pnand %p5566_p8, %p5755_p5 }
 0x5f6   : > { %p5572_p13 = por %p5571_p12, %p5570_p11 }
 0x5f7   : > { %p5568_p10 = pneg %p5567_p9 }
 0x5f8   : > { %p5574_p1 = por %p5573_p0, %p5572_p13 }
 0x5fa   : > { %p5575_p2 = pnand %p5574_p1, %p5568_p10 }
 0x5fc   : > { %5578 = shalt.err (!%p5575_p2)
}
 0x5fd   : > { %s9160_s11 = scalar_lea.sflag [#allocation6], %s7651_s14 }
 0x5fe   : > { %5350 = dma.vmem_to_hbm [thread:$0]  (%p5755_p5), %s4542_s30, 16, %s8672_s16, %s9160_s11  }
 0x5ff PF: > { %p5360_p3 = scmp.ge.s32.totalorder %s5649_s21, 2  ;;  %s4560_s23 = sand.u32 1, %s5637_s18  }
 0x600   : > { %s4561_s9 = scalar_lea.sflag [#allocation4], %s4560_s23 }
 0x601   : > { %p5354_p4 = pnand %p5360_p3, %p5759_p6 }
 0x603   : > { %5628 = dma.done.wait (!%p5354_p4), %s4561_s9, 64  }
 0x604   : > { %5630 = vsyncadd (!%p5354_p4), %s4561_s9, 4294967232  ;;  %s4570_s8 = scalar_lea.sflag [#allocation6], %s4560_s23 }
 0x605   : > { %5632 = dma.done.wait (!%p5354_p4), %s4570_s8, 16  }
 0x606   : > { %5634 = vsyncadd (!%p5354_p4), %s4570_s8, 4294967280  ;;  %p19_p5 = scmp.ge.s32.totalorder %s5742_s24, 4   ;;  %s9161_s18 = smov %s5641_s19 }
 0x607   : > { %s9162_s19 = smov %s5645_s20  ;;  %s9163_s20 = smov %s5753_s27 }
 0x608   : > { %s9164_s21 = smov %s5742_s24  ;;  %21 = sbr.rel (!%p19_p5) target bundleno = 10 (0xa), region = 186 }
 0x60f   :  { %4574 = vsyncpa [#allocation4], 1 }
 0x610   :  { %4576 = vsyncpa [#allocation4 + $0x1], 1 }
 0x611   :  { %4577 = vsyncpa [#allocation6], 1 }
 0x612   :  { %4579 = vsyncpa [#allocation6 + $0x1], 1 }

</bundles_post_ra>
